<compile_context>
chip_gen: v7x
topology: tpu7x:2x2x1
jax: 0.10.0
libtpu: 0.0.40
codegen_flags: <defaults>
</compile_context>

<pallas_src>
import math
import functools

import jax
import jax.numpy as jnp
from jax import lax
from jax.experimental import pallas as pl
from jax.experimental.pallas import tpu as pltpu

LAYER_NORM_EPS = 1e-12                 # ViTConfig default layer_norm_eps


# ----------------------------------------------------------------------------
# per-generation tuning (v5e/v6e: 128 MiB VMEM; v7x: 64 MiB VMEM + bf16 EUP)
# ----------------------------------------------------------------------------
def _tpu_kind():
    try:
        for d in jax.devices():
            if d.platform == "tpu":
                return d.device_kind.lower()
    except Exception:
        pass
    return ""


_KIND = _tpu_kind()
# bf16 EUP (exp/erf throughput) exists on v6e and newer; stay exact f32 on older parts.
_HAS_BF16_EUP = bool(_KIND) and not any(t in _KIND for t in ("v2", "v3", "v4", "v5"))


def _detect_vmem_limit():
    """~75% of physical VMEM: 48 MiB on v7x, 96 MiB on the 128-MiB v5e/v6e parts."""
    try:
        cap = getattr(pltpu.get_tpu_info(), "vmem_capacity_bytes", None)
        if cap:
            return min(int(cap) * 3 // 4, 96 * 1024 * 1024)
    except Exception:
        pass
    if "7" in _KIND:                      # v7x: 64 MiB physical per TensorCore
        return 48 * 1024 * 1024
    return 64 * 1024 * 1024               # v5e / v6e: 128 MiB physical


VMEM_LIMIT = _detect_vmem_limit()


# ----------------------------------------------------------------------------
# shape helpers
# ----------------------------------------------------------------------------
def _round_up(n, m):
    return ((n + m - 1) // m) * m


def _pad_rows(x, rp):
    r = x.shape[0]
    if rp == r:
        return x
    return jnp.pad(x, ((0, rp - r), (0, 0)))


def _stream_row_tile(rp, sp, cap=512):
    """Largest multiple of the padded sequence Sp that divides Rp = B*Sp and is <= cap,
    so the QKV / MLP row grids need no per-layer padding or slicing."""
    b = rp // sp
    best = sp
    for k in range(1, b + 1):
        if b % k == 0 and k * sp <= cap:
            best = k * sp
    return best


def _mlp_inter_tile(d, inter):
    """Keep wi+w2 resident (single reduction step) when they fit the per-chip VMEM
    budget; otherwise tile the intermediate dimension."""
    if 4 * d * inter <= VMEM_LIMIT // 3:       # wi + w2 in bf16 + buffering slack
        return inter
    for c in (1024, 512, 256, 128):
        if inter % c == 0:
            return c
    return inter


# ----------------------------------------------------------------------------
# math helpers (shared by kernels and the pure-JAX reference)
# ----------------------------------------------------------------------------
def _layer_norm(x, g, b, eps=LAYER_NORM_EPS):
    x = x.astype(jnp.float32)
    mu = jnp.mean(x, axis=-1, keepdims=True)
    var = jnp.mean((x - mu) ** 2, axis=-1, keepdims=True)
    return (x - mu) * lax.rsqrt(var + eps) * g + b


def _gelu_exact(x):
    # HF ViT hidden_act="gelu" -> exact (erf-based) GELU
    return 0.5 * x * (1.0 + lax.erf(x * jnp.float32(1.0 / math.sqrt(2.0))))


# ----------------------------------------------------------------------------
# Kernel bodies
# ----------------------------------------------------------------------------
def _linear_kernel(x_ref, w_ref, b_ref, o_ref):
    acc = jnp.dot(x_ref[...], w_ref[...], preferred_element_type=jnp.float32)
    o_ref[...] = (acc + b_ref[...]).astype(o_ref.dtype)


def _ln_linear_kernel(x_ref, g_ref, b_ref, w_ref, bias_ref, o_ref):
    h = _layer_norm(x_ref[...], g_ref[...], b_ref[...]).astype(jnp.bfloat16)
    acc = jnp.dot(h, w_ref[...], preferred_element_type=jnp.float32)
    o_ref[...] = (acc + bias_ref[...]).astype(o_ref.dtype)


def _attn_fused_kernel(s_valid, sp, exp_dtype,
                       resid_ref, q_ref, kt_ref, v_ref, wo_ref, bo_ref, o_ref):
    # blocks: resid (Sp,D) f32 | q,v (1,H,Sp,dh) bf16 | kT (1,H,dh,Sp) bf16
    #         wo (H,dh,D) bf16 | bo (1,D) f32  ->  o (Sp,D) f32
    q = q_ref[0]
    kt = kt_ref[0]
    v = v_ref[0]

    # Q already carries the 1/sqrt(dh) scale (folded into Wq/bq at param prep);
    # K comes pre-transposed so this is a canonical-form MXU matmul (no rhs relayout).
    s = jnp.einsum("hqd,hdk->hqk", q, kt, preferred_element_type=jnp.float32)

    if sp != s_valid:                       # mask zero-padded key columns
        col = lax.broadcasted_iota(jnp.int32, (1, 1, sp), 2)
        s = s + jnp.where(col < s_valid, jnp.float32(0.0), jnp.float32(-1e30))

    m = jnp.max(s, axis=-1, keepdims=True)
    # exp in bf16 on chips with a bf16 EUP (v6e/v7x), f32 elsewhere (v5e and older).
    e = jnp.exp((s - m).astype(exp_dtype))
    # denominator stays f32; normalization is DEFERRED onto the (H,Sp,dh) context
    # instead of the (H,Sp,Sp) probabilities.
    denom = jnp.sum(e.astype(jnp.float32), axis=-1, keepdims=True)
    ctx = jnp.einsum("hqk,hkd->hqd", e.astype(jnp.bfloat16), v,
                     preferred_element_type=jnp.float32)
    ctx = (ctx * pl.reciprocal(denom)).astype(jnp.bfloat16)   # exact reciprocal

    # fused output projection (per-head Wo) + residual + bias; ctx never hits HBM.
    proj = jnp.einsum("hqd,hdn->hqn", ctx, wo_ref[...],
                      preferred_element_type=jnp.float32)
    o_ref[...] = resid_ref[...] + jnp.sum(proj, axis=0) + bo_ref[...]


def _mlp_kernel(apply_final_ln,
                x_ref, g_ref, b_ref, wi_ref, bi_ref, w2_ref, b2_ref,
                fg_ref, fb_ref, o_ref, h_scratch):
    k = pl.program_id(1)

    @pl.when(k == 0)
    def _():
        x = x_ref[...]
        h_scratch[...] = _layer_norm(x, g_ref[...], b_ref[...]).astype(jnp.bfloat16)
        o_ref[...] = x + b2_ref[...]          # residual + output bias (f32 accumulator)

    inter = jnp.dot(h_scratch[...], wi_ref[...],
                    preferred_element_type=jnp.float32) + bi_ref[...]
    # TODO(synk): exact f32 erf kept for HF parity; bf16 GELU is ~2x EUP on v6e/v7x.
    inter = _gelu_exact(inter).astype(jnp.bfloat16)
    o_ref[...] += jnp.dot(inter, w2_ref[...], preferred_element_type=jnp.float32)

    if apply_final_ln:                         # fused final encoder LayerNorm (last layer)
        @pl.when(k == pl.num_programs(1) - 1)
        def _():
            o_ref[...] = _layer_norm(o_ref[...], fg_ref[...], fb_ref[...])


# ----------------------------------------------------------------------------
# pallas_call wrappers
# ----------------------------------------------------------------------------
def linear(x, w, b, out_dtype=jnp.float32):
    """Row-tiled out = x @ w + b (bf16 operands, f32 accumulation). Used once for
    the patch embedding, so it keeps its own pad/slice."""
    M, K = x.shape
    N = w.shape[1]
    tm = min(512, _round_up(M, 8))
    Mp = _round_up(M, tm)
    xp = _pad_rows(x, Mp)
    out = pl.pallas_call(
        _linear_kernel,
        grid=(Mp // tm,),
        in_specs=[pl.BlockSpec((tm, K), lambda i: (i, 0)),
                  pl.BlockSpec((K, N), lambda i: (0, 0)),
                  pl.BlockSpec((1, N), lambda i: (0, 0))],
        out_specs=pl.BlockSpec((tm, N), lambda i: (i, 0)),
        out_shape=jax.ShapeDtypeStruct((Mp, N), out_dtype),
        compiler_params=pltpu.CompilerParams(
            dimension_semantics=("parallel",), vmem_limit_bytes=VMEM_LIMIT),
    )(xp, w, b)
    return out[:M]


def ln_linear(x, g, b, w, bias, tm):
    """Row-tiled out = LayerNorm(x) @ w + bias  (fused QKV projection, bf16 out)."""
    M, D = x.shape
    N = w.shape[1]
    assert M % tm == 0
    return pl.pallas_call(
        _ln_linear_kernel,
        grid=(M // tm,),
        in_specs=[pl.BlockSpec((tm, D), lambda i: (i, 0)),
                  pl.BlockSpec((1, D), lambda i: (0, 0)),
                  pl.BlockSpec((1, D), lambda i: (0, 0)),
                  pl.BlockSpec((D, N), lambda i: (0, 0)),
                  pl.BlockSpec((1, N), lambda i: (0, 0))],
        out_specs=pl.BlockSpec((tm, N), lambda i: (i, 0)),
        out_shape=jax.ShapeDtypeStruct((M, N), jnp.bfloat16),
        compiler_params=pltpu.CompilerParams(
            dimension_semantics=("parallel",), vmem_limit_bytes=VMEM_LIMIT),
    )(x, g, b, w, bias)


def attention_fused(rows, q, kt, v, wo_heads, bo, *, s_valid):
    """Per-batch fused attention core + output projection + residual.
    rows: (B*Sp, D) f32 residual stream; q/v: (B,H,Sp,dh) bf16; kt: (B,H,dh,Sp) bf16;
    wo_heads: (H,dh,D) bf16; output aliased onto `rows`."""
    B, H, Sp, dh = q.shape
    Rp, D = rows.shape
    assert Rp == B * Sp
    exp_dtype = jnp.bfloat16 if _HAS_BF16_EUP else jnp.float32
    kernel = functools.partial(_attn_fused_kernel, s_valid, Sp, exp_dtype)
    return pl.pallas_call(
        kernel,
        grid=(B,),
        in_specs=[pl.BlockSpec((Sp, D), lambda b: (b, 0)),               # residual rows
                  pl.BlockSpec((1, H, Sp, dh), lambda b: (b, 0, 0, 0)),  # q (pre-scaled)
                  pl.BlockSpec((1, H, dh, Sp), lambda b: (b, 0, 0, 0)),  # k^T
                  pl.BlockSpec((1, H, Sp, dh), lambda b: (b, 0, 0, 0)),  # v
                  pl.BlockSpec((H, dh, D), lambda b: (0, 0, 0)),         # Wo per head
                  pl.BlockSpec((1, D), lambda b: (0, 0))],               # bo
        out_specs=pl.BlockSpec((Sp, D), lambda b: (b, 0)),
        out_shape=jax.ShapeDtypeStruct((Rp, D), jnp.float32),
        input_output_aliases={0: 0},
        compiler_params=pltpu.CompilerParams(
            dimension_semantics=("parallel",), vmem_limit_bytes=VMEM_LIMIT),
    )(rows, q, kt, v, wo_heads, bo)


def mlp_block(x, g, b, wi, bi, w2, b2, final_g, final_b, apply_final_ln, tm):
    """Row-tiled (and, only if needed, intermediate-tiled):
       x + GELU(LN(x)@wi+bi)@w2 + b2  (+ fused final LayerNorm on the last layer)."""
    M, D = x.shape
    I = wi.shape[1]
    ti = _mlp_inter_tile(D, I)
    assert M % tm == 0 and I % ti == 0
    return pl.pallas_call(
        functools.partial(_mlp_kernel, apply_final_ln),
        grid=(M // tm, I // ti),
        in_specs=[pl.BlockSpec((tm, D), lambda i, k: (i, 0)),
                  pl.BlockSpec((1, D), lambda i, k: (0, 0)),
                  pl.BlockSpec((1, D), lambda i, k: (0, 0)),
                  pl.BlockSpec((D, ti), lambda i, k: (0, k)),
                  pl.BlockSpec((1, ti), lambda i, k: (0, k)),
                  pl.BlockSpec((ti, D), lambda i, k: (k, 0)),
                  pl.BlockSpec((1, D), lambda i, k: (0, 0)),
                  pl.BlockSpec((1, D), lambda i, k: (0, 0)),
                  pl.BlockSpec((1, D), lambda i, k: (0, 0))],
        out_specs=pl.BlockSpec((tm, D), lambda i, k: (i, 0)),
        out_shape=jax.ShapeDtypeStruct((M, D), jnp.float32),
        scratch_shapes=[pltpu.VMEM((tm, D), jnp.bfloat16)],
        input_output_aliases={0: 0},
        compiler_params=pltpu.CompilerParams(
            dimension_semantics=("parallel", "arbitrary"),
            vmem_limit_bytes=VMEM_LIMIT),
    )(x, g, b, wi, bi, w2, b2, final_g, final_b)


# ----------------------------------------------------------------------------
# layer / model glue
# ----------------------------------------------------------------------------
def vit_layer(rows, lp, *, batch, sp, s_valid, num_heads, tm,
              final_g, final_b, apply_final_ln):
    """One ViT encoder layer on the flattened (B*Sp, D) residual stream."""
    Rp, D = rows.shape
    dh = D // num_heads

    # 1) layernorm_before + fused QKV projection (Q pre-scaled by 1/sqrt(dh))
    qkv = ln_linear(rows, lp["ln1_g"], lp["ln1_b"], lp["wqkv"], lp["bqkv"], tm)

    # 2) head split in plain JAX; K fed pre-transposed so the in-kernel score matmul is
    #    canonical (no rhs relayout). The ctx-side merge transpose + HBM round trip is
    #    gone entirely (projection fused into the attention kernel).
    qkv = qkv.reshape(batch, sp, 3, num_heads, dh)
    q = qkv[:, :, 0].transpose(0, 2, 1, 3)           # (B, H, Sp, dh)
    kt = qkv[:, :, 1].transpose(0, 2, 3, 1)          # (B, H, dh, Sp)
    v = qkv[:, :, 2].transpose(0, 2, 1, 3)           # (B, H, Sp, dh)

    # 3) fused attention core + output projection + residual (aliased onto `rows`)
    rows = attention_fused(rows, q, kt, v, lp["wo_heads"], lp["bo"], s_valid=s_valid)

    # 4) layernorm_after + GELU MLP + residual (+ fused final LayerNorm on last layer)
    rows = mlp_block(rows, lp["ln2_g"], lp["ln2_b"], lp["wi"], lp["bi"],
                     lp["w2"], lp["b2"], final_g, final_b, apply_final_ln, tm)
    return rows


def _extract_patches(x_nchw, patch_size):
    B, C, H, W = x_nchw.shape
    P = patch_size
    hp, wp = H // P, W // P
    p = x_nchw.reshape(B, C, hp, P, wp, P)
    p = p.transpose(0, 2, 4, 1, 3, 5)            # (B, hp, wp, C, P, P)
    return p.reshape(B * hp * wp, C * P * P), hp * wp


def vit_encoder_forward(x_nchw, params, cfg):
    """Pallas implementation of ViTencoder(type='patch').forward -> last_hidden_state.
    `params` must be the PREPARED tree (scale-folded Q, per-head Wo)."""
    B = x_nchw.shape[0]
    D = cfg["hidden_size"]
    H = cfg["num_attention_heads"]
    nlayers = cfg["num_hidden_layers"]

    # patch embedding (stride=kernel Conv2d as a row-tiled matmul)
    patches, N = _extract_patches(x_nchw, cfg["patch_size"])
    pe = linear(patches.astype(jnp.bfloat16), params["patch_w"], params["patch_b"])
    pe = pe.reshape(B, N, D)

    cls = jnp.broadcast_to(params["cls"], (B, 1, D))
    h = jnp.concatenate([cls, pe], axis=1) + params["pos"]          # (B, S, D) f32
    S = N + 1

    # pad the sequence ONCE to a sublane-aligned Sp; padded key columns are masked
    # inside the attention kernel, so there are no per-layer pad/slice HBM copies.
    Sp = _round_up(S, 8)
    if Sp != S:
        h = jnp.pad(h, ((0, 0), (0, Sp - S), (0, 0)))
    Rp = B * Sp
    rows = h.reshape(Rp, D)
    tm = _stream_row_tile(Rp, Sp)

    for li, lp in enumerate(params["layers"]):
        rows = vit_layer(rows, lp, batch=B, sp=Sp, s_valid=S, num_heads=H, tm=tm,
                         final_g=params["ln_f_g"], final_b=params["ln_f_b"],
                         apply_final_ln=(li == nlayers - 1))

    return rows.reshape(B, Sp, D)[:, :S, :]


# ----------------------------------------------------------------------------
# deterministic synthetic parameters + one-time parameter prep
# ----------------------------------------------------------------------------
def init_params(key, cfg):
    D = cfg["hidden_size"]
    I = cfg["intermediate_size"]
    C = cfg["num_channels"]
    P = cfg["patch_size"]
    N = (cfg["image_size"] // P) ** 2
    S = N + 1
    K = C * P * P
    std = 0.02
    keys = iter(jax.random.split(key, 4 + 8 * cfg["num_hidden_layers"]))

    def w(shape, dtype=jnp.bfloat16):
        return (jax.random.normal(next(keys), shape, jnp.float32) * std).astype(dtype)

    params = {
        "patch_w": w((K, D)),                        # matmul weights stored bf16
        "patch_b": w((1, D), jnp.float32),
        "cls": w((1, 1, D), jnp.float32),
        "pos": w((1, S, D), jnp.float32),
        "ln_f_g": jnp.ones((1, D), jnp.float32),
        "ln_f_b": jnp.zeros((1, D), jnp.float32),
        "layers": [],
    }
    for _ in range(cfg["num_hidden_layers"]):
        params["layers"].append({
            "ln1_g": jnp.ones((1, D), jnp.float32),
            "ln1_b": jnp.zeros((1, D), jnp.float32),
            "wqkv": w((D, 3 * D)),                   # fused [Wq | Wk | Wv]
            "bqkv": w((1, 3 * D), jnp.float32),
            "wo": w((D, D)),
            "bo": w((1, D), jnp.float32),
            "ln2_g": jnp.ones((1, D), jnp.float32),
            "ln2_b": jnp.zeros((1, D), jnp.float32),
            "wi": w((D, I)),
            "bi": w((1, I), jnp.float32),
            "w2": w((I, D)),
            "b2": w((1, D), jnp.float32),
        })
    return params


def prepare_params(params, cfg):
    """One-time parameter prep: fold 1/sqrt(dh) into the Q projection and reshape Wo to a
    per-head (H, dh, D) layout for the fused attention kernel."""
    D = cfg["hidden_size"]
    H = cfg["num_attention_heads"]
    dh = D // H
    scale = 1.0 / math.sqrt(dh)
    prepped = dict(params)
    layers = []
    for lp in params["layers"]:
        lp = dict(lp)
        wqkv, bqkv = lp["wqkv"], lp["bqkv"]
        wq = (wqkv[:, :D].astype(jnp.float32) * scale).astype(wqkv.dtype)
        lp["wqkv"] = jnp.concatenate([wq, wqkv[:, D:]], axis=1)
        lp["bqkv"] = jnp.concatenate([bqkv[:, :D] * scale, bqkv[:, D:]], axis=1)
        lp["wo_heads"] = lp["wo"].reshape(H, dh, D)
        del lp["wo"]
        layers.append(lp)
    prepped["layers"] = layers
    return prepped


# ----------------------------------------------------------------------------
# pure-JAX reference (module semantics, raw params, no Pallas)
# ----------------------------------------------------------------------------
def reference_forward(x_nchw, params, cfg):
    B = x_nchw.shape[0]
    D = cfg["hidden_size"]
    H = cfg["num_attention_heads"]
    dh = D // H
    patches, N = _extract_patches(x_nchw, cfg["patch_size"])
    pe = jnp.dot(patches.astype(jnp.bfloat16), params["patch_w"],
                 preferred_element_type=jnp.float32) + params["patch_b"]
    pe = pe.reshape(B, N, D)
    cls = jnp.broadcast_to(params["cls"], (B, 1, D))
    h = jnp.concatenate([cls, pe], axis=1) + params["pos"]
    S = N + 1
    for lp in params["layers"]:
        hn = _layer_norm(h, lp["ln1_g"], lp["ln1_b"]).astype(jnp.bfloat16)
        qkv = (jnp.dot(hn, lp["wqkv"], preferred_element_type=jnp.float32)
               + lp["bqkv"]).astype(jnp.bfloat16)
        qkv = qkv.reshape(B, S, 3, H, dh).transpose(2, 0, 3, 1, 4)
        q, k, v = qkv[0], qkv[1], qkv[2]
        s = jnp.einsum("bhqd,bhkd->bhqk", q, k,
                       preferred_element_type=jnp.float32) / math.sqrt(dh)
        p = jax.nn.softmax(s, axis=-1).astype(jnp.bfloat16)
        ctx = jnp.einsum("bhqk,bhkd->bhqd", p, v,
                         preferred_element_type=jnp.float32).astype(jnp.bfloat16)
        ctx = ctx.transpose(0, 2, 1, 3).reshape(B, S, D)
        h = h + jnp.dot(ctx, lp["wo"], preferred_element_type=jnp.float32) + lp["bo"]
        hn2 = _layer_norm(h, lp["ln2_g"], lp["ln2_b"]).astype(jnp.bfloat16)
        inter = _gelu_exact(jnp.dot(hn2, lp["wi"],
                                    preferred_element_type=jnp.float32) + lp["bi"])
        h = h + jnp.dot(inter.astype(jnp.bfloat16), lp["w2"],
                        preferred_element_type=jnp.float32) + lp["b2"]
    return _layer_norm(h, params["ln_f_g"], params["ln_f_b"])


# ----------------------------------------------------------------------------
if __name__ == "__main__":
    # small ViT config consistent with the module's constructor arguments
    cfg = dict(
        hidden_size=32,
        num_hidden_layers=2,
        num_attention_heads=4,
        intermediate_size=64,
        image_size=16,
        patch_size=8,
        num_channels=3,
    )
    key = jax.random.PRNGKey(0)
    pkey, xkey = jax.random.split(key)
    params = init_params(pkey, cfg)                  # canonical (module-semantics) params
    prepared = prepare_params(params, cfg)           # scale-folded / per-head-Wo params

    # pixel input, NCHW like PyTorch: (batch=2, channels=3, 16, 16)
    x = jax.random.normal(
        xkey, (2, cfg["num_channels"], cfg["image_size"], cfg["image_size"]),
        dtype=jnp.float32)

    fwd = jax.jit(functools.partial(vit_encoder_forward, cfg=cfg))
    out = jax.block_until_ready(fwd(x, prepared))

    seq_len = (cfg["image_size"] // cfg["patch_size"]) ** 2 + 1
    assert out.shape == (2, seq_len, cfg["hidden_size"]), out.shape
    assert bool(jnp.all(jnp.isfinite(out)))

    ref = reference_forward(x, params, cfg)
    max_err = float(jnp.max(jnp.abs(out - ref)))
    assert max_err < 1e-2, f"mismatch vs reference: {max_err}"

    print("KERNEL_OK")
</pallas_src>

<mosaic_0001>
module attributes {stable_mosaic.version = 11 : i64} {
  func.func @_linear_kernel(%arg0: i32, %arg1: memref<8x192xbf16, #tpu.memory_space<vmem>>, %arg2: memref<192x32xbf16, #tpu.memory_space<vmem>>, %arg3: memref<1x32xf32, #tpu.memory_space<vmem>>, %arg4: memref<8x32xf32, #tpu.memory_space<vmem>>) attributes {dimension_semantics = [#tpu.dimension_semantics<parallel>], iteration_bounds = array<i64: 1>, scalar_prefetch = 0 : i64, scratch_operands = 0 : i64, tpu.core_type = #tpu.core_type<tc>, window_params = [{transform_indices = @transform_0, window_bounds = array<i64: 8, 192>}, {pipeline_mode = #tpu.pipeline_mode<synchronous>, transform_indices = @transform_1, window_bounds = array<i64: 192, 32>}, {pipeline_mode = #tpu.pipeline_mode<synchronous>, transform_indices = @transform_2, window_bounds = array<i64: 1, 32>}, {transform_indices = @transform_3, window_bounds = array<i64: 8, 32>}]} {
    %c0 = arith.constant 0 : index
    %c0_0 = arith.constant 0 : index
    %0 = vector.load %arg1[%c0, %c0_0] : memref<8x192xbf16, #tpu.memory_space<vmem>>, vector<8x192xbf16>
    %c0_1 = arith.constant 0 : index
    %c0_2 = arith.constant 0 : index
    %1 = vector.load %arg2[%c0_1, %c0_2] : memref<192x32xbf16, #tpu.memory_space<vmem>>, vector<192x32xbf16>
    %cst = arith.constant dense<0.000000e+00> : vector<8x32xf32>
    %2 = tpu.matmul %0, %1, %cst {dimension_numbers = #tpu.dot_dimension_numbers<[1], [0], [0], [1], [0, 0, 1, 1], [], []>} : vector<8x192xbf16>, vector<192x32xbf16>, vector<8x32xf32> -> vector<8x32xf32>
    %c0_3 = arith.constant 0 : index
    %c0_4 = arith.constant 0 : index
    %3 = vector.load %arg3[%c0_3, %c0_4] : memref<1x32xf32, #tpu.memory_space<vmem>>, vector<1x32xf32>
    %4 = vector.broadcast %3 : vector<1x32xf32> to vector<8x32xf32>
    %5 = arith.addf %2, %4 : vector<8x32xf32>
    %c0_5 = arith.constant 0 : index
    %c0_6 = arith.constant 0 : index
    %6 = vector.load %arg4[%c0_5, %c0_6] : memref<8x32xf32, #tpu.memory_space<vmem>>, vector<8x32xf32>
    tpu.vector_store %arg4[%c0_5, %c0_6], %5 {strides = array<i32>} : memref<8x32xf32, #tpu.memory_space<vmem>>, vector<8x32xf32>,
    return
  }
  func.func @transform_0(%arg0: i32) -> (i32, i32) {
    %c0_i32 = arith.constant 0 : i32
    %c0_i32_0 = arith.constant 0 : i32
    return %arg0, %c0_i32 : i32, i32
  }
  func.func @transform_1(%arg0: i32) -> (i32, i32) {
    %c0_i32 = arith.constant 0 : i32
    %c0_i32_0 = arith.constant 0 : i32
    %c0_i32_1 = arith.constant 0 : i32
    return %c0_i32, %c0_i32_0 : i32, i32
  }
  func.func @transform_2(%arg0: i32) -> (i32, i32) {
    %c0_i32 = arith.constant 0 : i32
    %c0_i32_0 = arith.constant 0 : i32
    %c0_i32_1 = arith.constant 0 : i32
    return %c0_i32, %c0_i32_0 : i32, i32
  }
  func.func @transform_3(%arg0: i32) -> (i32, i32) {
    %c0_i32 = arith.constant 0 : i32
    %c0_i32_0 = arith.constant 0 : i32
    return %arg0, %c0_i32 : i32, i32
  }
}

module attributes {stable_mosaic.version = 11 : i64} {
  func.func @_ln_linear_kernel(%arg0: i32, %arg1: memref<16x32xf32, #tpu.memory_space<vmem>>, %arg2: memref<1x32xf32, #tpu.memory_space<vmem>>, %arg3: memref<1x32xf32, #tpu.memory_space<vmem>>, %arg4: memref<32x96xbf16, #tpu.memory_space<vmem>>, %arg5: memref<1x96xf32, #tpu.memory_space<vmem>>, %arg6: memref<16x96xbf16, #tpu.memory_space<vmem>>) attributes {dimension_semantics = [#tpu.dimension_semantics<parallel>], iteration_bounds = array<i64: 1>, scalar_prefetch = 0 : i64, scratch_operands = 0 : i64, tpu.core_type = #tpu.core_type<tc>, window_params = [{transform_indices = @transform_0, window_bounds = array<i64: 16, 32>}, {pipeline_mode = #tpu.pipeline_mode<synchronous>, transform_indices = @transform_1, window_bounds = array<i64: 1, 32>}, {pipeline_mode = #tpu.pipeline_mode<synchronous>, transform_indices = @transform_2, window_bounds = array<i64: 1, 32>}, {pipeline_mode = #tpu.pipeline_mode<synchronous>, transform_indices = @transform_3, window_bounds = array<i64: 32, 96>}, {pipeline_mode = #tpu.pipeline_mode<synchronous>, transform_indices = @transform_4, window_bounds = array<i64: 1, 96>}, {transform_indices = @transform_5, window_bounds = array<i64: 16, 96>}]} {
    %c0 = arith.constant 0 : index
    %c0_0 = arith.constant 0 : index
    %0 = vector.load %arg1[%c0, %c0_0] : memref<16x32xf32, #tpu.memory_space<vmem>>, vector<16x32xf32>
    %c0_1 = arith.constant 0 : index
    %c0_2 = arith.constant 0 : index
    %1 = vector.load %arg2[%c0_1, %c0_2] : memref<1x32xf32, #tpu.memory_space<vmem>>, vector<1x32xf32>
    %c0_3 = arith.constant 0 : index
    %c0_4 = arith.constant 0 : index
    %2 = vector.load %arg3[%c0_3, %c0_4] : memref<1x32xf32, #tpu.memory_space<vmem>>, vector<1x32xf32>
    %cst = arith.constant dense<0.000000e+00> : vector<16xf32>
    %3 = vector.multi_reduction <add>, %0, %cst [1] : vector<16x32xf32> to vector<16xf32>
    %4 = vector.shape_cast %3 : vector<16xf32> to vector<16x1xf32>
    %cst_5 = arith.constant 3.200000e+01 : f32
    %5 = vector.broadcast %cst_5 : f32 to vector<16x1xf32>
    %6 = arith.divf %4, %5 : vector<16x1xf32>
    %7 = vector.broadcast %6 : vector<16x1xf32> to vector<16x32xf32>
    %8 = arith.subf %0, %7 : vector<16x32xf32>
    %9 = arith.mulf %8, %8 : vector<16x32xf32>
    %cst_6 = arith.constant dense<0.000000e+00> : vector<16xf32>
    %10 = vector.multi_reduction <add>, %9, %cst_6 [1] : vector<16x32xf32> to vector<16xf32>
    %11 = vector.shape_cast %10 : vector<16xf32> to vector<16x1xf32>
    %cst_7 = arith.constant 3.200000e+01 : f32
    %12 = vector.broadcast %cst_7 : f32 to vector<16x1xf32>
    %13 = arith.divf %11, %12 : vector<16x1xf32>
    %14 = vector.broadcast %6 : vector<16x1xf32> to vector<16x32xf32>
    %15 = arith.subf %0, %14 : vector<16x32xf32>
    %cst_8 = arith.constant 9.99999996E-13 : f32
    %16 = vector.broadcast %cst_8 : f32 to vector<16x1xf32>
    %17 = arith.addf %13, %16 : vector<16x1xf32>
    %18 = math.rsqrt %17 : vector<16x1xf32>
    %19 = vector.broadcast %18 : vector<16x1xf32> to vector<16x32xf32>
    %20 = arith.mulf %15, %19 : vector<16x32xf32>
    %21 = vector.broadcast %1 : vector<1x32xf32> to vector<16x32xf32>
    %22 = arith.mulf %20, %21 : vector<16x32xf32>
    %23 = vector.broadcast %2 : vector<1x32xf32> to vector<16x32xf32>
    %24 = arith.addf %22, %23 : vector<16x32xf32>
    %25 = arith.truncf %24 : vector<16x32xf32> to vector<16x32xbf16>
    %c0_9 = arith.constant 0 : index
    %c0_10 = arith.constant 0 : index
    %26 = vector.load %arg4[%c0_9, %c0_10] : memref<32x96xbf16, #tpu.memory_space<vmem>>, vector<32x96xbf16>
    %cst_11 = arith.constant dense<0.000000e+00> : vector<16x96xf32>
    %27 = tpu.matmul %25, %26, %cst_11 {dimension_numbers = #tpu.dot_dimension_numbers<[1], [0], [0], [1], [0, 0, 1, 1], [], []>} : vector<16x32xbf16>, vector<32x96xbf16>, vector<16x96xf32> -> vector<16x96xf32>
    %c0_12 = arith.constant 0 : index
    %c0_13 = arith.constant 0 : index
    %28 = vector.load %arg5[%c0_12, %c0_13] : memref<1x96xf32, #tpu.memory_space<vmem>>, vector<1x96xf32>
    %29 = vector.broadcast %28 : vector<1x96xf32> to vector<16x96xf32>
    %30 = arith.addf %27, %29 : vector<16x96xf32>
    %31 = arith.truncf %30 : vector<16x96xf32> to vector<16x96xbf16>
    %c0_14 = arith.constant 0 : index
    %c0_15 = arith.constant 0 : index
    %32 = vector.load %arg6[%c0_14, %c0_15] : memref<16x96xbf16, #tpu.memory_space<vmem>>, vector<16x96xbf16>
    tpu.vector_store %arg6[%c0_14, %c0_15], %31 {strides = array<i32>} : memref<16x96xbf16, #tpu.memory_space<vmem>>, vector<16x96xbf16>,
    return
  }
  func.func @transform_0(%arg0: i32) -> (i32, i32) {
    %c0_i32 = arith.constant 0 : i32
    %c0_i32_0 = arith.constant 0 : i32
    return %arg0, %c0_i32 : i32, i32
  }
  func.func @transform_1(%arg0: i32) -> (i32, i32) {
    %c0_i32 = arith.constant 0 : i32
    %c0_i32_0 = arith.constant 0 : i32
    %c0_i32_1 = arith.constant 0 : i32
    return %c0_i32, %c0_i32_0 : i32, i32
  }
  func.func @transform_2(%arg0: i32) -> (i32, i32) {
    %c0_i32 = arith.constant 0 : i32
    %c0_i32_0 = arith.constant 0 : i32
    %c0_i32_1 = arith.constant 0 : i32
    return %c0_i32, %c0_i32_0 : i32, i32
  }
  func.func @transform_3(%arg0: i32) -> (i32, i32) {
    %c0_i32 = arith.constant 0 : i32
    %c0_i32_0 = arith.constant 0 : i32
    %c0_i32_1 = arith.constant 0 : i32
    return %c0_i32, %c0_i32_0 : i32, i32
  }
  func.func @transform_4(%arg0: i32) -> (i32, i32) {
    %c0_i32 = arith.constant 0 : i32
    %c0_i32_0 = arith.constant 0 : i32
    %c0_i32_1 = arith.constant 0 : i32
    return %c0_i32, %c0_i32_0 : i32, i32
  }
  func.func @transform_5(%arg0: i32) -> (i32, i32) {
    %c0_i32 = arith.constant 0 : i32
    %c0_i32_0 = arith.constant 0 : i32
    return %arg0, %c0_i32 : i32, i32
  }
}

module attributes {stable_mosaic.version = 11 : i64} {
  func.func @_mlp_kernel(%arg0: i32, %arg1: i32, %arg2: memref<16x32xf32, #tpu.memory_space<vmem>>, %arg3: memref<1x32xf32, #tpu.memory_space<vmem>>, %arg4: memref<1x32xf32, #tpu.memory_space<vmem>>, %arg5: memref<32x64xbf16, #tpu.memory_space<vmem>>, %arg6: memref<1x64xf32, #tpu.memory_space<vmem>>, %arg7: memref<64x32xbf16, #tpu.memory_space<vmem>>, %arg8: memref<1x32xf32, #tpu.memory_space<vmem>>, %arg9: memref<1x32xf32, #tpu.memory_space<vmem>>, %arg10: memref<1x32xf32, #tpu.memory_space<vmem>>, %arg11: memref<16x32xf32, #tpu.memory_space<vmem>>, %arg12: memref<16x32xbf16, #tpu.memory_space<vmem>>) attributes {dimension_semantics = [#tpu.dimension_semantics<parallel>, #tpu.dimension_semantics<arbitrary>], iteration_bounds = array<i64: 1, 1>, scalar_prefetch = 0 : i64, scratch_operands = 1 : i64, tpu.core_type = #tpu.core_type<tc>, window_params = [{transform_indices = @transform_0, window_bounds = array<i64: 16, 32>}, {pipeline_mode = #tpu.pipeline_mode<synchronous>, transform_indices = @transform_1, window_bounds = array<i64: 1, 32>}, {pipeline_mode = #tpu.pipeline_mode<synchronous>, transform_indices = @transform_2, window_bounds = array<i64: 1, 32>}, {transform_indices = @transform_3, window_bounds = array<i64: 32, 64>}, {transform_indices = @transform_4, window_bounds = array<i64: 1, 64>}, {transform_indices = @transform_5, window_bounds = array<i64: 64, 32>}, {pipeline_mode = #tpu.pipeline_mode<synchronous>, transform_indices = @transform_6, window_bounds = array<i64: 1, 32>}, {pipeline_mode = #tpu.pipeline_mode<synchronous>, transform_indices = @transform_7, window_bounds = array<i64: 1, 32>}, {pipeline_mode = #tpu.pipeline_mode<synchronous>, transform_indices = @transform_8, window_bounds = array<i64: 1, 32>}, {transform_indices = @transform_9, window_bounds = array<i64: 16, 32>}]} {
    %c0_i32 = arith.constant 0 : i32
    %0 = arith.cmpi eq, %arg1, %c0_i32 : i32
    %1 = arith.extui %0 : i1 to i32
    %c0_i32_0 = arith.constant 0 : i32
    %2 = arith.cmpi ne, %1, %c0_i32_0 : i32
    scf.if %2 {
      %c0_16 = arith.constant 0 : index
      %c0_17 = arith.constant 0 : index
      %23 = vector.load %arg2[%c0_16, %c0_17] : memref<16x32xf32, #tpu.memory_space<vmem>>, vector<16x32xf32>
      %c0_18 = arith.constant 0 : index
      %c0_19 = arith.constant 0 : index
      %24 = vector.load %arg3[%c0_18, %c0_19] : memref<1x32xf32, #tpu.memory_space<vmem>>, vector<1x32xf32>
      %c0_20 = arith.constant 0 : index
      %c0_21 = arith.constant 0 : index
      %25 = vector.load %arg4[%c0_20, %c0_21] : memref<1x32xf32, #tpu.memory_space<vmem>>, vector<1x32xf32>
      %cst_22 = arith.constant dense<0.000000e+00> : vector<16xf32>
      %26 = vector.multi_reduction <add>, %23, %cst_22 [1] : vector<16x32xf32> to vector<16xf32>
      %27 = vector.shape_cast %26 : vector<16xf32> to vector<16x1xf32>
      %cst_23 = arith.constant 3.200000e+01 : f32
      %28 = vector.broadcast %cst_23 : f32 to vector<16x1xf32>
      %29 = arith.divf %27, %28 : vector<16x1xf32>
      %30 = vector.broadcast %29 : vector<16x1xf32> to vector<16x32xf32>
      %31 = arith.subf %23, %30 : vector<16x32xf32>
      %32 = arith.mulf %31, %31 : vector<16x32xf32>
      %cst_24 = arith.constant dense<0.000000e+00> : vector<16xf32>
      %33 = vector.multi_reduction <add>, %32, %cst_24 [1] : vector<16x32xf32> to vector<16xf32>
      %34 = vector.shape_cast %33 : vector<16xf32> to vector<16x1xf32>
      %cst_25 = arith.constant 3.200000e+01 : f32
      %35 = vector.broadcast %cst_25 : f32 to vector<16x1xf32>
      %36 = arith.divf %34, %35 : vector<16x1xf32>
      %37 = vector.broadcast %29 : vector<16x1xf32> to vector<16x32xf32>
      %38 = arith.subf %23, %37 : vector<16x32xf32>
      %cst_26 = arith.constant 9.99999996E-13 : f32
      %39 = vector.broadcast %cst_26 : f32 to vector<16x1xf32>
      %40 = arith.addf %36, %39 : vector<16x1xf32>
      %41 = math.rsqrt %40 : vector<16x1xf32>
      %42 = vector.broadcast %41 : vector<16x1xf32> to vector<16x32xf32>
      %43 = arith.mulf %38, %42 : vector<16x32xf32>
      %44 = vector.broadcast %24 : vector<1x32xf32> to vector<16x32xf32>
      %45 = arith.mulf %43, %44 : vector<16x32xf32>
      %46 = vector.broadcast %25 : vector<1x32xf32> to vector<16x32xf32>
      %47 = arith.addf %45, %46 : vector<16x32xf32>
      %48 = arith.truncf %47 : vector<16x32xf32> to vector<16x32xbf16>
      %c0_27 = arith.constant 0 : index
      %c0_28 = arith.constant 0 : index
      %49 = vector.load %arg12[%c0_27, %c0_28] : memref<16x32xbf16, #tpu.memory_space<vmem>>, vector<16x32xbf16>
      tpu.vector_store %arg12[%c0_27, %c0_28], %48 {strides = array<i32>} : memref<16x32xbf16, #tpu.memory_space<vmem>>, vector<16x32xbf16>,
      %c0_29 = arith.constant 0 : index
      %c0_30 = arith.constant 0 : index
      %50 = vector.load %arg8[%c0_29, %c0_30] : memref<1x32xf32, #tpu.memory_space<vmem>>, vector<1x32xf32>
      %51 = vector.broadcast %50 : vector<1x32xf32> to vector<16x32xf32>
      %52 = arith.addf %23, %51 : vector<16x32xf32>
      %c0_31 = arith.constant 0 : index
      %c0_32 = arith.constant 0 : index
      %53 = vector.load %arg11[%c0_31, %c0_32] : memref<16x32xf32, #tpu.memory_space<vmem>>, vector<16x32xf32>
      tpu.vector_store %arg11[%c0_31, %c0_32], %52 {strides = array<i32>} : memref<16x32xf32, #tpu.memory_space<vmem>>, vector<16x32xf32>,
    } else {
    }
    %c0 = arith.constant 0 : index
    %c0_1 = arith.constant 0 : index
    %3 = vector.load %arg12[%c0, %c0_1] : memref<16x32xbf16, #tpu.memory_space<vmem>>, vector<16x32xbf16>
    %c0_2 = arith.constant 0 : index
    %c0_3 = arith.constant 0 : index
    %4 = vector.load %arg5[%c0_2, %c0_3] : memref<32x64xbf16, #tpu.memory_space<vmem>>, vector<32x64xbf16>
    %cst = arith.constant dense<0.000000e+00> : vector<16x64xf32>
    %5 = tpu.matmul %3, %4, %cst {dimension_numbers = #tpu.dot_dimension_numbers<[1], [0], [0], [1], [0, 0, 1, 1], [], []>} : vector<16x32xbf16>, vector<32x64xbf16>, vector<16x64xf32> -> vector<16x64xf32>
    %c0_4 = arith.constant 0 : index
    %c0_5 = arith.constant 0 : index
    %6 = vector.load %arg6[%c0_4, %c0_5] : memref<1x64xf32, #tpu.memory_space<vmem>>, vector<1x64xf32>
    %7 = vector.broadcast %6 : vector<1x64xf32> to vector<16x64xf32>
    %8 = arith.addf %5, %7 : vector<16x64xf32>
    %cst_6 = arith.constant 5.000000e-01 : f32
    %9 = vector.broadcast %cst_6 : f32 to vector<16x64xf32>
    %10 = arith.mulf %9, %8 : vector<16x64xf32>
    %cst_7 = arith.constant 0.707106769 : f32
    %11 = vector.broadcast %cst_7 : f32 to vector<16x64xf32>
    %12 = arith.mulf %8, %11 : vector<16x64xf32>
    %13 = math.erf %12 : vector<16x64xf32>
    %cst_8 = arith.constant 1.000000e+00 : f32
    %14 = vector.broadcast %cst_8 : f32 to vector<16x64xf32>
    %15 = arith.addf %14, %13 : vector<16x64xf32>
    %16 = arith.mulf %10, %15 : vector<16x64xf32>
    %17 = arith.truncf %16 : vector<16x64xf32> to vector<16x64xbf16>
    %c0_9 = arith.constant 0 : index
    %c0_10 = arith.constant 0 : index
    %18 = vector.load %arg11[%c0_9, %c0_10] : memref<16x32xf32, #tpu.memory_space<vmem>>, vector<16x32xf32>
    %c0_11 = arith.constant 0 : index
    %c0_12 = arith.constant 0 : index
    %19 = vector.load %arg7[%c0_11, %c0_12] : memref<64x32xbf16, #tpu.memory_space<vmem>>, vector<64x32xbf16>
    %cst_13 = arith.constant dense<0.000000e+00> : vector<16x32xf32>
    %20 = tpu.matmul %17, %19, %cst_13 {dimension_numbers = #tpu.dot_dimension_numbers<[1], [0], [0], [1], [0, 0, 1, 1], [], []>} : vector<16x64xbf16>, vector<64x32xbf16>, vector<16x32xf32> -> vector<16x32xf32>
    %21 = arith.addf %18, %20 : vector<16x32xf32>
    %c0_14 = arith.constant 0 : index
    %c0_15 = arith.constant 0 : index
    %22 = vector.load %arg11[%c0_14, %c0_15] : memref<16x32xf32, #tpu.memory_space<vmem>>, vector<16x32xf32>
    tpu.vector_store %arg11[%c0_14, %c0_15], %21 {strides = array<i32>} : memref<16x32xf32, #tpu.memory_space<vmem>>, vector<16x32xf32>,
    return
  }
  func.func @transform_0(%arg0: i32, %arg1: i32) -> (i32, i32) {
    %c0_i32 = arith.constant 0 : i32
    %c0_i32_0 = arith.constant 0 : i32
    return %arg0, %c0_i32 : i32, i32
  }
  func.func @transform_1(%arg0: i32, %arg1: i32) -> (i32, i32) {
    %c0_i32 = arith.constant 0 : i32
    %c0_i32_0 = arith.constant 0 : i32
    %c0_i32_1 = arith.constant 0 : i32
    return %c0_i32, %c0_i32_0 : i32, i32
  }
  func.func @transform_2(%arg0: i32, %arg1: i32) -> (i32, i32) {
    %c0_i32 = arith.constant 0 : i32
    %c0_i32_0 = arith.constant 0 : i32
    %c0_i32_1 = arith.constant 0 : i32
    return %c0_i32, %c0_i32_0 : i32, i32
  }
  func.func @transform_3(%arg0: i32, %arg1: i32) -> (i32, i32) {
    %c0_i32 = arith.constant 0 : i32
    %c0_i32_0 = arith.constant 0 : i32
    return %c0_i32, %arg1 : i32, i32
  }
  func.func @transform_4(%arg0: i32, %arg1: i32) -> (i32, i32) {
    %c0_i32 = arith.constant 0 : i32
    %c0_i32_0 = arith.constant 0 : i32
    return %c0_i32, %arg1 : i32, i32
  }
  func.func @transform_5(%arg0: i32, %arg1: i32) -> (i32, i32) {
    %c0_i32 = arith.constant 0 : i32
    %c0_i32_0 = arith.constant 0 : i32
    return %arg1, %c0_i32 : i32, i32
  }
  func.func @transform_6(%arg0: i32, %arg1: i32) -> (i32, i32) {
    %c0_i32 = arith.constant 0 : i32
    %c0_i32_0 = arith.constant 0 : i32
    %c0_i32_1 = arith.constant 0 : i32
    return %c0_i32, %c0_i32_0 : i32, i32
  }
  func.func @transform_7(%arg0: i32, %arg1: i32) -> (i32, i32) {
    %c0_i32 = arith.constant 0 : i32
    %c0_i32_0 = arith.constant 0 : i32
    %c0_i32_1 = arith.constant 0 : i32
    return %c0_i32, %c0_i32_0 : i32, i32
  }
  func.func @transform_8(%arg0: i32, %arg1: i32) -> (i32, i32) {
    %c0_i32 = arith.constant 0 : i32
    %c0_i32_0 = arith.constant 0 : i32
    %c0_i32_1 = arith.constant 0 : i32
    return %c0_i32, %c0_i32_0 : i32, i32
  }
  func.func @transform_9(%arg0: i32, %arg1: i32) -> (i32, i32) {
    %c0_i32 = arith.constant 0 : i32
    %c0_i32_0 = arith.constant 0 : i32
    return %arg0, %c0_i32 : i32, i32
  }
}

module attributes {stable_mosaic.version = 11 : i64} {
  func.func @_attn_fused_kernel(%arg0: i32, %arg1: memref<8x32xf32, #tpu.memory_space<vmem>>, %arg2: memref<1x4x8x8xbf16, #tpu.memory_space<vmem>>, %arg3: memref<1x4x8x8xbf16, #tpu.memory_space<vmem>>, %arg4: memref<1x4x8x8xbf16, #tpu.memory_space<vmem>>, %arg5: memref<4x8x32xbf16, #tpu.memory_space<vmem>>, %arg6: memref<1x32xf32, #tpu.memory_space<vmem>>, %arg7: memref<8x32xf32, #tpu.memory_space<vmem>>) attributes {dimension_semantics = [#tpu.dimension_semantics<parallel>], iteration_bounds = array<i64: 2>, scalar_prefetch = 0 : i64, scratch_operands = 0 : i64, tpu.core_type = #tpu.core_type<tc>, window_params = [{transform_indices = @transform_0, window_bounds = array<i64: 8, 32>}, {transform_indices = @transform_1, window_bounds = array<i64: 1, 4, 8, 8>}, {transform_indices = @transform_2, window_bounds = array<i64: 1, 4, 8, 8>}, {transform_indices = @transform_3, window_bounds = array<i64: 1, 4, 8, 8>}, {pipeline_mode = #tpu.pipeline_mode<synchronous>, transform_indices = @transform_4, window_bounds = array<i64: 4, 8, 32>}, {pipeline_mode = #tpu.pipeline_mode<synchronous>, transform_indices = @transform_5, window_bounds = array<i64: 1, 32>}, {transform_indices = @transform_6, window_bounds = array<i64: 8, 32>}]} {
    %c0 = arith.constant 0 : index
    %c0_0 = arith.constant 0 : index
    %c0_1 = arith.constant 0 : index
    %c0_2 = arith.constant 0 : index
    %0 = vector.load %arg2[%c0, %c0_0, %c0_1, %c0_2] : memref<1x4x8x8xbf16, #tpu.memory_space<vmem>>, vector<1x4x8x8xbf16>
    %1 = vector.shape_cast %0 : vector<1x4x8x8xbf16> to vector<4x8x8xbf16>
    %c0_3 = arith.constant 0 : index
    %c0_4 = arith.constant 0 : index
    %c0_5 = arith.constant 0 : index
    %c0_6 = arith.constant 0 : index
    %2 = vector.load %arg3[%c0_3, %c0_4, %c0_5, %c0_6] : memref<1x4x8x8xbf16, #tpu.memory_space<vmem>>, vector<1x4x8x8xbf16>
    %3 = vector.shape_cast %2 : vector<1x4x8x8xbf16> to vector<4x8x8xbf16>
    %c0_7 = arith.constant 0 : index
    %c0_8 = arith.constant 0 : index
    %c0_9 = arith.constant 0 : index
    %c0_10 = arith.constant 0 : index
    %4 = vector.load %arg4[%c0_7, %c0_8, %c0_9, %c0_10] : memref<1x4x8x8xbf16, #tpu.memory_space<vmem>>, vector<1x4x8x8xbf16>
    %5 = vector.shape_cast %4 : vector<1x4x8x8xbf16> to vector<4x8x8xbf16>
    "tpu.trace_start"() <{level = 10 : i32, message = "hqd,hdk->hqk"}> : () -> ()
    %cst = arith.constant dense<0.000000e+00> : vector<4x8x8xf32>
    %6 = tpu.matmul %1, %3, %cst {dimension_numbers = #tpu.dot_dimension_numbers<[2], [1], [1], [2], [0, 0, 0, 1, 1, 2], [0], [0]>} : vector<4x8x8xbf16>, vector<4x8x8xbf16>, vector<4x8x8xf32> -> vector<4x8x8xf32>
    "tpu.trace_stop"() : () -> ()
    %7 = tpu.iota {dimensions = array<i32: 2>} : vector<1x1x8xi32>
    %c5_i32 = arith.constant 5 : i32
    %8 = vector.broadcast %c5_i32 : i32 to vector<1x1x8xi32>
    %9 = arith.cmpi slt, %7, %8 : vector<1x1x8xi32>
    %cst_11 = arith.constant 0.000000e+00 : f32
    %cst_12 = arith.constant -1.000000e+30 : f32
    %10 = vector.broadcast %cst_11 : f32 to vector<1x1x8xf32>
    %11 = vector.broadcast %cst_12 : f32 to vector<1x1x8xf32>
    %12 = arith.select %9, %10, %11 : vector<1x1x8xi1>, vector<1x1x8xf32>
    %13 = vector.broadcast %12 : vector<1x1x8xf32> to vector<4x8x8xf32>
    %14 = arith.addf %6, %13 : vector<4x8x8xf32>
    %cst_13 = arith.constant dense<0xFF800000> : vector<4x8xf32>
    %15 = vector.multi_reduction <maximumf>, %14, %cst_13 [2] : vector<4x8x8xf32> to vector<4x8xf32>
    %16 = vector.shape_cast %15 : vector<4x8xf32> to vector<4x8x1xf32>
    %17 = vector.broadcast %16 : vector<4x8x1xf32> to vector<4x8x8xf32>
    %18 = arith.subf %14, %17 : vector<4x8x8xf32>
    %19 = math.exp %18 : vector<4x8x8xf32>
    %cst_14 = arith.constant dense<0.000000e+00> : vector<4x8xf32>
    %20 = vector.multi_reduction <add>, %19, %cst_14 [2] : vector<4x8x8xf32> to vector<4x8xf32>
    %21 = vector.shape_cast %20 : vector<4x8xf32> to vector<4x8x1xf32>
    %22 = arith.truncf %19 : vector<4x8x8xf32> to vector<4x8x8xbf16>
    "tpu.trace_start"() <{level = 10 : i32, message = "hqk,hkd->hqd"}> : () -> ()
    %cst_15 = arith.constant dense<0.000000e+00> : vector<4x8x8xf32>
    %23 = tpu.matmul %22, %5, %cst_15 {dimension_numbers = #tpu.dot_dimension_numbers<[2], [1], [1], [2], [0, 0, 0, 1, 1, 2], [0], [0]>} : vector<4x8x8xbf16>, vector<4x8x8xbf16>, vector<4x8x8xf32> -> vector<4x8x8xf32>
    "tpu.trace_stop"() : () -> ()
    %24 = tpu.reciprocal %21 : vector<4x8x1xf32> -> vector<4x8x1xf32>
    %25 = vector.broadcast %24 : vector<4x8x1xf32> to vector<4x8x8xf32>
    %26 = arith.mulf %23, %25 : vector<4x8x8xf32>
    %27 = arith.truncf %26 : vector<4x8x8xf32> to vector<4x8x8xbf16>
    %c0_16 = arith.constant 0 : index
    %c0_17 = arith.constant 0 : index
    %c0_18 = arith.constant 0 : index
    %28 = vector.load %arg5[%c0_16, %c0_17, %c0_18] : memref<4x8x32xbf16, #tpu.memory_space<vmem>>, vector<4x8x32xbf16>
    "tpu.trace_start"() <{level = 10 : i32, message = "hqd,hdn->hqn"}> : () -> ()
    %cst_19 = arith.constant dense<0.000000e+00> : vector<4x8x32xf32>
    %29 = tpu.matmul %27, %28, %cst_19 {dimension_numbers = #tpu.dot_dimension_numbers<[2], [1], [1], [2], [0, 0, 0, 1, 1, 2], [0], [0]>} : vector<4x8x8xbf16>, vector<4x8x32xbf16>, vector<4x8x32xf32> -> vector<4x8x32xf32>
    "tpu.trace_stop"() : () -> ()
    %c0_20 = arith.constant 0 : index
    %c0_21 = arith.constant 0 : index
    %30 = vector.load %arg1[%c0_20, %c0_21] : memref<8x32xf32, #tpu.memory_space<vmem>>, vector<8x32xf32>
    %cst_22 = arith.constant dense<0.000000e+00> : vector<8x32xf32>
    %31 = vector.multi_reduction <add>, %29, %cst_22 [0] : vector<4x8x32xf32> to vector<8x32xf32>
    %32 = arith.addf %30, %31 : vector<8x32xf32>
    %c0_23 = arith.constant 0 : index
    %c0_24 = arith.constant 0 : index
    %33 = vector.load %arg6[%c0_23, %c0_24] : memref<1x32xf32, #tpu.memory_space<vmem>>, vector<1x32xf32>
    %34 = vector.broadcast %33 : vector<1x32xf32> to vector<8x32xf32>
    %35 = arith.addf %32, %34 : vector<8x32xf32>
    %c0_25 = arith.constant 0 : index
    %c0_26 = arith.constant 0 : index
    %36 = vector.load %arg7[%c0_25, %c0_26] : memref<8x32xf32, #tpu.memory_space<vmem>>, vector<8x32xf32>
    tpu.vector_store %arg7[%c0_25, %c0_26], %35 {strides = array<i32>} : memref<8x32xf32, #tpu.memory_space<vmem>>, vector<8x32xf32>,
    return
  }
  func.func @transform_0(%arg0: i32) -> (i32, i32) {
    %c0_i32 = arith.constant 0 : i32
    %c0_i32_0 = arith.constant 0 : i32
    return %arg0, %c0_i32 : i32, i32
  }
  func.func @transform_1(%arg0: i32) -> (i32, i32, i32, i32) {
    %c0_i32 = arith.constant 0 : i32
    %c0_i32_0 = arith.constant 0 : i32
    %c0_i32_1 = arith.constant 0 : i32
    %c0_i32_2 = arith.constant 0 : i32
    return %arg0, %c0_i32, %c0_i32_0, %c0_i32_1 : i32, i32, i32, i32
  }
  func.func @transform_2(%arg0: i32) -> (i32, i32, i32, i32) {
    %c0_i32 = arith.constant 0 : i32
    %c0_i32_0 = arith.constant 0 : i32
    %c0_i32_1 = arith.constant 0 : i32
    %c0_i32_2 = arith.constant 0 : i32
    return %arg0, %c0_i32, %c0_i32_0, %c0_i32_1 : i32, i32, i32, i32
  }
  func.func @transform_3(%arg0: i32) -> (i32, i32, i32, i32) {
    %c0_i32 = arith.constant 0 : i32
    %c0_i32_0 = arith.constant 0 : i32
    %c0_i32_1 = arith.constant 0 : i32
    %c0_i32_2 = arith.constant 0 : i32
    return %arg0, %c0_i32, %c0_i32_0, %c0_i32_1 : i32, i32, i32, i32
  }
  func.func @transform_4(%arg0: i32) -> (i32, i32, i32) {
    %c0_i32 = arith.constant 0 : i32
    %c0_i32_0 = arith.constant 0 : i32
    %c0_i32_1 = arith.constant 0 : i32
    %c0_i32_2 = arith.constant 0 : i32
    return %c0_i32, %c0_i32_0, %c0_i32_1 : i32, i32, i32
  }
  func.func @transform_5(%arg0: i32) -> (i32, i32) {
    %c0_i32 = arith.constant 0 : i32
    %c0_i32_0 = arith.constant 0 : i32
    %c0_i32_1 = arith.constant 0 : i32
    return %c0_i32, %c0_i32_0 : i32, i32
  }
  func.func @transform_6(%arg0: i32) -> (i32, i32) {
    %c0_i32 = arith.constant 0 : i32
    %c0_i32_0 = arith.constant 0 : i32
    return %arg0, %c0_i32 : i32, i32
  }
}

module attributes {stable_mosaic.version = 11 : i64} {
  func.func @_mlp_kernel(%arg0: i32, %arg1: i32, %arg2: memref<16x32xf32, #tpu.memory_space<vmem>>, %arg3: memref<1x32xf32, #tpu.memory_space<vmem>>, %arg4: memref<1x32xf32, #tpu.memory_space<vmem>>, %arg5: memref<32x64xbf16, #tpu.memory_space<vmem>>, %arg6: memref<1x64xf32, #tpu.memory_space<vmem>>, %arg7: memref<64x32xbf16, #tpu.memory_space<vmem>>, %arg8: memref<1x32xf32, #tpu.memory_space<vmem>>, %arg9: memref<1x32xf32, #tpu.memory_space<vmem>>, %arg10: memref<1x32xf32, #tpu.memory_space<vmem>>, %arg11: memref<16x32xf32, #tpu.memory_space<vmem>>, %arg12: memref<16x32xbf16, #tpu.memory_space<vmem>>) attributes {dimension_semantics = [#tpu.dimension_semantics<parallel>, #tpu.dimension_semantics<arbitrary>], iteration_bounds = array<i64: 1, 1>, scalar_prefetch = 0 : i64, scratch_operands = 1 : i64, tpu.core_type = #tpu.core_type<tc>, window_params = [{transform_indices = @transform_0, window_bounds = array<i64: 16, 32>}, {pipeline_mode = #tpu.pipeline_mode<synchronous>, transform_indices = @transform_1, window_bounds = array<i64: 1, 32>}, {pipeline_mode = #tpu.pipeline_mode<synchronous>, transform_indices = @transform_2, window_bounds = array<i64: 1, 32>}, {transform_indices = @transform_3, window_bounds = array<i64: 32, 64>}, {transform_indices = @transform_4, window_bounds = array<i64: 1, 64>}, {transform_indices = @transform_5, window_bounds = array<i64: 64, 32>}, {pipeline_mode = #tpu.pipeline_mode<synchronous>, transform_indices = @transform_6, window_bounds = array<i64: 1, 32>}, {pipeline_mode = #tpu.pipeline_mode<synchronous>, transform_indices = @transform_7, window_bounds = array<i64: 1, 32>}, {pipeline_mode = #tpu.pipeline_mode<synchronous>, transform_indices = @transform_8, window_bounds = array<i64: 1, 32>}, {transform_indices = @transform_9, window_bounds = array<i64: 16, 32>}]} {
    %c0_i32 = arith.constant 0 : i32
    %0 = arith.cmpi eq, %arg1, %c0_i32 : i32
    %1 = arith.extui %0 : i1 to i32
    %c0_i32_0 = arith.constant 0 : i32
    %2 = arith.cmpi ne, %1, %c0_i32_0 : i32
    scf.if %2 {
      %c0_18 = arith.constant 0 : index
      %c0_19 = arith.constant 0 : index
      %26 = vector.load %arg2[%c0_18, %c0_19] : memref<16x32xf32, #tpu.memory_space<vmem>>, vector<16x32xf32>
      %c0_20 = arith.constant 0 : index
      %c0_21 = arith.constant 0 : index
      %27 = vector.load %arg3[%c0_20, %c0_21] : memref<1x32xf32, #tpu.memory_space<vmem>>, vector<1x32xf32>
      %c0_22 = arith.constant 0 : index
      %c0_23 = arith.constant 0 : index
      %28 = vector.load %arg4[%c0_22, %c0_23] : memref<1x32xf32, #tpu.memory_space<vmem>>, vector<1x32xf32>
      %cst_24 = arith.constant dense<0.000000e+00> : vector<16xf32>
      %29 = vector.multi_reduction <add>, %26, %cst_24 [1] : vector<16x32xf32> to vector<16xf32>
      %30 = vector.shape_cast %29 : vector<16xf32> to vector<16x1xf32>
      %cst_25 = arith.constant 3.200000e+01 : f32
      %31 = vector.broadcast %cst_25 : f32 to vector<16x1xf32>
      %32 = arith.divf %30, %31 : vector<16x1xf32>
      %33 = vector.broadcast %32 : vector<16x1xf32> to vector<16x32xf32>
      %34 = arith.subf %26, %33 : vector<16x32xf32>
      %35 = arith.mulf %34, %34 : vector<16x32xf32>
      %cst_26 = arith.constant dense<0.000000e+00> : vector<16xf32>
      %36 = vector.multi_reduction <add>, %35, %cst_26 [1] : vector<16x32xf32> to vector<16xf32>
      %37 = vector.shape_cast %36 : vector<16xf32> to vector<16x1xf32>
      %cst_27 = arith.constant 3.200000e+01 : f32
      %38 = vector.broadcast %cst_27 : f32 to vector<16x1xf32>
      %39 = arith.divf %37, %38 : vector<16x1xf32>
      %40 = vector.broadcast %32 : vector<16x1xf32> to vector<16x32xf32>
      %41 = arith.subf %26, %40 : vector<16x32xf32>
      %cst_28 = arith.constant 9.99999996E-13 : f32
      %42 = vector.broadcast %cst_28 : f32 to vector<16x1xf32>
      %43 = arith.addf %39, %42 : vector<16x1xf32>
      %44 = math.rsqrt %43 : vector<16x1xf32>
      %45 = vector.broadcast %44 : vector<16x1xf32> to vector<16x32xf32>
      %46 = arith.mulf %41, %45 : vector<16x32xf32>
      %47 = vector.broadcast %27 : vector<1x32xf32> to vector<16x32xf32>
      %48 = arith.mulf %46, %47 : vector<16x32xf32>
      %49 = vector.broadcast %28 : vector<1x32xf32> to vector<16x32xf32>
      %50 = arith.addf %48, %49 : vector<16x32xf32>
      %51 = arith.truncf %50 : vector<16x32xf32> to vector<16x32xbf16>
      %c0_29 = arith.constant 0 : index
      %c0_30 = arith.constant 0 : index
      %52 = vector.load %arg12[%c0_29, %c0_30] : memref<16x32xbf16, #tpu.memory_space<vmem>>, vector<16x32xbf16>
      tpu.vector_store %arg12[%c0_29, %c0_30], %51 {strides = array<i32>} : memref<16x32xbf16, #tpu.memory_space<vmem>>, vector<16x32xbf16>,
      %c0_31 = arith.constant 0 : index
      %c0_32 = arith.constant 0 : index
      %53 = vector.load %arg8[%c0_31, %c0_32] : memref<1x32xf32, #tpu.memory_space<vmem>>, vector<1x32xf32>
      %54 = vector.broadcast %53 : vector<1x32xf32> to vector<16x32xf32>
      %55 = arith.addf %26, %54 : vector<16x32xf32>
      %c0_33 = arith.constant 0 : index
      %c0_34 = arith.constant 0 : index
      %56 = vector.load %arg11[%c0_33, %c0_34] : memref<16x32xf32, #tpu.memory_space<vmem>>, vector<16x32xf32>
      tpu.vector_store %arg11[%c0_33, %c0_34], %55 {strides = array<i32>} : memref<16x32xf32, #tpu.memory_space<vmem>>, vector<16x32xf32>,
    } else {
    }
    %c0 = arith.constant 0 : index
    %c0_1 = arith.constant 0 : index
    %3 = vector.load %arg12[%c0, %c0_1] : memref<16x32xbf16, #tpu.memory_space<vmem>>, vector<16x32xbf16>
    %c0_2 = arith.constant 0 : index
    %c0_3 = arith.constant 0 : index
    %4 = vector.load %arg5[%c0_2, %c0_3] : memref<32x64xbf16, #tpu.memory_space<vmem>>, vector<32x64xbf16>
    %cst = arith.constant dense<0.000000e+00> : vector<16x64xf32>
    %5 = tpu.matmul %3, %4, %cst {dimension_numbers = #tpu.dot_dimension_numbers<[1], [0], [0], [1], [0, 0, 1, 1], [], []>} : vector<16x32xbf16>, vector<32x64xbf16>, vector<16x64xf32> -> vector<16x64xf32>
    %c0_4 = arith.constant 0 : index
    %c0_5 = arith.constant 0 : index
    %6 = vector.load %arg6[%c0_4, %c0_5] : memref<1x64xf32, #tpu.memory_space<vmem>>, vector<1x64xf32>
    %7 = vector.broadcast %6 : vector<1x64xf32> to vector<16x64xf32>
    %8 = arith.addf %5, %7 : vector<16x64xf32>
    %cst_6 = arith.constant 5.000000e-01 : f32
    %9 = vector.broadcast %cst_6 : f32 to vector<16x64xf32>
    %10 = arith.mulf %9, %8 : vector<16x64xf32>
    %cst_7 = arith.constant 0.707106769 : f32
    %11 = vector.broadcast %cst_7 : f32 to vector<16x64xf32>
    %12 = arith.mulf %8, %11 : vector<16x64xf32>
    %13 = math.erf %12 : vector<16x64xf32>
    %cst_8 = arith.constant 1.000000e+00 : f32
    %14 = vector.broadcast %cst_8 : f32 to vector<16x64xf32>
    %15 = arith.addf %14, %13 : vector<16x64xf32>
    %16 = arith.mulf %10, %15 : vector<16x64xf32>
    %17 = arith.truncf %16 : vector<16x64xf32> to vector<16x64xbf16>
    %c0_9 = arith.constant 0 : index
    %c0_10 = arith.constant 0 : index
    %18 = vector.load %arg11[%c0_9, %c0_10] : memref<16x32xf32, #tpu.memory_space<vmem>>, vector<16x32xf32>
    %c0_11 = arith.constant 0 : index
    %c0_12 = arith.constant 0 : index
    %19 = vector.load %arg7[%c0_11, %c0_12] : memref<64x32xbf16, #tpu.memory_space<vmem>>, vector<64x32xbf16>
    %cst_13 = arith.constant dense<0.000000e+00> : vector<16x32xf32>
    %20 = tpu.matmul %17, %19, %cst_13 {dimension_numbers = #tpu.dot_dimension_numbers<[1], [0], [0], [1], [0, 0, 1, 1], [], []>} : vector<16x64xbf16>, vector<64x32xbf16>, vector<16x32xf32> -> vector<16x32xf32>
    %21 = arith.addf %18, %20 : vector<16x32xf32>
    %c0_14 = arith.constant 0 : index
    %c0_15 = arith.constant 0 : index
    %22 = vector.load %arg11[%c0_14, %c0_15] : memref<16x32xf32, #tpu.memory_space<vmem>>, vector<16x32xf32>
    tpu.vector_store %arg11[%c0_14, %c0_15], %21 {strides = array<i32>} : memref<16x32xf32, #tpu.memory_space<vmem>>, vector<16x32xf32>,
    %c0_i32_16 = arith.constant 0 : i32
    %23 = arith.cmpi eq, %arg1, %c0_i32_16 : i32
    %24 = arith.extui %23 : i1 to i32
    %c0_i32_17 = arith.constant 0 : i32
    %25 = arith.cmpi ne, %24, %c0_i32_17 : i32
    scf.if %25 {
      %c0_18 = arith.constant 0 : index
      %c0_19 = arith.constant 0 : index
      %26 = vector.load %arg11[%c0_18, %c0_19] : memref<16x32xf32, #tpu.memory_space<vmem>>, vector<16x32xf32>
      %c0_20 = arith.constant 0 : index
      %c0_21 = arith.constant 0 : index
      %27 = vector.load %arg9[%c0_20, %c0_21] : memref<1x32xf32, #tpu.memory_space<vmem>>, vector<1x32xf32>
      %c0_22 = arith.constant 0 : index
      %c0_23 = arith.constant 0 : index
      %28 = vector.load %arg10[%c0_22, %c0_23] : memref<1x32xf32, #tpu.memory_space<vmem>>, vector<1x32xf32>
      %cst_24 = arith.constant dense<0.000000e+00> : vector<16xf32>
      %29 = vector.multi_reduction <add>, %26, %cst_24 [1] : vector<16x32xf32> to vector<16xf32>
      %30 = vector.shape_cast %29 : vector<16xf32> to vector<16x1xf32>
      %cst_25 = arith.constant 3.200000e+01 : f32
      %31 = vector.broadcast %cst_25 : f32 to vector<16x1xf32>
      %32 = arith.divf %30, %31 : vector<16x1xf32>
      %33 = vector.broadcast %32 : vector<16x1xf32> to vector<16x32xf32>
      %34 = arith.subf %26, %33 : vector<16x32xf32>
      %35 = arith.mulf %34, %34 : vector<16x32xf32>
      %cst_26 = arith.constant dense<0.000000e+00> : vector<16xf32>
      %36 = vector.multi_reduction <add>, %35, %cst_26 [1] : vector<16x32xf32> to vector<16xf32>
      %37 = vector.shape_cast %36 : vector<16xf32> to vector<16x1xf32>
      %cst_27 = arith.constant 3.200000e+01 : f32
      %38 = vector.broadcast %cst_27 : f32 to vector<16x1xf32>
      %39 = arith.divf %37, %38 : vector<16x1xf32>
      %40 = vector.broadcast %32 : vector<16x1xf32> to vector<16x32xf32>
      %41 = arith.subf %26, %40 : vector<16x32xf32>
      %cst_28 = arith.constant 9.99999996E-13 : f32
      %42 = vector.broadcast %cst_28 : f32 to vector<16x1xf32>
      %43 = arith.addf %39, %42 : vector<16x1xf32>
      %44 = math.rsqrt %43 : vector<16x1xf32>
      %45 = vector.broadcast %44 : vector<16x1xf32> to vector<16x32xf32>
      %46 = arith.mulf %41, %45 : vector<16x32xf32>
      %47 = vector.broadcast %27 : vector<1x32xf32> to vector<16x32xf32>
      %48 = arith.mulf %46, %47 : vector<16x32xf32>
      %49 = vector.broadcast %28 : vector<1x32xf32> to vector<16x32xf32>
      %50 = arith.addf %48, %49 : vector<16x32xf32>
      %c0_29 = arith.constant 0 : index
      %c0_30 = arith.constant 0 : index
      %51 = vector.load %arg11[%c0_29, %c0_30] : memref<16x32xf32, #tpu.memory_space<vmem>>, vector<16x32xf32>
      tpu.vector_store %arg11[%c0_29, %c0_30], %50 {strides = array<i32>} : memref<16x32xf32, #tpu.memory_space<vmem>>, vector<16x32xf32>,
    } else {
    }
    return
  }
  func.func @transform_0(%arg0: i32, %arg1: i32) -> (i32, i32) {
    %c0_i32 = arith.constant 0 : i32
    %c0_i32_0 = arith.constant 0 : i32
    return %arg0, %c0_i32 : i32, i32
  }
  func.func @transform_1(%arg0: i32, %arg1: i32) -> (i32, i32) {
    %c0_i32 = arith.constant 0 : i32
    %c0_i32_0 = arith.constant 0 : i32
    %c0_i32_1 = arith.constant 0 : i32
    return %c0_i32, %c0_i32_0 : i32, i32
  }
  func.func @transform_2(%arg0: i32, %arg1: i32) -> (i32, i32) {
    %c0_i32 = arith.constant 0 : i32
    %c0_i32_0 = arith.constant 0 : i32
    %c0_i32_1 = arith.constant 0 : i32
    return %c0_i32, %c0_i32_0 : i32, i32
  }
  func.func @transform_3(%arg0: i32, %arg1: i32) -> (i32, i32) {
    %c0_i32 = arith.constant 0 : i32
    %c0_i32_0 = arith.constant 0 : i32
    return %c0_i32, %arg1 : i32, i32
  }
  func.func @transform_4(%arg0: i32, %arg1: i32) -> (i32, i32) {
    %c0_i32 = arith.constant 0 : i32
    %c0_i32_0 = arith.constant 0 : i32
    return %c0_i32, %arg1 : i32, i32
  }
  func.func @transform_5(%arg0: i32, %arg1: i32) -> (i32, i32) {
    %c0_i32 = arith.constant 0 : i32
    %c0_i32_0 = arith.constant 0 : i32
    return %arg1, %c0_i32 : i32, i32
  }
  func.func @transform_6(%arg0: i32, %arg1: i32) -> (i32, i32) {
    %c0_i32 = arith.constant 0 : i32
    %c0_i32_0 = arith.constant 0 : i32
    %c0_i32_1 = arith.constant 0 : i32
    return %c0_i32, %c0_i32_0 : i32, i32
  }
  func.func @transform_7(%arg0: i32, %arg1: i32) -> (i32, i32) {
    %c0_i32 = arith.constant 0 : i32
    %c0_i32_0 = arith.constant 0 : i32
    %c0_i32_1 = arith.constant 0 : i32
    return %c0_i32, %c0_i32_0 : i32, i32
  }
  func.func @transform_8(%arg0: i32, %arg1: i32) -> (i32, i32) {
    %c0_i32 = arith.constant 0 : i32
    %c0_i32_0 = arith.constant 0 : i32
    %c0_i32_1 = arith.constant 0 : i32
    return %c0_i32, %c0_i32_0 : i32, i32
  }
  func.func @transform_9(%arg0: i32, %arg1: i32) -> (i32, i32) {
    %c0_i32 = arith.constant 0 : i32
    %c0_i32_0 = arith.constant 0 : i32
    return %arg0, %c0_i32 : i32, i32
  }
}

</mosaic_0001>

<bundles_post_ra>
// kernel: vit_encoder_forward.7
= control target key start
LH: loop header
LB: loop body
LE: loop exit
PB: predicated region body
PF: predicated region fallthrough
CT: control target
= control target key end

     0   :  { %8 = vsyncpa [#allocation3], 0  ;;  %s431_s0 = inlined_call_operand.hbm [shape: bf16[8,192], index: 0, kind: input, shape index: {}]   ;;  %s432_s1 = inlined_call_operand.hbm [shape: bf16[192,32], index: 1, kind: input, shape index: {}]   ;;  %s433_s2 = inlined_call_operand.hbm [shape: f32[1,32], index: 2, kind: input, shape index: {}]   ;;  %s434_s3 = inlined_call_operand.hbm [shape: f32[8,32], index: 3, kind: output, shape index: {}]  }
   0x1   :  { %9 = vsyncpa [#allocation6], 0 }
   0x2   :  { %10 = vsyncpa [#allocation4], 0  ;;  %s356_s12 = smov [#allocation5]   ;;  %s262_s16 = scalar_lea.hbm %s432_s1, 1536 }
   0x3   :  { %s26_s13 = sshll.u32 %s356_s12, 4  ;;  %p263_p0 = scmp.ne.s32.totalorder %s432_s1, %s262_s16  ;;  %s27_s13 = int_to_ptr.vmem [resolvable:$true] %s26_s13 }
   0x4   :  { %p266_p1 = scmp.lt.u32.totalorder %s262_s16, %s432_s1 }
   0x6   :  { %p268_p2 = pnand %p266_p1, %p263_p0 }
   0x8   :  { %271 = shalt.err (!%p268_p2)
}
   0x9   :  { %s272_s21 = scalar_lea.vmem %s27_s13, 1536  ;;  %p277_p4 = scmp.lt.s32.totalorder %s27_s13, %s27_s13 }
   0xa   :  { %p273_p3 = scmp.ne.s32.totalorder %s27_s13, %s272_s21  ;;  %p278_p5 = scmp.lt.s32.totalorder %s272_s21, %s272_s21 }
   0xc   :  { %p279_p6 = por %p278_p5, %p277_p4 }
   0xe   :  { %p280_p7 = pnand %p279_p6, %p273_p3 }
  0x10   :  { %283 = shalt.err (!%p280_p7)
}
  0x11   :  { %s357_s22 = smov 64   ;;  %s358_s23 = smov 4  }
  0x12   :  { %32 = dma.hbm_to_vmem [thread:$0]  %s432_s1, 1536, %s27_s13, [#allocation6], %s357_s22, %s357_s22, %s358_s23  }
  0x13   :  { %s359_s26 = smov [#allocation2]   ;;  %s360_s28 = smov [#allocation7]  }
  0x14   :  { %s17_s27 = sshll.u32 %s359_s26, 4  ;;  %s39_s29 = sshll.u32 %s360_s28, 4  ;;  %s18_s27 = int_to_ptr.vmem [resolvable:$true] %s17_s27  ;;  %s40_s29 = int_to_ptr.vmem [resolvable:$true] %s39_s29 }
  0x15   :  { %s284_s5 = scalar_lea.hbm %s431_s0, 128 }
  0x16   :  { %p285_p8 = scmp.ne.s32.totalorder %s431_s0, %s284_s5  ;;  %p288_p9 = scmp.lt.u32.totalorder %s284_s5, %s431_s0 }
  0x18   :  { %p290_p10 = pnand %p288_p9, %p285_p8 }
  0x1a   :  { %293 = shalt.err (!%p290_p10)
}
  0x1b   :  { %s294_s1 = scalar_lea.vmem %s18_s27, 128  ;;  %p299_p12 = scmp.lt.s32.totalorder %s18_s27, %s18_s27 }
  0x1c   :  { %p295_p11 = scmp.ne.s32.totalorder %s18_s27, %s294_s1  ;;  %p300_p13 = scmp.lt.s32.totalorder %s294_s1, %s294_s1 }
  0x1e   :  { %p301_p0 = por %p300_p13, %p299_p12 }
  0x20   :  { %p302_p1 = pnand %p301_p0, %p295_p11 }
  0x22   :  { %305 = shalt.err (!%p302_p1)
}
  0x23   :  { %20 = dma.hbm_to_vmem [thread:$0]  %s431_s0, 128, %s18_s27, [#allocation3]  }
  0x24   :  { %s306_s14 = scalar_lea.hbm %s433_s2, 16 }
  0x25   :  { %p307_p2 = scmp.ne.s32.totalorder %s433_s2, %s306_s14  ;;  %p310_p3 = scmp.lt.u32.totalorder %s306_s14, %s433_s2 }
  0x27   :  { %p312_p4 = pnand %p310_p3, %p307_p2 }
  0x29   :  { %315 = shalt.err (!%p312_p4)
}
  0x2a   :  { %s316_s19 = scalar_lea.vmem %s40_s29, 16  ;;  %s320_s20 = scalar_lea.vmem %s40_s29, 32 }
  0x2b   :  { %p317_p5 = scmp.ne.s32.totalorder %s40_s29, %s316_s19  ;;  %p321_p6 = scmp.lt.s32.totalorder %s40_s29, %s40_s29 }
  0x2c   :  { %p322_p7 = scmp.lt.s32.totalorder %s320_s20, %s316_s19 }
  0x2e   :  { %p323_p8 = por %p322_p7, %p321_p6 }
  0x30   :  { %p324_p9 = pnand %p323_p8, %p317_p5 }
  0x32   :  { %327 = shalt.err (!%p324_p9)
}
  0x33   :  { %42 = dma.hbm_to_vmem [thread:$0]  %s433_s2, 16, %s40_s29, [#allocation6]  }
  0x34   :  { %350 = dma.done.wait [#allocation3], 128  }
  0x35   :  { %351 = vsyncadd [#allocation3], 4294967168 }
  0x36   :  { %352 = dma.done.wait [#allocation6], 1552  }
  0x37   :  { %353 = vsyncadd [#allocation6], 4294965744  ;;  %v361_v0 = vmov 0   ;;  %v248_v1 = vld [vmem:[#allocation5] sm:$0xff]   ;;  %v249_v2 = vld [vmem:[#allocation5 + $0x8] sm:$0xff]   ;;  %vm163_vm0 = vcmask 523264  }
  0x38   :  { %167 = vmatprep.subr.bf16.mxu0 %v361_v0  ;;  %v250_v3 = vld [vmem:[#allocation5 + $0x10] sm:$0xff]   ;;  %v251_v4 = vld [vmem:[#allocation5 + $0x18] sm:$0xff]   ;;  %v252_v7 = vld [vmem:[#allocation5 + $0x20] sm:$0xff]   ;;  %s362_s2 = smov [#allocation8]   ;;  %vm207_vm1 = vcmask 261120  }
  0x39   :  { %168 = vmatpush1.bf16.msra.mxu0 %v248_v1  ;;  %v53_v5 = vld [vmem:[#allocation2] sm:$0xff]  ;;  %v253_v8 = vld [vmem:[#allocation5 + $0x28] sm:$0xff]   ;;  %v254_v9 = vld [vmem:[#allocation5 + $0x30] sm:$0xff]   ;;  %s215_s22 = sshll.u32 %s362_s2, 4  ;;  %s216_s22 = int_to_ptr.vmem [resolvable:$true] %s215_s22 }
  0x3a   :  { %169 = vmatprep.subr.bf16.mxu0 %v361_v0  ;;  %v227_v6 = vcombine.high %v53_v5, %v53_v5  ;;  %v255_v10 = vld [vmem:[#allocation5 + $0x38] sm:$0xff]   ;;  %v256_v11 = vld [vmem:[#allocation5 + $0x40] sm:$0xff]   ;;  %v257_v12 = vld [vmem:[#allocation5 + $0x48] sm:$0xff]   ;;  %v226_v15 = vcombine.low %v53_v5, %v53_v5  ;;  %s328_s23 = scalar_lea.vmem %s216_s22, 128  ;;  %p333_p11 = scmp.lt.s32.totalorder %s216_s22, %s216_s22 }
  0x3b   :  { %v258_v13 = vld [vmem:[#allocation5 + $0x50] sm:$0xff]   ;;  %v259_v14 = vld [vmem:[#allocation5 + $0x58] sm:$0xff]   ;;  %v225_v16 = vld [vmem:[#allocation7] ss:$0 sm:$0xff]  ;;  %p329_p10 = scmp.ne.s32.totalorder %s216_s22, %s328_s23  ;;  %p334_p12 = scmp.lt.s32.totalorder %s328_s23, %s328_s23 }
  0x3c   :  { %240 = vmatprep.mubr.msk.bf16.mxu0 %vm163_vm0, %v227_v6 }
  0x3d   :  { %170 = vmatpush1.bf16.msra.mxu0 %v249_v2  ;;  %p335_p13 = por %p334_p12, %p333_p11 }
  0x3e   :  { %171 = vmatprep.subr.bf16.mxu0 %v361_v0 }
  0x3f   :  { %p336_p0 = pnand %p335_p13, %p329_p10 }
  0x41   :  { %172 = vmatpush1.bf16.msra.mxu0 %v250_v3 }
  0x42   :  { %173 = vmatprep.subr.bf16.mxu0 %v361_v0 }
  0x45   :  { %174 = vmatpush1.bf16.msra.mxu0 %v251_v4 }
  0x46   :  { %175 = vmatprep.subr.bf16.mxu0 %v361_v0 }
  0x49   :  { %176 = vmatpush1.bf16.msra.mxu0 %v252_v7 }
  0x4a   :  { %177 = vmatprep.subr.bf16.mxu0 %v361_v0 }
  0x4d   :  { %178 = vmatpush1.bf16.msra.mxu0 %v253_v8 }
  0x4e   :  { %179 = vmatprep.subr.bf16.mxu0 %v361_v0 }
  0x51   :  { %180 = vmatpush1.bf16.msra.mxu0 %v254_v9 }
  0x52   :  { %181 = vmatprep.subr.bf16.mxu0 %v361_v0 }
  0x55   :  { %182 = vmatpush1.bf16.msra.mxu0 %v255_v10 }
  0x56   :  { %183 = vmatprep.subr.bf16.mxu0 %v361_v0 }
  0x59   :  { %184 = vmatpush1.bf16.msra.mxu0 %v256_v11 }
  0x5a   :  { %185 = vmatprep.subr.bf16.mxu0 %v361_v0 }
  0x5d   :  { %186 = vmatpush1.bf16.msra.mxu0 %v257_v12 }
  0x5e   :  { %187 = vmatprep.subr.bf16.mxu0 %v361_v0 }
  0x61   :  { %188 = vmatpush1.bf16.msra.mxu0 %v258_v13 }
  0x62   :  { %189 = vmatprep.subr.bf16.mxu0 %v361_v0 }
  0x65   :  { %190 = vmatpush1.bf16.msra.mxu0 %v259_v14 }
  0x68   :  { %200 = vmatmul.mubr.bf16.vlgmr.msra.gmra.mrb[0].mxu0 %v226_v15 }
 0x13b   :  { %v201_v17 = vpop.f32.mrb[0].mxu0 }
 0x13c   :  { %v202_v18 = vadd.f32 %v225_v16, %v201_v17  ;;  %v203_v19 = vpop.f32.mrb[1].mxu0 }
 0x13d   :  { %v204_v20 = vpop.f32.mrb[2].mxu0 }
 0x13e   :  { %v205_v21 = vpop.f32.mrb[3].mxu0  ;;  %208 = vst.msk [vmem:[#allocation8] sm:$0xff] %vm207_vm1, %v202_v18 }
 0x13f   :  { %339 = shalt.err (!%p336_p0)
}
 0x140   :  { %s340_s26 = scalar_lea.hbm %s434_s3, 128 }
 0x141   :  { %p341_p1 = scmp.ne.s32.totalorder %s434_s3, %s340_s26  ;;  %p344_p2 = scmp.lt.u32.totalorder %s340_s26, %s434_s3 }
 0x143   :  { %p346_p3 = pnand %p344_p2, %p341_p1 }
 0x145   :  { %349 = shalt.err (!%p346_p3)
}
 0x146   :  { %218 = dma.vmem_to_hbm [thread:$0]  %s216_s22, 128, %s434_s3, [#allocation4]  }
 0x147   :  { %354 = dma.done.wait [#allocation4], 128  }
 0x148   :  { %355 = vsyncadd [#allocation4], 4294967168 }
 0x149   :  { %222 = vsyncpa [#allocation3], 1 }
 0x14a   :  { %223 = vsyncpa [#allocation6], 1 }
 0x14b   :  { %224 = vsyncpa [#allocation4], 1 }

// kernel: vit_encoder_forward.8
= control target key start
LH: loop header
LB: loop body
LE: loop exit
PB: predicated region body
PF: predicated region fallthrough
CT: control target
= control target key end

     0   :  { %10 = vsyncpa [#allocation3], 0  ;;  %s541_s0 = inlined_call_operand.hbm [shape: f32[16,32], index: 0, kind: input, shape index: {}]   ;;  %s542_s1 = inlined_call_operand.hbm [shape: f32[1,32], index: 1, kind: input, shape index: {}]   ;;  %s543_s2 = inlined_call_operand.hbm [shape: f32[1,32], index: 2, kind: input, shape index: {}]   ;;  %s544_s3 = inlined_call_operand.hbm [shape: bf16[32,96], index: 3, kind: input, shape index: {}]   ;;  %s545_s4 = inlined_call_operand.hbm [shape: f32[1,96], index: 4, kind: input, shape index: {}]   ;;  %s546_s5 = inlined_call_operand.hbm [shape: bf16[16,96], index: 5, kind: output, shape index: {}]  }
   0x1   :  { %11 = vsyncpa [#allocation6], 0 }
   0x2   :  { %12 = vsyncpa [#allocation9], 0 }
   0x3   :  { %13 = vsyncpa [#allocation4], 0  ;;  %s409_s18 = smov [#allocation5]   ;;  %s410_s20 = smov [#allocation8]  }
   0x4   :  { %s32_s19 = sshll.u32 %s409_s18, 4  ;;  %s51_s21 = sshll.u32 %s410_s20, 4  ;;  %s33_s19 = int_to_ptr.vmem [resolvable:$true] %s32_s19  ;;  %s451_s21 = int_to_ptr.vmem [resolvable:$true] %s51_s21 }
   0x5   :  { %s269_s24 = scalar_lea.hbm %s542_s1, 16 }
   0x6   :  { %p270_p0 = scmp.ne.s32.totalorder %s542_s1, %s269_s24  ;;  %p273_p1 = scmp.lt.u32.totalorder %s269_s24, %s542_s1 }
   0x8   :  { %p275_p2 = pnand %p273_p1, %p270_p0 }
   0xa   :  { %278 = shalt.err (!%p275_p2)
}
   0xb   :  { %s279_s29 = scalar_lea.vmem %s33_s19, 16  ;;  %s283_s30 = scalar_lea.vmem %s33_s19, 32 }
   0xc   :  { %p280_p3 = scmp.ne.s32.totalorder %s33_s19, %s279_s29  ;;  %p284_p4 = scmp.lt.s32.totalorder %s33_s19, %s33_s19 }
   0xd   :  { %p285_p5 = scmp.lt.s32.totalorder %s283_s30, %s279_s29 }
   0xf   :  { %p286_p6 = por %p285_p5, %p284_p4 }
  0x11   :  { %p287_p7 = pnand %p286_p6, %p280_p3 }
  0x13   :  { %290 = shalt.err (!%p287_p7)
}
  0x14   :  { %35 = dma.hbm_to_vmem [thread:$0]  %s542_s1, 16, %s33_s19, [#allocation6]  }
  0x15   :  { %s291_s10 = scalar_lea.hbm %s544_s3, 256 }
  0x16   :  { %p292_p8 = scmp.ne.s32.totalorder %s544_s3, %s291_s10  ;;  %p295_p9 = scmp.lt.u32.totalorder %s291_s10, %s544_s3 }
  0x18   :  { %p297_p10 = pnand %p295_p9, %p292_p8 }
  0x1a   :  { %300 = shalt.err (!%p297_p10)
}
  0x1b   :  { %s301_s15 = scalar_lea.vmem %s451_s21, 256  ;;  %p306_p12 = scmp.lt.s32.totalorder %s451_s21, %s451_s21 }
  0x1c   :  { %p302_p11 = scmp.ne.s32.totalorder %s451_s21, %s301_s15  ;;  %p307_p13 = scmp.lt.s32.totalorder %s301_s15, %s301_s15 }
  0x1e   :  { %p308_p0 = por %p307_p13, %p306_p12 }
  0x20   :  { %p309_p1 = pnand %p308_p0, %p302_p11 }
  0x22   :  { %312 = shalt.err (!%p309_p1)
}
  0x23   :  { %s411_s1 = smov 64   ;;  %s412_s16 = smov 4  }
  0x24   :  { %57 = dma.hbm_to_vmem [thread:$0]  %s544_s3, 256, %s451_s21, [#allocation9], %s411_s1, %s411_s1, %s412_s16  }
  0x25   :  { %s413_s19 = smov [#allocation2]   ;;  %s313_s24 = scalar_lea.hbm %s541_s0, 256 }
  0x26   :  { %s19_s20 = sshll.u32 %s413_s19, 4  ;;  %p314_p2 = scmp.ne.s32.totalorder %s541_s0, %s313_s24  ;;  %s20_s20 = int_to_ptr.vmem [resolvable:$true] %s19_s20 }
  0x27   :  { %p317_p3 = scmp.lt.u32.totalorder %s313_s24, %s541_s0 }
  0x29   :  { %p319_p4 = pnand %p317_p3, %p314_p2 }
  0x2b   :  { %322 = shalt.err (!%p319_p4)
}
  0x2c   :  { %s323_s29 = scalar_lea.vmem %s20_s20, 256  ;;  %p328_p6 = scmp.lt.s32.totalorder %s20_s20, %s20_s20 }
  0x2d   :  { %p324_p5 = scmp.ne.s32.totalorder %s20_s20, %s323_s29  ;;  %p329_p7 = scmp.lt.s32.totalorder %s323_s29, %s323_s29 }
  0x2f   :  { %p330_p8 = por %p329_p7, %p328_p6 }
  0x31   :  { %p331_p9 = pnand %p330_p8, %p324_p5 }
  0x33   :  { %334 = shalt.err (!%p331_p9)
}
  0x34   :  { %s414_s3 = smov 128   ;;  %s415_s21 = smov 8  }
  0x35   :  { %25 = dma.hbm_to_vmem [thread:$0]  %s541_s0, 256, %s20_s20, [#allocation3], %s414_s3, %s414_s3, %s415_s21  }
  0x36   :  { %s416_s7 = smov [#allocation7]   ;;  %s417_s9 = smov [#allocation10]  }
  0x37   :  { %s42_s8 = sshll.u32 %s416_s7, 4  ;;  %s64_s10 = sshll.u32 %s417_s9, 4  ;;  %s43_s8 = int_to_ptr.vmem [resolvable:$true] %s42_s8  ;;  %s65_s10 = int_to_ptr.vmem [resolvable:$true] %s64_s10 }
  0x38   :  { %s335_s13 = scalar_lea.hbm %s543_s2, 16 }
  0x39   :  { %p336_p10 = scmp.ne.s32.totalorder %s543_s2, %s335_s13  ;;  %p339_p11 = scmp.lt.u32.totalorder %s335_s13, %s543_s2 }
  0x3b   :  { %p341_p12 = pnand %p339_p11, %p336_p10 }
  0x3d   :  { %344 = shalt.err (!%p341_p12)
}
  0x3e   :  { %s345_s0 = scalar_lea.vmem %s43_s8, 16  ;;  %s349_s19 = scalar_lea.vmem %s43_s8, 32 }
  0x3f   :  { %p346_p13 = scmp.ne.s32.totalorder %s43_s8, %s345_s0  ;;  %p350_p0 = scmp.lt.s32.totalorder %s43_s8, %s43_s8 }
  0x40   :  { %p351_p1 = scmp.lt.s32.totalorder %s349_s19, %s345_s0 }
  0x42   :  { %p352_p2 = por %p351_p1, %p350_p0 }
  0x44   :  { %p353_p3 = pnand %p352_p2, %p346_p13 }
  0x46   :  { %356 = shalt.err (!%p353_p3)
}
  0x47   :  { %45 = dma.hbm_to_vmem [thread:$0]  %s543_s2, 16, %s43_s8, [#allocation6]  }
  0x48   :  { %s357_s25 = scalar_lea.hbm %s545_s4, 16 }
  0x49   :  { %p358_p4 = scmp.ne.s32.totalorder %s545_s4, %s357_s25  ;;  %p361_p5 = scmp.lt.u32.totalorder %s357_s25, %s545_s4 }
  0x4b   :  { %p363_p6 = pnand %p361_p5, %p358_p4 }
  0x4d   :  { %366 = shalt.err (!%p363_p6)
}
  0x4e   :  { %s367_s3 = scalar_lea.vmem %s65_s10, 16  ;;  %s371_s21 = scalar_lea.vmem %s65_s10, 32 }
  0x4f   :  { %p368_p7 = scmp.ne.s32.totalorder %s65_s10, %s367_s3  ;;  %p372_p8 = scmp.lt.s32.totalorder %s65_s10, %s65_s10 }
  0x50   :  { %p373_p9 = scmp.lt.s32.totalorder %s371_s21, %s367_s3 }
  0x52   :  { %p374_p10 = por %p373_p9, %p372_p8 }
  0x54   :  { %p375_p11 = pnand %p374_p10, %p368_p7 }
  0x56   :  { %378 = shalt.err (!%p375_p11)
}
  0x57   :  { %67 = dma.hbm_to_vmem [thread:$0]  %s545_s4, 16, %s65_s10, [#allocation9]  }
  0x58   :  { %401 = dma.done.wait [#allocation3], 256  }
  0x59   :  { %402 = vsyncadd [#allocation3], 4294967040 }
  0x5a   :  { %403 = dma.done.wait [#allocation6], 32  }
  0x5b   :  { %404 = vsyncadd [#allocation6], 4294967264 }
  0x5c   :  { %405 = dma.done.wait [#allocation9], 272  }
  0x5d   :  { %406 = vsyncadd [#allocation9], 4294967024  ;;  %vm88_vm0 = vcmask 261120   ;;  %v84_v0 = vld [vmem:[#allocation2] sm:$0xff]  ;;  %v85_v1 = vld [vmem:[#allocation2 + $0x8] sm:$0xff]  ;;  %v418_v15 = vmov 0.0  }
  0x5e   :  { %v89_v2 = vsel %vm88_vm0, %v84_v0, 0.0  ;;  %v92_v3 = vsel %vm88_vm0, %v85_v1, 0.0  ;;  %v263_v14 = vld [vmem:[#allocation8] sm:$0xff]   ;;  %243 = vmatprep.subr.bf16.mxu0 %v418_v15  ;;  %v264_v16 = vld [vmem:[#allocation8 + $0x8] sm:$0xff]   ;;  %vm419_vm1 = vmmov 0   ;;  %vm208_vm2 = vcmask 781312  }
  0x5f   :  { %90 = vadd.xlane.f32.xlu0 %v89_v2  ;;  %244 = vmatpush3.bf16.msra.mxu0 %v263_v14  ;;  %v230_v25 = vld [vmem:[#allocation5] ss:$0 sm:$0xff]  ;;  %v231_v29 = vld [vmem:[#allocation7] ss:$0 sm:$0xff]  ;;  %v232_v34 = vld [vmem:[#allocation10] ss:$0 sm:$0xff] }
  0x60   :  { %247 = vmatprep.mubr.msk.bf16.mxu0 %vm419_vm1, %v418_v15  ;;  %245 = vmatprep.subr.bf16.mxu0 %v418_v15  ;;  %s420_s4 = smov [#allocation11]  }
  0x61   :  { %s216_s6 = sshll.u32 %s420_s4, 4  ;;  %s217_s6 = int_to_ptr.vmem [resolvable:$true] %s216_s6 }
  0x62   :  { %s379_s7 = scalar_lea.vmem %s217_s6, 128  ;;  %p384_p13 = scmp.lt.s32.totalorder %s217_s6, %s217_s6 }
  0x63   :  { %93 = vadd.xlane.f32.xlu0 %v92_v3  ;;  %246 = vmatpush3.bf16.msra.mxu0 %v264_v16  ;;  %p380_p12 = scmp.ne.s32.totalorder %s217_s6, %s379_s7  ;;  %p385_p0 = scmp.lt.s32.totalorder %s379_s7, %s379_s7 }
  0x65   :  { %p386_p1 = por %p385_p0, %p384_p13 }
  0x67   :  { %p387_p2 = pnand %p386_p1, %p380_p12 }
  0xec   :  { %v91_v4 = vpop.xlane.xlu0 %90 }
  0xed   :  { %v96_v5 = vmul.f32 0.03125, %v91_v4 }
  0xef   :  { %v98_v6 = vsub.f32 %v84_v0, %v96_v5 }
  0xf0   :  { %v94_v7 = vpop.xlane.xlu0 %93 }
  0xf1   :  { %v97_v8 = vmul.f32 0.03125, %v94_v7  ;;  %v100_v9 = vmul.f32 %v98_v6, %v98_v6 }
  0xf3   :  { %v99_v10 = vsub.f32 %v85_v1, %v97_v8  ;;  %v102_v11 = vsel %vm88_vm0, %v100_v9, 0.0 }
  0xf4   :  { %103 = vadd.xlane.f32.xlu1 %v102_v11 }
  0xf5   :  { %v101_v12 = vmul.f32 %v99_v10, %v99_v10 }
  0xf7   :  { %v105_v13 = vsel %vm88_vm0, %v101_v12, 0.0 }
  0xf8   :  { %106 = vadd.xlane.f32.xlu1 %v105_v13 }
 0x181   :  { %v104_v17 = vpop.xlane.xlu1 %103 }
 0x182   :  { %v108_v18 = vmul.f32 0.03125, %v104_v17 }
 0x184   :  { %v110_v19 = vadd.f32 1e-12, %v108_v18 }
 0x185   :  { %v107_v20 = vpop.xlane.xlu1 %106 }
 0x186   :  { %265 = vrsqrt.f32 %v110_v19  ;;  %v109_v21 = vmul.f32 0.03125, %v107_v20 }
 0x188   :  { %v111_v22 = vadd.f32 1e-12, %v109_v21 }
 0x18a   :  { %267 = vrsqrt.f32 %v111_v22 }
 0x190   :  { %v266_v23 = vpop.eup %265 }
 0x191   :  { %v114_v24 = vmul.f32 %v266_v23, %v98_v6 }
 0x193   :  { %v122_v28 = vmul.f32 %v230_v25, %v114_v24 }
 0x194   :  { %v268_v26 = vpop.eup %267 }
 0x195   :  { %v115_v27 = vmul.f32 %v268_v26, %v99_v10  ;;  %v130_v31 = vadd.f32 %v231_v29, %v122_v28 }
 0x197   :  { %v123_v30 = vmul.f32 %v230_v25, %v115_v27 }
 0x199   :  { %v131_v32 = vadd.f32 %v231_v29, %v123_v30 }
 0x19b   :  { %v132_v33 = vpack.c.bf16 %v131_v32, %v130_v31 }
 0x19d   :  { %248 = vmatmul.mubr.msk.bf16.vlgmr.msra.gmra.mrb[0].mxu0 %vm88_vm0, %v132_v33 }
 0x270   :  { %v193_v35 = vpop.f32.mrb[0].mxu0 }
 0x271   :  { %v194_v36 = vadd.f32 %v232_v34, %v193_v35  ;;  %v249_v37 = vpop.f32.mrb[1].mxu0 }
 0x272   :  { %v196_v38 = vpop.f32.mrb[2].mxu0 }
 0x273   :  { %v238_v39 = vpack.c.bf16 %v194_v36, %v194_v36  ;;  %v197_v40 = vadd.f32 %v232_v34, %v196_v38  ;;  %v250_v41 = vpop.f32.mrb[3].mxu0 }
 0x275   :  { %v239_v42 = vpack.c.bf16 %v197_v40, %v197_v40  ;;  %209 = vst.msk [vmem:[#allocation11] sm:$0xf] %vm208_vm2, %v238_v39 }
 0x277   :  { %210 = vst.msk [vmem:[#allocation11 + $0x4] sm:$0xf] %vm208_vm2, %v239_v42 }
 0x278   :  { %390 = shalt.err (!%p387_p2)
}
 0x279   :  { %s391_s10 = scalar_lea.hbm %s546_s5, 128 }
 0x27a   :  { %p392_p3 = scmp.ne.s32.totalorder %s546_s5, %s391_s10  ;;  %p395_p4 = scmp.lt.u32.totalorder %s391_s10, %s546_s5 }
 0x27c   :  { %p397_p5 = pnand %p395_p4, %p392_p3 }
 0x27e   :  { %400 = shalt.err (!%p397_p5)
}
 0x27f   :  { %222 = dma.vmem_to_hbm [thread:$0]  %s217_s6, 128, %s546_s5, [#allocation4], %s411_s1, %s411_s1, %s412_s16  }
 0x280   :  { %407 = dma.done.wait [#allocation4], 128  }
 0x281   :  { %408 = vsyncadd [#allocation4], 4294967168 }
 0x282   :  { %226 = vsyncpa [#allocation3], 1 }
 0x283   :  { %227 = vsyncpa [#allocation6], 1 }
 0x284   :  { %228 = vsyncpa [#allocation9], 1 }
 0x285   :  { %229 = vsyncpa [#allocation4], 1 }

// kernel: vit_encoder_forward.10
= control target key start
LH: loop header
LB: loop body
LE: loop exit
PB: predicated region body
PF: predicated region fallthrough
CT: control target
= control target key end

     0   :  { %14 = vsyncpa [#allocation4], 0  ;;  %s904_s0 = inlined_call_operand.hbm [shape: f32[16,32], index: 0, kind: input, shape index: {}, may-alias: {0,9}]   ;;  %s905_s1 = inlined_call_operand.hbm [shape: f32[1,32], index: 1, kind: input, shape index: {}]   ;;  %s906_s2 = inlined_call_operand.hbm [shape: f32[1,32], index: 2, kind: input, shape index: {}]   ;;  %s907_s3 = inlined_call_operand.hbm [shape: bf16[32,64], index: 3, kind: input, shape index: {}]   ;;  %s908_s4 = inlined_call_operand.hbm [shape: f32[1,64], index: 4, kind: input, shape index: {}]   ;;  %s909_s5 = inlined_call_operand.hbm [shape: bf16[64,32], index: 5, kind: input, shape index: {}]   ;;  %s910_s6 = inlined_call_operand.hbm [shape: f32[1,32], index: 6, kind: input, shape index: {}]   ;;  %s911_s7 = inlined_call_operand.hbm [shape: f32[1,32], index: 7, kind: input, shape index: {}]   ;;  %s912_s8 = inlined_call_operand.hbm [shape: f32[1,32], index: 8, kind: input, shape index: {}]   ;;  %s913_s9 = inlined_call_operand.hbm [shape: f32[16,32], index: 9, kind: output, shape index: {}, may-alias: {0,9}]  }
   0x1   :  { %15 = vsyncpa [#allocation7], 0 }
   0x2   :  { %16 = vsyncpa [#allocation10], 0 }
   0x3   :  { %17 = vsyncpa [#allocation13], 0 }
   0x4   :  { %18 = vsyncpa [#allocation16], 0 }
   0x5   :  { %19 = vsyncpa [#allocation5], 0  ;;  %s695_s30 = smov [#allocation6]   ;;  %s696_s11 = smov [#allocation9]  }
   0x6   :  { %s38_s10 = sshll.u32 %s695_s30, 4  ;;  %s57_s12 = sshll.u32 %s696_s11, 4  ;;  %s39_s10 = int_to_ptr.vmem [resolvable:$true] %s38_s10  ;;  %s761_s12 = int_to_ptr.vmem [resolvable:$true] %s57_s12 }
   0x7   :  { %s463_s15 = scalar_lea.hbm %s905_s1, 16 }
   0x8   :  { %p464_p0 = scmp.ne.s32.totalorder %s905_s1, %s463_s15  ;;  %p467_p1 = scmp.lt.u32.totalorder %s463_s15, %s905_s1 }
   0xa   :  { %p469_p2 = pnand %p467_p1, %p464_p0 }
   0xc   :  { %472 = shalt.err (!%p469_p2)
}
   0xd   :  { %s473_s20 = scalar_lea.vmem %s39_s10, 16  ;;  %s477_s21 = scalar_lea.vmem %s39_s10, 32 }
   0xe   :  { %p474_p3 = scmp.ne.s32.totalorder %s39_s10, %s473_s20  ;;  %p478_p4 = scmp.lt.s32.totalorder %s39_s10, %s39_s10 }
   0xf   :  { %p479_p5 = scmp.lt.s32.totalorder %s477_s21, %s473_s20 }
  0x11   :  { %p480_p6 = por %p479_p5, %p478_p4 }
  0x13   :  { %p481_p7 = pnand %p480_p6, %p474_p3 }
  0x15   :  { %484 = shalt.err (!%p481_p7)
}
  0x16   :  { %41 = dma.hbm_to_vmem [thread:$0]  %s905_s1, 16, %s39_s10, [#allocation7]  }
  0x17   :  { %s485_s26 = scalar_lea.hbm %s907_s3, 256 }
  0x18   :  { %p486_p8 = scmp.ne.s32.totalorder %s907_s3, %s485_s26  ;;  %p489_p9 = scmp.lt.u32.totalorder %s485_s26, %s907_s3 }
  0x1a   :  { %p491_p10 = pnand %p489_p9, %p486_p8 }
  0x1c   :  { %494 = shalt.err (!%p491_p10)
}
  0x1d   :  { %s495_s11 = scalar_lea.vmem %s761_s12, 256  ;;  %p500_p12 = scmp.lt.s32.totalorder %s761_s12, %s761_s12 }
  0x1e   :  { %p496_p11 = scmp.ne.s32.totalorder %s761_s12, %s495_s11  ;;  %p501_p13 = scmp.lt.s32.totalorder %s495_s11, %s495_s11 }
  0x20   :  { %p502_p0 = por %p501_p13, %p500_p12 }
  0x22   :  { %p503_p1 = pnand %p502_p0, %p496_p11 }
  0x24   :  { %506 = shalt.err (!%p503_p1)
}
  0x25   :  { %s697_s1 = smov 64   ;;  %s698_s10 = smov 4  }
  0x26   :  { %63 = dma.hbm_to_vmem [thread:$0]  %s907_s3, 256, %s761_s12, [#allocation10], %s697_s1, %s697_s1, %s698_s10  }
  0x27   :  { %s699_s15 = smov [#allocation12]   ;;  %s700_s17 = smov [#allocation15]  }
  0x28   :  { %s79_s16 = sshll.u32 %s699_s15, 4  ;;  %s102_s18 = sshll.u32 %s700_s17, 4  ;;  %s80_s16 = int_to_ptr.vmem [resolvable:$true] %s79_s16  ;;  %s103_s18 = int_to_ptr.vmem [resolvable:$true] %s102_s18 }
  0x29   :  { %s507_s21 = scalar_lea.hbm %s909_s5, 512 }
  0x2a   :  { %p508_p2 = scmp.ne.s32.totalorder %s909_s5, %s507_s21  ;;  %p511_p3 = scmp.lt.u32.totalorder %s507_s21, %s909_s5 }
  0x2c   :  { %p513_p4 = pnand %p511_p3, %p508_p2 }
  0x2e   :  { %516 = shalt.err (!%p513_p4)
}
  0x2f   :  { %s517_s3 = scalar_lea.vmem %s80_s16, 512  ;;  %p522_p6 = scmp.lt.s32.totalorder %s80_s16, %s80_s16 }
  0x30   :  { %p518_p5 = scmp.ne.s32.totalorder %s80_s16, %s517_s3  ;;  %p523_p7 = scmp.lt.s32.totalorder %s517_s3, %s517_s3 }
  0x32   :  { %p524_p8 = por %p523_p7, %p522_p6 }
  0x34   :  { %p525_p9 = pnand %p524_p8, %p518_p5 }
  0x36   :  { %528 = shalt.err (!%p525_p9)
}
  0x37   :  { %85 = dma.hbm_to_vmem [thread:$0]  %s909_s5, 512, %s80_s16, [#allocation13], %s697_s1, %s697_s1, %s698_s10  }
  0x38   :  { %s529_s29 = scalar_lea.hbm %s911_s7, 16 }
  0x39   :  { %p530_p10 = scmp.ne.s32.totalorder %s911_s7, %s529_s29  ;;  %p533_p11 = scmp.lt.u32.totalorder %s529_s29, %s911_s7 }
  0x3b   :  { %p535_p12 = pnand %p533_p11, %p530_p10 }
  0x3d   :  { %538 = shalt.err (!%p535_p12)
}
  0x3e   :  { %s539_s15 = scalar_lea.vmem %s103_s18, 16  ;;  %s543_s17 = scalar_lea.vmem %s103_s18, 32 }
  0x3f   :  { %p540_p13 = scmp.ne.s32.totalorder %s103_s18, %s539_s15  ;;  %p544_p0 = scmp.lt.s32.totalorder %s103_s18, %s103_s18 }
  0x40   :  { %p545_p1 = scmp.lt.s32.totalorder %s543_s17, %s539_s15 }
  0x42   :  { %p546_p2 = por %p545_p1, %p544_p0 }
  0x44   :  { %p547_p3 = pnand %p546_p2, %p540_p13 }
  0x46   :  { %550 = shalt.err (!%p547_p3)
}
  0x47   :  { %105 = dma.hbm_to_vmem [thread:$0]  %s911_s7, 16, %s103_s18, [#allocation16]  }
  0x48   :  { %s701_s10 = smov [#allocation3]   ;;  %s551_s21 = scalar_lea.hbm %s904_s0, 256 }
  0x49   :  { %s25_s16 = sshll.u32 %s701_s10, 4  ;;  %p552_p4 = scmp.ne.s32.totalorder %s904_s0, %s551_s21  ;;  %s26_s16 = int_to_ptr.vmem [resolvable:$true] %s25_s16 }
  0x4a   :  { %p555_p5 = scmp.lt.u32.totalorder %s551_s21, %s904_s0 }
  0x4c   :  { %p557_p6 = pnand %p555_p5, %p552_p4 }
  0x4e   :  { %560 = shalt.err (!%p557_p6)
}
  0x4f   :  { %s561_s3 = scalar_lea.vmem %s26_s16, 256  ;;  %p566_p8 = scmp.lt.s32.totalorder %s26_s16, %s26_s16 }
  0x50   :  { %p562_p7 = scmp.ne.s32.totalorder %s26_s16, %s561_s3  ;;  %p567_p9 = scmp.lt.s32.totalorder %s561_s3, %s561_s3 }
  0x52   :  { %p568_p10 = por %p567_p9, %p566_p8 }
  0x54   :  { %p569_p11 = pnand %p568_p10, %p562_p7 }
  0x56   :  { %572 = shalt.err (!%p569_p11)
}
  0x57   :  { %s702_s7 = smov 128   ;;  %s703_s18 = smov 8  }
  0x58   :  { %31 = dma.hbm_to_vmem [thread:$0]  %s904_s0, 256, %s26_s16, [#allocation4], %s702_s7, %s702_s7, %s703_s18  }
  0x59   :  { %s704_s27 = smov [#allocation8]   ;;  %s705_s29 = smov [#allocation11]  }
  0x5a   :  { %s48_s28 = sshll.u32 %s704_s27, 4  ;;  %s70_s30 = sshll.u32 %s705_s29, 4  ;;  %s49_s28 = int_to_ptr.vmem [resolvable:$true] %s48_s28  ;;  %s71_s30 = int_to_ptr.vmem [resolvable:$true] %s70_s30 }
  0x5b   :  { %s573_s14 = scalar_lea.hbm %s906_s2, 16 }
  0x5c   :  { %p574_p12 = scmp.ne.s32.totalorder %s906_s2, %s573_s14  ;;  %p577_p13 = scmp.lt.u32.totalorder %s573_s14, %s906_s2 }
  0x5e   :  { %p579_p0 = pnand %p577_p13, %p574_p12 }
  0x60   :  { %582 = shalt.err (!%p579_p0)
}
  0x61   :  { %s583_s0 = scalar_lea.vmem %s49_s28, 16  ;;  %s587_s10 = scalar_lea.vmem %s49_s28, 32 }
  0x62   :  { %p584_p1 = scmp.ne.s32.totalorder %s49_s28, %s583_s0  ;;  %p588_p2 = scmp.lt.s32.totalorder %s49_s28, %s49_s28 }
  0x63   :  { %p589_p3 = scmp.lt.s32.totalorder %s587_s10, %s583_s0 }
  0x65   :  { %p590_p4 = por %p589_p3, %p588_p2 }
  0x67   :  { %p591_p5 = pnand %p590_p4, %p584_p1 }
  0x69   :  { %594 = shalt.err (!%p591_p5)
}
  0x6a   :  { %51 = dma.hbm_to_vmem [thread:$0]  %s906_s2, 16, %s49_s28, [#allocation7]  }
  0x6b   :  { %s595_s22 = scalar_lea.hbm %s908_s4, 16 }
  0x6c   :  { %p596_p6 = scmp.ne.s32.totalorder %s908_s4, %s595_s22  ;;  %p599_p7 = scmp.lt.u32.totalorder %s595_s22, %s908_s4 }
  0x6e   :  { %p601_p8 = pnand %p599_p7, %p596_p6 }
  0x70   :  { %604 = shalt.err (!%p601_p8)
}
  0x71   :  { %s605_s12 = scalar_lea.vmem %s71_s30, 16  ;;  %s609_s26 = scalar_lea.vmem %s71_s30, 32 }
  0x72   :  { %p606_p9 = scmp.ne.s32.totalorder %s71_s30, %s605_s12  ;;  %p610_p10 = scmp.lt.s32.totalorder %s71_s30, %s71_s30 }
  0x73   :  { %p611_p11 = scmp.lt.s32.totalorder %s609_s26, %s605_s12 }
  0x75   :  { %p612_p12 = por %p611_p11, %p610_p10 }
  0x77   :  { %p613_p13 = pnand %p612_p12, %p606_p9 }
  0x79   :  { %616 = shalt.err (!%p613_p13)
}
  0x7a   :  { %73 = dma.hbm_to_vmem [thread:$0]  %s908_s4, 16, %s71_s30, [#allocation10]  }
  0x7b   :  { %s706_s28 = smov [#allocation14]   ;;  %s707_s11 = smov [#allocation17]  }
  0x7c   :  { %s92_s29 = sshll.u32 %s706_s28, 4  ;;  %s112_s13 = sshll.u32 %s707_s11, 4  ;;  %s93_s29 = int_to_ptr.vmem [resolvable:$true] %s92_s29  ;;  %s113_s13 = int_to_ptr.vmem [resolvable:$true] %s112_s13 }
  0x7d   :  { %s617_s17 = scalar_lea.hbm %s910_s6, 16 }
  0x7e   :  { %p618_p0 = scmp.ne.s32.totalorder %s910_s6, %s617_s17  ;;  %p621_p1 = scmp.lt.u32.totalorder %s617_s17, %s910_s6 }
  0x80   :  { %p623_p2 = pnand %p621_p1, %p618_p0 }
  0x82   :  { %626 = shalt.err (!%p623_p2)
}
  0x83   :  { %s627_s4 = scalar_lea.vmem %s93_s29, 16  ;;  %s631_s30 = scalar_lea.vmem %s93_s29, 32 }
  0x84   :  { %p628_p3 = scmp.ne.s32.totalorder %s93_s29, %s627_s4  ;;  %p632_p4 = scmp.lt.s32.totalorder %s93_s29, %s93_s29 }
  0x85   :  { %p633_p5 = scmp.lt.s32.totalorder %s631_s30, %s627_s4 }
  0x87   :  { %p634_p6 = por %p633_p5, %p632_p4 }
  0x89   :  { %p635_p7 = pnand %p634_p6, %p628_p3 }
  0x8b   :  { %638 = shalt.err (!%p635_p7)
}
  0x8c   :  { %95 = dma.hbm_to_vmem [thread:$0]  %s910_s6, 16, %s93_s29, [#allocation13]  }
  0x8d   :  { %s639_s22 = scalar_lea.hbm %s912_s8, 16 }
  0x8e   :  { %p640_p8 = scmp.ne.s32.totalorder %s912_s8, %s639_s22  ;;  %p643_p9 = scmp.lt.u32.totalorder %s639_s22, %s912_s8 }
  0x90   :  { %p645_p10 = pnand %p643_p9, %p640_p8 }
  0x92   :  { %648 = shalt.err (!%p645_p10)
}
  0x93   :  { %s649_s12 = scalar_lea.vmem %s113_s13, 16  ;;  %s653_s26 = scalar_lea.vmem %s113_s13, 32 }
  0x94   :  { %p650_p11 = scmp.ne.s32.totalorder %s113_s13, %s649_s12  ;;  %p654_p12 = scmp.lt.s32.totalorder %s113_s13, %s113_s13 }
  0x95   :  { %p655_p13 = scmp.lt.s32.totalorder %s653_s26, %s649_s12 }
  0x97   :  { %p656_p0 = por %p655_p13, %p654_p12 }
  0x99   :  { %p657_p1 = pnand %p656_p0, %p650_p11 }
  0x9b   :  { %660 = shalt.err (!%p657_p1)
}
  0x9c   :  { %115 = dma.hbm_to_vmem [thread:$0]  %s912_s8, 16, %s113_s13, [#allocation16]  }
  0x9d   :  { %683 = dma.done.wait [#allocation4], 256  }
  0x9e   :  { %684 = vsyncadd [#allocation4], 4294967040 }
  0x9f   :  { %685 = dma.done.wait [#allocation7], 32  }
  0xa0   :  { %686 = vsyncadd [#allocation7], 4294967264 }
  0xa1   :  { %687 = dma.done.wait [#allocation10], 272  }
  0xa2   :  { %688 = vsyncadd [#allocation10], 4294967024 }
  0xa3   :  { %689 = dma.done.wait [#allocation13], 528  }
  0xa4   :  { %690 = vsyncadd [#allocation13], 4294966768 }
  0xa5   :  { %691 = dma.done.wait [#allocation16], 32  }
  0xa6   :  { %692 = vsyncadd [#allocation16], 4294967264  ;;  %vm152_vm0 = vcmask 261120   ;;  %v148_v0 = vld [vmem:[#allocation3] sm:$0xff]  ;;  %v149_v2 = vld [vmem:[#allocation3 + $0x8] sm:$0xff]  ;;  %v708_v18 = vmov 0.0  }
  0xa7   :  { %v395_v1 = vld [vmem:[#allocation14] ss:$0 sm:$0xff]  ;;  %v153_v3 = vsel %vm152_vm0, %v148_v0, 0.0  ;;  %v156_v5 = vsel %vm152_vm0, %v149_v2, 0.0  ;;  %v449_v17 = vld [vmem:[#allocation9] sm:$0xff]   ;;  %413 = vmatprep.subr.bf16.mxu0 %v708_v18  ;;  %421 = vmatprep.subr.bf16.mxu1 %v708_v18  ;;  %v450_v19 = vld [vmem:[#allocation9 + $0x8] sm:$0xff]  }
  0xa8   :  { %v205_v4 = vadd.f32 %v395_v1, %v148_v0  ;;  %v206_v6 = vadd.f32 %v395_v1, %v149_v2  ;;  %154 = vadd.xlane.f32.xlu0 %v153_v3  ;;  %414 = vmatpush3.bf16.msra.mxu0 %v449_v17  ;;  %vm709_vm1 = vmmov 0   ;;  %v393_v28 = vld [vmem:[#allocation6] ss:$0 sm:$0xff]  ;;  %v394_v32 = vld [vmem:[#allocation8] ss:$0 sm:$0xff]  ;;  %v451_v38 = vld [vmem:[#allocation12] sm:$0xff]  }
  0xa9   :  { %417 = vmatprep.mubr.msk.bf16.mxu0 %vm709_vm1, %v708_v18  ;;  %415 = vmatprep.subr.bf16.mxu0 %v708_v18  ;;  %v452_v39 = vld [vmem:[#allocation12 + $0x8] sm:$0xff]   ;;  %v453_v40 = vld [vmem:[#allocation12 + $0x10] sm:$0xff]   ;;  %v454_v41 = vld [vmem:[#allocation12 + $0x18] sm:$0xff]   ;;  %vm323_vm2 = vcmask 523264   ;;  %s710_s8 = smov [#allocation18]  }
  0xaa   :  { %207 = vst.msk [vmem:[#allocation18] sm:$0xff] %vm152_vm0, %v205_v4  ;;  %208 = vst.msk [vmem:[#allocation18 + $0x8] sm:$0xff] %vm152_vm0, %v206_v6  ;;  %429 = vmatprep.mubr.msk.bf16.mxu1 %vm709_vm1, %v708_v18  ;;  %422 = vmatpush3.bf16.msra.mxu1 %v451_v38  ;;  %v396_v42 = vld [vmem:[#allocation11] ss:$0 sm:$0xff]  ;;  %s377_s27 = sshll.u32 %s710_s8, 4  ;;  %s378_s27 = int_to_ptr.vmem [resolvable:$true] %s377_s27 }
  0xab   :  { %423 = vmatprep.subr.bf16.mxu1 %v708_v18  ;;  %s661_s28 = scalar_lea.vmem %s378_s27, 256  ;;  %p666_p3 = scmp.lt.s32.totalorder %s378_s27, %s378_s27 }
  0xac   :  { %157 = vadd.xlane.f32.xlu0 %v156_v5  ;;  %416 = vmatpush3.bf16.msra.mxu0 %v450_v19  ;;  %p662_p2 = scmp.ne.s32.totalorder %s378_s27, %s661_s28  ;;  %p667_p4 = scmp.lt.s32.totalorder %s661_s28, %s661_s28 }
  0xae   :  { %424 = vmatpush3.bf16.msra.mxu1 %v452_v39  ;;  %p668_p5 = por %p667_p4, %p666_p3 }
  0xaf   :  { %425 = vmatprep.subr.bf16.mxu1 %v708_v18 }
  0xb0   :  { %p669_p6 = pnand %p668_p5, %p662_p2 }
  0xb1   :  { %v289_v60 = vld [vmem:[#allocation18] sm:$0xff]  ;;  %v290_v62 = vld [vmem:[#allocation18 + $0x8] sm:$0xff] }
  0xb2   :  { %426 = vmatpush3.bf16.msra.mxu1 %v453_v40 }
  0xb3   :  { %427 = vmatprep.subr.bf16.mxu1 %v708_v18 }
  0xb6   :  { %428 = vmatpush3.bf16.msra.mxu1 %v454_v41 }
 0x135   :  { %v155_v7 = vpop.xlane.xlu0 %154 }
 0x136   :  { %v160_v8 = vmul.f32 0.03125, %v155_v7 }
 0x138   :  { %v162_v9 = vsub.f32 %v148_v0, %v160_v8 }
 0x139   :  { %v158_v10 = vpop.xlane.xlu0 %157 }
 0x13a   :  { %v161_v11 = vmul.f32 0.03125, %v158_v10  ;;  %v164_v12 = vmul.f32 %v162_v9, %v162_v9 }
 0x13c   :  { %v163_v13 = vsub.f32 %v149_v2, %v161_v11  ;;  %v166_v14 = vsel %vm152_vm0, %v164_v12, 0.0 }
 0x13d   :  { %167 = vadd.xlane.f32.xlu1 %v166_v14 }
 0x13e   :  { %v165_v15 = vmul.f32 %v163_v13, %v163_v13 }
 0x140   :  { %v169_v16 = vsel %vm152_vm0, %v165_v15, 0.0 }
 0x141   :  { %170 = vadd.xlane.f32.xlu1 %v169_v16 }
 0x1ca   :  { %v168_v20 = vpop.xlane.xlu1 %167 }
 0x1cb   :  { %v172_v21 = vmul.f32 0.03125, %v168_v20 }
 0x1cd   :  { %v174_v22 = vadd.f32 1e-12, %v172_v21 }
 0x1ce   :  { %v171_v23 = vpop.xlane.xlu1 %170 }
 0x1cf   :  { %455 = vrsqrt.f32 %v174_v22  ;;  %v173_v24 = vmul.f32 0.03125, %v171_v23 }
 0x1d1   :  { %v175_v25 = vadd.f32 1e-12, %v173_v24 }
 0x1d3   :  { %457 = vrsqrt.f32 %v175_v25 }
 0x1d9   :  { %v456_v26 = vpop.eup %455 }
 0x1da   :  { %v178_v27 = vmul.f32 %v456_v26, %v162_v9 }
 0x1dc   :  { %v186_v30 = vmul.f32 %v393_v28, %v178_v27 }
 0x1dd   :  { %v458_v29 = vpop.eup %457 }
 0x1de   :  { %v179_v31 = vmul.f32 %v458_v29, %v163_v13  ;;  %v194_v34 = vadd.f32 %v394_v32, %v186_v30 }
 0x1e0   :  { %v187_v33 = vmul.f32 %v393_v28, %v179_v31 }
 0x1e2   :  { %v195_v35 = vadd.f32 %v394_v32, %v187_v33 }
 0x1e4   :  { %v196_v36 = vpack.c.bf16 %v195_v35, %v194_v34 }
 0x1e6   :  { %197 = vst.msk [vmem:[#allocation2] sm:$0xff] %vm152_vm0, %v196_v36 }
 0x1ed   :  { %v209_v37 = vld [vmem:[#allocation2] sm:$0xff] }
 0x1ee   :  { %418 = vmatmul.mubr.msk.bf16.vlgmr.msra.gmra.mrb[0].mxu0 %vm152_vm0, %v209_v37 }
 0x2c1   :  { %v271_v43 = vpop.f32.mrb[0].mxu0 }
 0x2c2   :  { %v272_v44 = vadd.f32 %v396_v42, %v271_v43  ;;  %v419_v45 = vpop.f32.mrb[1].mxu0 }
 0x2c3   :  { %v274_v46 = vpop.f32.mrb[2].mxu0 }
 0x2c4   :  { %v280_v47 = vmul.f32 0.70710677, %v272_v44  ;;  %v275_v48 = vadd.f32 %v396_v42, %v274_v46  ;;  %v420_v49 = vpop.f32.mrb[3].mxu0  ;;  %v278_v54 = vmul.f32 0.5, %v272_v44 }
 0x2c6   :  { %459 = verf.f32 %v280_v47  ;;  %v281_v50 = vmul.f32 0.70710677, %v275_v48  ;;  %v279_v55 = vmul.f32 0.5, %v275_v48 }
 0x2c8   :  { %461 = verf.f32 %v281_v50 }
 0x2d0   :  { %v460_v51 = vpop.eup %459 }
 0x2d1   :  { %v284_v52 = vadd.f32 1.0, %v460_v51 }
 0x2d2   :  { %v462_v53 = vpop.eup %461 }
 0x2d3   :  { %v285_v56 = vadd.f32 1.0, %v462_v53  ;;  %v286_v57 = vmul.f32 %v284_v52, %v278_v54 }
 0x2d5   :  { %v287_v58 = vmul.f32 %v285_v56, %v279_v55 }
 0x2d7   :  { %v288_v59 = vpack.c.bf16 %v287_v58, %v286_v57 }
 0x2d9   :  { %430 = vmatmul.mubr.msk.bf16.vlgmr.msra.gmra.mrb[0].mxu1 %vm323_vm2, %v288_v59 }
 0x3ac   :  { %v361_v61 = vpop.f32.mrb[0].mxu1 }
 0x3ad   :  { %v368_v63 = vadd.f32 %v361_v61, %v289_v60  ;;  %v431_v0 = vpop.f32.mrb[1].mxu1 }
 0x3ae   :  { %v364_v1 = vpop.f32.mrb[2].mxu1 }
 0x3af   :  { %370 = vst.msk [vmem:[#allocation18] sm:$0xff] %vm152_vm0, %v368_v63  ;;  %v369_v2 = vadd.f32 %v364_v1, %v290_v62  ;;  %v432_v3 = vpop.f32.mrb[3].mxu1 }
 0x3b1   :  { %371 = vst.msk [vmem:[#allocation18 + $0x8] sm:$0xff] %vm152_vm0, %v369_v2 }
 0x3b2   :  { %672 = shalt.err (!%p669_p6)
}
 0x3b3   :  { %s673_s13 = scalar_lea.hbm %s913_s9, 256 }
 0x3b4   :  { %p674_p7 = scmp.ne.s32.totalorder %s913_s9, %s673_s13  ;;  %p677_p8 = scmp.lt.u32.totalorder %s673_s13, %s913_s9 }
 0x3b6   :  { %p679_p9 = pnand %p677_p8, %p674_p7 }
 0x3b8   :  { %682 = shalt.err (!%p679_p9)
}
 0x3b9   :  { %383 = dma.vmem_to_hbm [thread:$0]  %s378_s27, 256, %s913_s9, [#allocation5], %s702_s7, %s702_s7, %s703_s18  }
 0x3ba   :  { %693 = dma.done.wait [#allocation5], 256  }
 0x3bb   :  { %694 = vsyncadd [#allocation5], 4294967040 }
 0x3bc   :  { %387 = vsyncpa [#allocation4], 1 }
 0x3bd   :  { %388 = vsyncpa [#allocation7], 1 }
 0x3be   :  { %389 = vsyncpa [#allocation10], 1 }
 0x3bf   :  { %390 = vsyncpa [#allocation13], 1 }
 0x3c0   :  { %391 = vsyncpa [#allocation16], 1 }
 0x3c1   :  { %392 = vsyncpa [#allocation5], 1 }

// kernel: vit_encoder_forward.9
= control target key start
LH: loop header
LB: loop body
LE: loop exit
PB: predicated region body
PF: predicated region fallthrough
CT: control target
= control target key end

     0   :  { %s2223_s0 = inlined_call_operand.hbm [shape: f32[16,32], index: 0, kind: input, shape index: {}, may-alias: {0,6}]   ;;  %s2224_s1 = inlined_call_operand.hbm [shape: bf16[2,4,8,8], index: 1, kind: input, shape index: {}]   ;;  %s2225_s2 = inlined_call_operand.hbm [shape: bf16[2,4,8,8], index: 2, kind: input, shape index: {}]   ;;  %s2226_s3 = inlined_call_operand.hbm [shape: bf16[2,4,8,8], index: 3, kind: input, shape index: {}]   ;;  %s2227_s4 = inlined_call_operand.hbm [shape: bf16[4,8,32], index: 4, kind: input, shape index: {}]   ;;  %s2228_s5 = inlined_call_operand.hbm [shape: f32[1,32], index: 5, kind: input, shape index: {}]   ;;  %s2229_s6 = inlined_call_operand.hbm [shape: f32[16,32], index: 6, kind: output, shape index: {}, may-alias: {0,6}]  }
   0x1   :  { %2251 = sst [smem:[#allocation25_spill]] %s2224_s1 }
   0x2   :  { %2252 = sst [smem:[#allocation26_spill]] %s2227_s4 }
   0x3   :  { %2253 = sst [smem:[#allocation27_spill]] %s2229_s6 }
   0x4   :  { %11 = vsyncpa [#allocation3], 0 }
   0x5   :  { %13 = vsyncpa [#allocation3 + $0x1], 0 }
   0x6   :  { %14 = vsyncpa [#allocation6], 0 }
   0x7   :  { %16 = vsyncpa [#allocation6 + $0x1], 0 }
   0x8   :  { %17 = vsyncpa [#allocation9], 0 }
   0x9   :  { %19 = vsyncpa [#allocation9 + $0x1], 0 }
   0xa   :  { %20 = vsyncpa [#allocation12], 0 }
   0xb   :  { %21 = vsyncpa [#allocation4], 0 }
   0xc   :  { %23 = vsyncpa [#allocation4 + $0x1], 0  ;;  %s1776_s21 = smov 0   ;;  %s1778_s22 = smov 0  }
   0xd   :  { %s1780_s23 = smov 0   ;;  %s1782_s24 = smov 0  }
   0xe LB: > { %2254 = sst [smem:[#allocation20_spill]] %s1715_s21  ;;  %s1797_s25 = sadd.s32 4294967295, %s1727_s24   ;;  %s1727_s24 = sphi %s1782_s24, %s2292_s24   ;;  %s1723_s23 = sphi %s1780_s23, %s2294_s23   ;;  %s1719_s22 = sphi %s1778_s22, %s2296_s22   ;;  %s1715_s21 = sphi %s1776_s21, %s2295_s21  }
   0xf   : > { %2255 = sst [smem:[#allocation21_spill]] %s1723_s23  ;;  %s1226_s26 = sadd.s32 4294967294, %s1727_s24  }
  0x10   : > { %s1801_s27 = sadd.s32 1, %s1727_s24   ;;  %s36_s28 = sadd.s32 1, %s1723_s23 }
  0x11   : > { %2256 = sst [smem:[#allocation22_spill]] %s1801_s27  ;;  %s33_s29 = ssub.s32 %s1727_s24, %s1801_s27 }
  0x12   : > { %p43_p0 = scmp.ne.s32.totalorder %s1723_s23, %s1719_s22  ;;  %p34_p1 = scmp.eq.s32.totalorder %s33_s29, 0 }
  0x13   : > { %p44_p2 = scmp.eq.s32.totalorder %s1727_s24, 0  ;;  %p49_p3 = scmp.ne.s32.totalorder %s1719_s22, %s1715_s21 }
  0x14   : > { %p2230_p4 = scmp.eq.s32.totalorder %s1797_s25, 0  ;;  %p193_p7 = scmp.eq.s32.totalorder %s1797_s25, 1 }
  0x15   : > { %s1813_s30 = scalar_select %p34_p1, %s1723_s23, %s36_s28  }
  0x16   : > { %p1815_p5 = por %p44_p2, %p43_p0  ;;  %p1821_p6 = por %p2230_p4, %p49_p3 }
  0x17   : > { %2257 = sst [smem:[#allocation23_spill]] %s1813_s30  ;;  %p199_p8 = scmp.eq.s32.totalorder %s1226_s26, 1 }
  0x18   : > { %s2258_s7 = scalar_select %p1815_p5, 1, 0 }
  0x19   : > { %s2259_s8 = scalar_select %p1821_p6, 1, 0 }
  0x1a   : > { %p1227_p9 = scmp.ge.s32.totalorder %s1727_s24, 1  ;;  %p206_p10 = scmp.lt.s32.totalorder %s1727_s24, 3 }
  0x1b   : > { %p1828_p11 = por %p193_p7, %p43_p0  ;;  %p1832_p12 = por %p199_p8, %p49_p3 }
  0x1c   : > { %p1836_p13 = pnand %p1227_p9, %p206_p10  ;;  %s1729_s12 = smov [#allocation10]  }
  0x1d   : > { %s2260_s9 = scalar_select %p1828_p11, 1, 0 }
  0x1e   : > { %s2261_s10 = scalar_select %p1832_p12, 1, 0 }
  0x1f   : > { %s2263_s11 = scalar_select %p1836_p13, 1, 0 }
  0x20   : > { %2262 = sst [smem:[#allocation24_spill]] %s2261_s10  ;;  %p1384_p1 = pneg %p1836_p13 }
  0x21   : > { %s218_s13 = sshll.u32 %s1729_s12, 4  ;;  %s1851_s15 = sand.u32 1, %s1723_s23   ;;  %s219_s13 = int_to_ptr.vmem [resolvable:$true] %s218_s13 }
  0x22   : > { %p1844_p2 = pnand %p1384_p1, %p2230_p4  ;;  %s2265_s4 = sld [smem:[#allocation26_spill]] }
  0x24   : > { %s2264_s14 = scalar_select %p1844_p2, 1, 0 }
  0x25   : > { %p2239_p8 = pneg %p1844_p2 }
  0x28   : > { %s1469_s19 = scalar_lea.hbm %s2265_s4, 256 }
  0x29   : > { %p1470_p7 = scmp.ne.s32.totalorder %s2265_s4, %s1469_s19  ;;  %p1476_p1 = scmp.lt.u32.totalorder %s1469_s19, %s2265_s4 }
  0x2b   : > { %p1472_p9 = pnand %p2239_p8, %p1470_p7 }
  0x2d   : > { %p1473_p10 = pneg %p1472_p9 }
  0x2f   : > { %p1478_p0 = pnand %p1476_p1, %p1473_p10 }
  0x31   : > { %1481 = shalt.err (!%p1478_p0)
}
  0x32   : > { %s1482_s12 = scalar_lea.vmem %s219_s13, 256  ;;  %p1490_p11 = scmp.lt.s32.totalorder %s219_s13, %s219_s13 }
  0x33   : > { %p1483_p4 = scmp.ne.s32.totalorder %s219_s13, %s1482_s12  ;;  %p1491_p6 = scmp.lt.s32.totalorder %s1482_s12, %s1482_s12 }
  0x35   : > { %p1485_p3 = pnand %p1483_p4, %p2239_p8  ;;  %p1492_p13 = por %p1491_p6, %p1490_p11 }
  0x37   : > { %p1486_p12 = pneg %p1485_p3 }
  0x39   : > { %p1493_p5 = pnand %p1492_p13, %p1486_p12 }
  0x3b   : > { %1496 = shalt.err (!%p1493_p5)
}
  0x3c   : > { %s2234_s17 = smov 64   ;;  %s2236_s18 = smov 4  }
  0x3d   : > { %1387 = dma.hbm_to_vmem [thread:$0]  (!%p1844_p2), %s2265_s4, 256, %s219_s13, [#allocation9], %s2234_s17, %s2234_s17, %s2236_s18  }
  0x3e   : > { %p2266_p4 = scmp.ne.s32.totalorder %s2258_s7, 0  ;;  %p2267_p6 = scmp.lt.s32.totalorder %s1727_s24, 2 }
  0x3f   : > { %s1888_s28 = sshll.u32 %s1851_s15, 4  ;;  %s1891_s29 = sshll.u32 %s1727_s24, 8 }
  0x40   : > { %p1883_p11 = pnand %p2267_p6, %p2266_p4  ;;  %s2269_s1 = sld [smem:[#allocation25_spill]] }
  0x41   : > { %s265_s7 = scalar_lea.vmem [#allocation5], %s1888_s28  ;;  %s2270_s19 = sand.u32 1, %s1727_s24  }
  0x42   : > { %s2268_s26 = scalar_select %p1883_p11, 1, 0 }
  0x43   : > { %s272_s13 = sshll.u32 %s265_s7, 4  ;;  %s1904_s20 = scalar_lea.sflag [#allocation6], %s2270_s19  ;;  %s1900_s13 = int_to_ptr.vmem [resolvable:$true] %s272_s13 }
  0x44   : > { %p1910_p12 = pneg %p1883_p11 }
  0x46   : > { %s1897_s30 = scalar_lea.hbm %s2269_s1, %s1891_s29  ;;  %s1502_s7 = scalar_lea.hbm %s2269_s1, 512 }
  0x47   : > { %s1497_s17 = scalar_lea.hbm %s1897_s30, 256  ;;  %p1503_p3 = scmp.lt.u32.totalorder %s1897_s30, %s2269_s1 }
  0x48   : > { %p1498_p5 = scmp.ne.s32.totalorder %s1897_s30, %s1497_s17  ;;  %p1504_p7 = scmp.lt.u32.totalorder %s1502_s7, %s1497_s17 }
  0x49   : > { %s2271_s18 = scalar_select %p1910_p12, 1, 0 }
  0x4a   : > { %p1500_p13 = pnand %p1910_p12, %p1498_p5  ;;  %p1505_p9 = por %p1504_p7, %p1503_p3 }
  0x4b   : > { %p1506_p10 = scmp.lt.u32.totalorder %s1497_s17, %s1897_s30 }
  0x4c   : > { %p1501_p0 = pneg %p1500_p13 }
  0x4d   : > { %p1507_p1 = por %p1506_p10, %p1505_p9 }
  0x4f   : > { %p1508_p4 = pnand %p1507_p1, %p1501_p0 }
  0x51   : > { %1511 = shalt.err (!%p1508_p4)
}
  0x52   : > { %s1512_s19 = scalar_lea.vmem %s1900_s13, 256  ;;  %s1732_s16 = smov [#allocation5]  }
  0x53   : > { %p1513_p6 = scmp.ne.s32.totalorder %s1900_s13, %s1512_s19  ;;  %s1517_s12 = sshll.u32 %s1732_s16, 4  ;;  %s1518_s12 = int_to_ptr.vmem [resolvable:$false] %s1517_s12 }
  0x54   : > { %s1519_s4 = scalar_lea.vmem %s1518_s12, 512  ;;  %p1520_p8 = scmp.lt.s32.totalorder %s1900_s13, %s1518_s12 }
  0x55   : > { %p1515_p5 = pnand %p1513_p6, %p1910_p12  ;;  %p1521_p2 = scmp.lt.s32.totalorder %s1519_s4, %s1512_s19 }
  0x57   : > { %p1516_p13 = pneg %p1515_p5  ;;  %p1522_p3 = por %p1521_p2, %p1520_p8 }
  0x59   : > { %p1523_p7 = pnand %p1522_p3, %p1516_p13 }
  0x5b   : > { %1526 = shalt.err (!%p1523_p7)
}
  0x5c   : > { %s2272_s23 = smov 4   ;;  %s2273_s17 = smov 64  }
  0x5d   : > { %1397 = dma.hbm_to_vmem [thread:$0]  (!%p1883_p11), %s1897_s30, 256, %s1900_s13, %s1904_s20, %s2273_s17, %s2273_s17, %s2272_s23  }
  0x5e   : > { %s1733_s7 = smov [#allocation11]   ;;  %s1231_s1 = sshll.u32 %s1851_s15, 3 }
  0x5f   : > { %s232_s16 = sshll.u32 %s1733_s7, 4  ;;  %s1527_s4 = scalar_lea.hbm %s2228_s5, 16  ;;  %s233_s16 = int_to_ptr.vmem [resolvable:$true] %s232_s16 }
  0x60   : > { %p1528_p2 = scmp.ne.s32.totalorder %s2228_s5, %s1527_s4  ;;  %p2274_p8 = scmp.ne.s32.totalorder %s2264_s14, 0 }
  0x61   : > { %p1534_p1 = scmp.lt.u32.totalorder %s1527_s4, %s2228_s5 }
  0x62   : > { %p2275_p0 = pneg %p2274_p8 }
  0x64   : > { %p1530_p9 = pnand %p1528_p2, %p2275_p0 }
  0x66   : > { %p1531_p10 = pneg %p1530_p9 }
  0x68   : > { %p1536_p4 = pnand %p1534_p1, %p1531_p10 }
  0x6a   : > { %1539 = shalt.err (!%p1536_p4)
}
  0x6b   : > { %s1540_s30 = scalar_lea.vmem %s233_s16, 16  ;;  %p2276_p5 = pmov %p2275_p0 }
  0x6c   : > { %p1541_p6 = scmp.ne.s32.totalorder %s233_s16, %s1540_s30  ;;  %s1547_s13 = scalar_lea.vmem %s233_s16, 32 }
  0x6d   : > { %p1548_p7 = scmp.lt.s32.totalorder %s233_s16, %s233_s16  ;;  %p1549_p11 = scmp.lt.s32.totalorder %s1547_s13, %s1540_s30 }
  0x6e   : > { %p1543_p13 = pnand %p1541_p6, %p2276_p5 }
  0x6f   : > { %p1550_p12 = por %p1549_p11, %p1548_p7 }
  0x70   : > { %p1544_p3 = pneg %p1543_p13 }
  0x72   : > { %p1551_p0 = pnand %p1550_p12, %p1544_p3 }
  0x74   : > { %1554 = shalt.err (!%p1551_p0)
}
  0x75   : > { %1390 = dma.hbm_to_vmem [thread:$0]  (!%p2274_p8), %s2228_s5, 16, %s233_s16, [#allocation12]  }
  0x76   : > { %s1232_s21 = sshll.u32 %s1727_s24, 7  ;;  %s247_s10 = scalar_lea.vmem [#allocation2], %s1231_s1 }
  0x77   : > { %s254_s7 = sshll.u32 %s247_s10, 4  ;;  %s1962_s4 = scalar_lea.hbm %s2223_s0, %s1232_s21  ;;  %s255_s7 = int_to_ptr.vmem [resolvable:$true] %s254_s7 }
  0x78   : > { %s244_s14 = scalar_lea.sflag [#allocation3], %s1851_s15  ;;  %s1555_s30 = scalar_lea.hbm %s1962_s4, 128 }
  0x79   : > { %p1556_p11 = scmp.ne.s32.totalorder %s1962_s4, %s1555_s30  ;;  %p2277_p12 = scmp.ne.s32.totalorder %s2271_s18, 0 }
  0x7a   : > { %s1560_s1 = scalar_lea.hbm %s2223_s0, 256  ;;  %p1561_p8 = scmp.lt.u32.totalorder %s1962_s4, %s2223_s0 }
  0x7b   : > { %p1558_p2 = pnand %p1556_p11, %p2277_p12  ;;  %p1562_p10 = scmp.lt.u32.totalorder %s1560_s1, %s1555_s30 }
  0x7c   : > { %p1564_p4 = scmp.lt.u32.totalorder %s1555_s30, %s1962_s4 }
  0x7d   : > { %p1559_p9 = pneg %p1558_p2  ;;  %p1563_p1 = por %p1562_p10, %p1561_p8 }
  0x7f   : > { %p1565_p6 = por %p1564_p4, %p1563_p1 }
  0x81   : > { %p1566_p5 = pnand %p1565_p6, %p1559_p9 }
  0x83   : > { %1569 = shalt.err (!%p1566_p5)
}
  0x84   : > { %s1570_s15 = scalar_lea.vmem %s255_s7, 128  ;;  %s1734_s21 = smov [#allocation2]  }
  0x85   : > { %p1571_p13 = scmp.ne.s32.totalorder %s255_s7, %s1570_s15  ;;  %s1575_s10 = sshll.u32 %s1734_s21, 4  ;;  %s1576_s10 = int_to_ptr.vmem [resolvable:$false] %s1575_s10 }
  0x86   : > { %s1577_s12 = scalar_lea.vmem %s1576_s10, 256  ;;  %p1578_p0 = scmp.lt.s32.totalorder %s255_s7, %s1576_s10 }
  0x87   : > { %p1573_p3 = pnand %p1571_p13, %p2277_p12  ;;  %p1579_p11 = scmp.lt.s32.totalorder %s1577_s12, %s1570_s15 }
  0x89   : > { %p1574_p7 = pneg %p1573_p3  ;;  %p1580_p2 = por %p1579_p11, %p1578_p0 }
  0x8b   : > { %p1581_p8 = pnand %p1580_p2, %p1574_p7 }
  0x8d   : > { %1584 = shalt.err (!%p1581_p8)
}
  0x8e   : > { %p2278_p10 = scmp.ne.s32.totalorder %s2268_s26, 0  ;;  %s1986_s16 = scalar_lea.hbm %s2225_s2, %s1891_s29 }
  0x8f   : > { %s286_s13 = scalar_lea.vmem [#allocation7], %s1888_s28  ;;  %s1995_s15 = scalar_lea.hbm %s2226_s3, %s1891_s29 }
  0x90   : > { %1394 = dma.hbm_to_vmem [thread:$0]  (!%p2278_p10), %s1962_s4, 128, %s255_s7, %s244_s14  }
  0x91   : > { %s293_s1 = sshll.u32 %s286_s13, 4  ;;  %s1585_s21 = scalar_lea.hbm %s1986_s16, 256  ;;  %s1989_s1 = int_to_ptr.vmem [resolvable:$true] %s293_s1 }
  0x92   : > { %p1586_p9 = scmp.ne.s32.totalorder %s1986_s16, %s1585_s21  ;;  %s1590_s14 = scalar_lea.hbm %s2225_s2, 512 }
  0x93   : > { %p1591_p6 = scmp.lt.u32.totalorder %s1986_s16, %s2225_s2  ;;  %p1592_p5 = scmp.lt.u32.totalorder %s1590_s14, %s1585_s21 }
  0x94   : > { %p1588_p1 = pnand %p1586_p9, %p2277_p12  ;;  %p1594_p3 = scmp.lt.u32.totalorder %s1585_s21, %s1986_s16 }
  0x95   : > { %p1593_p13 = por %p1592_p5, %p1591_p6 }
  0x96   : > { %p1589_p4 = pneg %p1588_p1 }
  0x97   : > { %p1595_p7 = por %p1594_p3, %p1593_p13 }
  0x99   : > { %p1596_p0 = pnand %p1595_p7, %p1589_p4 }
  0x9b   : > { %1599 = shalt.err (!%p1596_p0)
}
  0x9c   : > { %s1600_s29 = scalar_lea.vmem %s1989_s1, 256  ;;  %s1735_s19 = smov [#allocation7]  }
  0x9d   : > { %p1601_p11 = scmp.ne.s32.totalorder %s1989_s1, %s1600_s29  ;;  %s1605_s30 = sshll.u32 %s1735_s19, 4  ;;  %s1606_s30 = int_to_ptr.vmem [resolvable:$false] %s1605_s30 }
  0x9e   : > { %s1607_s13 = scalar_lea.vmem %s1606_s30, 512  ;;  %p1608_p9 = scmp.lt.s32.totalorder %s1989_s1, %s1606_s30 }
  0x9f   : > { %p1603_p2 = pnand %p1601_p11, %p2277_p12  ;;  %p1609_p1 = scmp.lt.s32.totalorder %s1607_s13, %s1600_s29 }
  0xa1   : > { %p1604_p8 = pneg %p1603_p2  ;;  %p1610_p6 = por %p1609_p1, %p1608_p9 }
  0xa3   : > { %p1611_p5 = pnand %p1610_p6, %p1604_p8 }
  0xa5   : > { %1614 = shalt.err (!%p1611_p5)
}
  0xa6   : > { %1400 = dma.hbm_to_vmem [thread:$0]  (!%p2278_p10), %s1986_s16, 256, %s1989_s1, %s1904_s20, %s2273_s17, %s2273_s17, %s2272_s23  }
  0xa7   : > { %s307_s27 = scalar_lea.vmem [#allocation8], %s1888_s28  ;;  %s2279_s21 = sand.u32 1, %s1727_s24  }
  0xa8   : > { %s314_s6 = sshll.u32 %s307_s27, 4  ;;  %s2027_s7 = scalar_lea.sflag [#allocation9], %s2279_s21  ;;  %s2023_s6 = int_to_ptr.vmem [resolvable:$true] %s314_s6 }
  0xa9   : > { %s1615_s4 = scalar_lea.hbm %s1995_s15, 256  ;;  %s1620_s12 = scalar_lea.hbm %s2226_s3, 512 }
  0xaa   : > { %p1616_p4 = scmp.ne.s32.totalorder %s1995_s15, %s1615_s4  ;;  %p1621_p7 = scmp.lt.u32.totalorder %s1995_s15, %s2226_s3 }
  0xab   : > { %p1622_p0 = scmp.lt.u32.totalorder %s1620_s12, %s1615_s4  ;;  %p1624_p2 = scmp.lt.u32.totalorder %s1615_s4, %s1995_s15 }
  0xac   : > { %p1618_p13 = pnand %p1616_p4, %p2277_p12 }
  0xad   : > { %p1623_p11 = por %p1622_p0, %p1621_p7 }
  0xae   : > { %p1619_p3 = pneg %p1618_p13 }
  0xaf   : > { %p1625_p8 = por %p1624_p2, %p1623_p11 }
  0xb1   : > { %p1626_p9 = pnand %p1625_p8, %p1619_p3 }
  0xb3   : > { %1629 = shalt.err (!%p1626_p9)
}
  0xb4   : > { %s1630_s28 = scalar_lea.vmem %s2023_s6, 256  ;;  %s1736_s20 = smov [#allocation8]  }
  0xb5   : > { %p1631_p1 = scmp.ne.s32.totalorder %s2023_s6, %s1630_s28  ;;  %s1635_s16 = sshll.u32 %s1736_s20, 4  ;;  %s1636_s16 = int_to_ptr.vmem [resolvable:$false] %s1635_s16 }
  0xb6   : > { %s1637_s1 = scalar_lea.vmem %s1636_s16, 512  ;;  %p1638_p4 = scmp.lt.s32.totalorder %s2023_s6, %s1636_s16 }
  0xb7   : > { %p1633_p6 = pnand %p1631_p1, %p2277_p12  ;;  %p1639_p13 = scmp.lt.s32.totalorder %s1637_s1, %s1630_s28 }
  0xb9   : > { %p1634_p5 = pneg %p1633_p6  ;;  %p1640_p7 = por %p1639_p13, %p1638_p4 }
  0xbb   : > { %p1641_p0 = pnand %p1640_p7, %p1634_p5 }
  0xbd   : > { %1644 = shalt.err (!%p1641_p0)
}
  0xbe   : > { %1403 = dma.hbm_to_vmem [thread:$0]  (!%p2278_p10), %s1995_s15, 256, %s2023_s6, %s2027_s7, %s2273_s17, %s2273_s17, %s2272_s23  }
  0xbf   : > { %p2280_p12 = scmp.ne.s32.totalorder %s2263_s11, 0 }
  0xc0   : > { %s2057_s18 = sand.u32 (!%p2280_p12), 1, %s1719_s22   ;;  %p2281_p3 = scmp.ne.s32.totalorder (!%p2280_p12), %s2259_s8, 0 }
  0xc1   : > { %326 = sbr.rel (%p2280_p12) target bundleno = 1054 (0x41e), region = 44  ;;  %s1243_s30 = sshll.u32 (!%p2280_p12), %s2057_s18, 3 }
  0xc2   : > { %s329_s13 = scalar_lea.sflag (!%p2280_p12), [#allocation3], %s2057_s18  ;;  %s2063_s26 = scalar_lea.vmem (!%p2280_p12), [#allocation2], %s1243_s30 }
  0xc8   : > { %1690 = dma.done.wait (%p2281_p3), %s329_s13, 128  }
  0xc9   : > { %1692 = vsyncadd (%p2281_p3), %s329_s13, 4294967168  ;;  %s337_s11 = sand.u32 1, %s1797_s25   ;;  %s1244_s23 = sshll.u32 %s2057_s18, 4 }
  0xca   : > { %s338_s17 = scalar_lea.sflag [#allocation6], %s337_s11  ;;  %s2071_s15 = scalar_lea.vmem [#allocation5], %s1244_s23 }
  0xcb   : > { %1694 = dma.done.wait (%p2281_p3), %s338_s17, 512  }
  0xcc   : > { %1696 = vsyncadd (%p2281_p3), %s338_s17, 4294966784  ;;  %s350_s27 = scalar_lea.vmem [#allocation7], %s1244_s23  ;;  %s356_s6 = scalar_lea.sflag [#allocation9], %s337_s11 }
  0xcd   : > { %s2077_s21 = scalar_lea.vmem [#allocation8], %s1244_s23 }
  0xce   : > { %1698 = dma.done.wait (%p2281_p3), %s356_s6, 256  }
  0xcf   : > { %1700 = vsyncadd (%p2281_p3), %s356_s6, 4294967040  ;;  %p2282_p10 = scmp.eq.s32.totalorder %s1797_s25, 0 }
  0xd1   : > { %1702 = dma.done.wait (%p2282_p10), [#allocation9], 256   ;;  %p2283_p11 = pmov %p2282_p10 }
  0xd2   : > { %p2284_p2 = pmov %p2282_p10 }
  0xd3   : > { %1704 = vsyncadd (%p2283_p11), [#allocation9], 4294967040 }
  0xd4   : > { %1706 = dma.done.wait (%p2284_p2), [#allocation12], 16   ;;  %p2285_p8 = pmov %p2284_p2 }
  0xd5   : > { %v1737_v0 = vmov 0.0   ;;  %vm1738_vm0 = vmmov 0   ;;  %vm432_vm1 = vcmask 1043456   ;;  %v416_v1 = vld [vmem:[%s350_s27] sm:$0xf]  ;;  %vm428_vm2 = vcmask 64512  }
  0xd6   : > { %1708 = vsyncadd (%p2285_p8), [#allocation12], 4294967280  ;;  %1294 = vmatprep.subr.bf16.mxu0 %v1737_v0  ;;  %1300 = vmatprep.subr.bf16.mxu1 %v1737_v0  ;;  %v417_v2 = vld [vmem:[%s350_s27 + $0x4] sm:$0xf]  ;;  %v434_v3 = vsel %vm432_vm1, %v416_v1, 0  ;;  %v424_v13 = vlaneseq  ;;  %vm1039_vm4 = vcmask 261120  }
  0xd7   : > { %1296 = vmatprep.mubr.msk.bf16.mxu0 %vm1738_vm0, %v1737_v0  ;;  %1302 = vmatprep.mubr.msk.bf16.mxu1 %vm1738_vm0, %v1737_v0  ;;  %v480_v4 = vsel %vm432_vm1, %v417_v2, 0  ;;  %v418_v5 = vld [vmem:[%s350_s27 + $0x8] sm:$0xf]  ;;  %v412_v6 = vld [vmem:[%s2071_s15] sm:$0xf]  ;;  %s1264_s8 = sshll.u32 %s1797_s25, 7 }
  0xd8   : > { %1295 = vmatpush3.bf16.msra.mxu0 %v434_v3  ;;  %1301 = vmatpush3.bf16.msra.mxu1 %v480_v4  ;;  %v413_v7 = vld [vmem:[%s2071_s15 + $0x4] sm:$0xf]  ;;  %v419_v8 = vld [vmem:[%s350_s27 + $0xc] sm:$0xf]  ;;  %v526_v9 = vsel %vm432_vm1, %v418_v5, 0  ;;  %v425_v14 = vand.u32 127, %v424_v13 }
  0xd9   : > { %1306 = vmatprep.subr.bf16.mxu0 %v1737_v0  ;;  %1312 = vmatprep.subr.bf16.mxu1 %v1737_v0  ;;  %v572_v10 = vsel %vm432_vm1, %v419_v8, 0  ;;  %v414_v11 = vld [vmem:[%s2071_s15 + $0x8] sm:$0xf]  ;;  %v415_v12 = vld [vmem:[%s2071_s15 + $0xc] sm:$0xf]  ;;  %s410_s7 = scalar_lea.vmem [#allocation13], %s1243_s30 }
  0xda   : > { %vm426_vm3 = vcmp.lt.s32.totalorder %v425_v14, 5  ;;  %v1739_v15 = vmov -1e+30   ;;  %v420_v41 = vld [vmem:[%s2077_s21] sm:$0xf]  ;;  %s1071_s4 = sshll.u32 %s410_s7, 4  ;;  %s2180_s4 = int_to_ptr.vmem [resolvable:$true] %s1071_s4 }
  0xdb   : > { %1297 = vmatmul.mubr.msk.bf16.vlgmr.msra.gmra.mrb[0].mxu0 %vm428_vm2, %v412_v6  ;;  %1303 = vmatmul.mubr.msk.bf16.vlgmr.msra.gmra.mrb[0].mxu1 %vm428_vm2, %v413_v7  ;;  %v427_v16 = vsel %vm426_vm3, 0.0, %v1739_v15  ;;  %v658_v42 = vsel %vm432_vm1, %v420_v41, 0  ;;  %v421_v43 = vld [vmem:[%s2077_s21 + $0x4] sm:$0xf]  ;;  %v422_v56 = vld [vmem:[%s2077_s21 + $0x8] sm:$0xf] }
  0xdc   : > { %1307 = vmatpush3.bf16.msra.mxu0 %v526_v9  ;;  %1313 = vmatpush3.bf16.msra.mxu1 %v572_v10  ;;  %v704_v44 = vsel %vm432_vm1, %v421_v43, 0  ;;  %v750_v61 = vsel %vm432_vm1, %v422_v56, 0  ;;  %v423_v62 = vld [vmem:[%s2077_s21 + $0xc] sm:$0xf]  ;;  %v850_v10 = vld [vmem:[#allocation10] sm:$0xf] }
  0xdd   : > { %1308 = vmatprep.mubr.msk.bf16.mxu0 %vm1738_vm0, %v1737_v0  ;;  %1314 = vmatprep.mubr.msk.bf16.mxu1 %vm1738_vm0, %v1737_v0  ;;  %v796_v3 = vsel %vm432_vm1, %v423_v62, 0  ;;  %s2286_s12 = sld [smem:[#allocation27_spill]]  ;;  %s1058_s19 = scalar_lea.sflag [#allocation4], %s2057_s18 }
  0xde   : > { %1318 = vmatprep.subr.bf16.mxu0 %v1737_v0  ;;  %1324 = vmatprep.subr.bf16.mxu1 %v1737_v0  ;;  %s1645_s28 = scalar_lea.vmem %s2180_s4, 128  ;;  %p2287_p1 = scmp.ne.s32.totalorder %s2260_s9, 0 }
  0xdf   : > { %p1646_p9 = scmp.ne.s32.totalorder %s2180_s4, %s1645_s28  ;;  %s1740_s25 = smov [#allocation13]  }
  0xe0   : > { %s1649_s20 = sshll.u32 %s1740_s25, 4  ;;  %s1650_s20 = int_to_ptr.vmem [resolvable:$false] %s1649_s20 }
  0xe1   : > { %p1647_p6 = pnand %p1646_p9, %p2287_p1  ;;  %s1651_s16 = scalar_lea.vmem %s1650_s20, 256 }
  0xe2   : > { %p1652_p4 = scmp.lt.s32.totalorder %s2180_s4, %s1650_s20  ;;  %p1653_p13 = scmp.lt.s32.totalorder %s1651_s16, %s1645_s28 }
  0xe3   : > { %1309 = vmatmul.mubr.msk.bf16.vlgmr.msra.gmra.mrb[4].mxu0 %vm428_vm2, %v414_v11  ;;  %1315 = vmatmul.mubr.msk.bf16.vlgmr.msra.gmra.mrb[4].mxu1 %vm428_vm2, %v415_v12  ;;  %v858_v11 = vsel %vm432_vm1, %v850_v10, 0  ;;  %v851_v12 = vld [vmem:[#allocation10 + $0x4] sm:$0xf]  ;;  %s2178_s29 = scalar_lea.hbm %s2286_s12, %s1264_s8  ;;  %p1648_p5 = pneg %p1647_p6 }
  0xe4   : > { %1320 = vmatprep.mubr.msk.bf16.mxu0 %vm1738_vm0, %v1737_v0  ;;  %1326 = vmatprep.mubr.msk.bf16.mxu1 %vm1738_vm0, %v1737_v0  ;;  %v904_v13 = vsel %vm432_vm1, %v851_v12, 0  ;;  %p1654_p7 = por %p1653_p13, %p1652_p4 }
  0xe5   : > { %1319 = vmatpush3.bf16.msra.mxu0 %v658_v42  ;;  %1325 = vmatpush3.bf16.msra.mxu1 %v704_v44 }
  0xe6   : > { %1330 = vmatprep.subr.bf16.mxu0 %v1737_v0  ;;  %1336 = vmatprep.subr.bf16.mxu1 %v1737_v0  ;;  %p1655_p0 = pnand %p1654_p7, %p1648_p5 }
 0x1ae   : > { %v470_v17 = vpop.f32.mrb[0].mxu0  ;;  %v516_v18 = vpop.f32.mrb[0].mxu1 }
 0x1af   : > { %v471_v19 = vadd.f32 %v470_v17, %v427_v16  ;;  %v1298_v20 = vpop.f32.mrb[1].mxu0  ;;  %v517_v21 = vadd.f32 %v516_v18, %v427_v16  ;;  %v1304_v22 = vpop.f32.mrb[1].mxu1 }
 0x1b0   : > { %v473_v23 = vpop.f32.mrb[2].mxu0  ;;  %v519_v24 = vpop.f32.mrb[2].mxu1  ;;  %v852_v20 = vld [vmem:[#allocation10 + $0x8] sm:$0xf] }
 0x1b1   : > { %v1299_v25 = vpop.f32.mrb[3].mxu0  ;;  %v614_v26 = vsel %vm428_vm2, %v471_v19, -inf  ;;  %v1305_v27 = vpop.f32.mrb[3].mxu1  ;;  %v617_v28 = vsel %vm428_vm2, %v517_v21, -inf }
 0x1b2   : > { %615 = vmax.xlane.f32.xlu0 %v614_v26  ;;  %v950_v26 = vsel %vm432_vm1, %v852_v20, 0 }
 0x1b6   : > { %618 = vmax.xlane.f32.xlu0 %v617_v28  ;;  %v562_v29 = vpop.f32.mrb[4].mxu0  ;;  %v608_v30 = vpop.f32.mrb[4].mxu1 }
 0x1b7   : > { %v563_v31 = vadd.f32 %v562_v29, %v427_v16  ;;  %v1310_v32 = vpop.f32.mrb[5].mxu0  ;;  %v609_v33 = vadd.f32 %v608_v30, %v427_v16  ;;  %v1316_v34 = vpop.f32.mrb[5].mxu1  ;;  %v853_v29 = vld [vmem:[#allocation10 + $0xc] sm:$0xf] }
 0x1b8   : > { %v565_v35 = vpop.f32.mrb[6].mxu0  ;;  %v611_v36 = vpop.f32.mrb[6].mxu1 }
 0x1b9   : > { %v1311_v37 = vpop.f32.mrb[7].mxu0  ;;  %v620_v38 = vsel %vm428_vm2, %v563_v31, -inf  ;;  %v1317_v39 = vpop.f32.mrb[7].mxu1  ;;  %v623_v40 = vsel %vm428_vm2, %v609_v33, -inf  ;;  %v996_v35 = vsel %vm432_vm1, %v853_v29, 0 }
 0x1ba   : > { %621 = vmax.xlane.f32.xlu1 %v620_v38 }
 0x1be   : > { %624 = vmax.xlane.f32.xlu1 %v623_v40 }
 0x23f   : > { %v616_v45 = vpop.xlane.xlu0 %615 }
 0x240   : > { %v626_v46 = vsub.f32 %v471_v19, %v616_v45 }
 0x242   : > { %v630_v47 = vmul.f32 1.442695, %v626_v46 }
 0x243   : > { %v619_v48 = vpop.xlane.xlu0 %618 }
 0x244   : > { %1453 = vpow2.f32 %v630_v47  ;;  %v627_v49 = vsub.f32 %v517_v21, %v619_v48 }
 0x246   : > { %v632_v50 = vmul.f32 1.442695, %v627_v49 }
 0x247   : > { %v622_v51 = vpop.xlane.xlu1 %621 }
 0x248   : > { %1455 = vpow2.f32 %v632_v50  ;;  %v628_v52 = vsub.f32 %v563_v31, %v622_v51 }
 0x24a   : > { %v634_v53 = vmul.f32 1.442695, %v628_v52 }
 0x24b   : > { %v625_v54 = vpop.xlane.xlu1 %624 }
 0x24c   : > { %1457 = vpow2.f32 %v634_v53  ;;  %v629_v55 = vsub.f32 %v609_v33, %v625_v54 }
 0x24e   : > { %v1454_v57 = vpop.eup %1453  ;;  %v636_v58 = vmul.f32 1.442695, %v629_v55 }
 0x24f   : > { %v638_v59 = vsel %vm428_vm2, %v1454_v57, 0.0  ;;  %v650_v60 = vpack.c.bf16 %v1454_v57, %v1454_v57 }
 0x250   : > { %1459 = vpow2.f32 %v636_v58  ;;  %639 = vadd.xlane.f32.xlu0 %v638_v59 }
 0x251   : > { %1321 = vmatmul.mubr.msk.bf16.vlgmr.msra.gmra.mrb[8].mxu0 %vm428_vm2, %v650_v60 }
 0x252   : > { %v1456_v63 = vpop.eup %1455  ;;  %1331 = vmatpush3.bf16.msra.mxu0 %v750_v61  ;;  %1332 = vmatprep.mubr.msk.bf16.mxu0 %vm1738_vm0, %v1737_v0 }
 0x253   : > { %v641_v1 = vsel %vm428_vm2, %v1456_v63, 0.0  ;;  %v651_v2 = vpack.c.bf16 %v1456_v63, %v1456_v63  ;;  %1342 = vmatprep.subr.bf16.mxu0 %v1737_v0 }
 0x254   : > { %642 = vadd.xlane.f32.xlu1 %v641_v1 }
 0x255   : > { %1327 = vmatmul.mubr.msk.bf16.vlgmr.msra.gmra.mrb[8].mxu1 %vm428_vm2, %v651_v2 }
 0x256   : > { %v1458_v4 = vpop.eup %1457  ;;  %1337 = vmatpush3.bf16.msra.mxu1 %v796_v3  ;;  %1338 = vmatprep.mubr.msk.bf16.mxu1 %vm1738_vm0, %v1737_v0 }
 0x257   : > { %v644_v5 = vsel %vm428_vm2, %v1458_v4, 0.0  ;;  %v652_v6 = vpack.c.bf16 %v1458_v4, %v1458_v4  ;;  %1348 = vmatprep.subr.bf16.mxu1 %v1737_v0  ;;  %v1038_v4 = vld [vmem:[%s2063_s26] sm:$0xff] }
 0x258   : > { %645 = vadd.xlane.f32.xlu0 %v644_v5 }
 0x259   : > { %1333 = vmatmul.mubr.msk.bf16.vlgmr.msra.gmra.mrb[12].mxu0 %vm428_vm2, %v652_v6 }
 0x25a   : > { %v1460_v7 = vpop.eup %1459  ;;  %1344 = vmatprep.mubr.msk.bf16.mxu0 %vm1738_vm0, %v1737_v0  ;;  %1343 = vmatpush3.bf16.msra.mxu0 %v858_v11 }
 0x25b   : > { %v647_v8 = vsel %vm428_vm2, %v1460_v7, 0.0  ;;  %v653_v9 = vpack.c.bf16 %v1460_v7, %v1460_v7  ;;  %1354 = vmatprep.subr.bf16.mxu0 %v1737_v0 }
 0x25c   : > { %648 = vadd.xlane.f32.xlu1 %v647_v8 }
 0x25d   : > { %1339 = vmatmul.mubr.msk.bf16.vlgmr.msra.gmra.mrb[12].mxu1 %vm428_vm2, %v653_v9  ;;  %v1262_v9 = vld [vmem:[#allocation11] ss:$0 sm:$0xff] }
 0x25e   : > { %1350 = vmatprep.mubr.msk.bf16.mxu1 %vm1738_vm0, %v1737_v0  ;;  %1349 = vmatpush3.bf16.msra.mxu1 %v904_v13 }
 0x25f   : > { %1360 = vmatprep.subr.bf16.mxu1 %v1737_v0 }
 0x2dd   : > { %v640_v14 = vpop.xlane.xlu0 %639 }
 0x2de   : > { %1461 = vrcp.f32 %v640_v14 }
 0x2e1   : > { %v643_v15 = vpop.xlane.xlu1 %642 }
 0x2e2   : > { %1463 = vrcp.f32 %v643_v15 }
 0x2e5   : > { %v646_v16 = vpop.xlane.xlu0 %645 }
 0x2e6   : > { %1465 = vrcp.f32 %v646_v16 }
 0x2e8   : > { %v1462_v18 = vpop.eup %1461 }
 0x2e9   : > { %v649_v17 = vpop.xlane.xlu1 %648 }
 0x2ea   : > { %1467 = vrcp.f32 %v649_v17 }
 0x2ec   : > { %v1464_v27 = vpop.eup %1463 }
 0x2f0   : > { %v1466_v36 = vpop.eup %1465 }
 0x2f4   : > { %v1468_v43 = vpop.eup %1467 }
 0x324   : > { %v694_v19 = vpop.f32.mrb[8].mxu0 }
 0x325   : > { %v842_v21 = vmul.f32 %v1462_v18, %v694_v19  ;;  %v1322_v22 = vpop.f32.mrb[9].mxu0 }
 0x326   : > { %v697_v23 = vpop.f32.mrb[10].mxu0 }
 0x327   : > { %v846_v24 = vpack.c.bf16 %v842_v21, %v842_v21  ;;  %v1323_v25 = vpop.f32.mrb[11].mxu0 }
 0x328   : > { %v740_v28 = vpop.f32.mrb[8].mxu1 }
 0x329   : > { %v843_v30 = vmul.f32 %v1464_v27, %v740_v28  ;;  %v1328_v31 = vpop.f32.mrb[9].mxu1  ;;  %1345 = vmatmul.mubr.msk.bf16.vlgmr.msra.gmra.mrb[16].mxu0 %vm428_vm2, %v846_v24 }
 0x32a   : > { %v743_v32 = vpop.f32.mrb[10].mxu1  ;;  %1355 = vmatpush3.bf16.msra.mxu0 %v950_v26  ;;  %1356 = vmatprep.mubr.msk.bf16.mxu0 %vm1738_vm0, %v1737_v0 }
 0x32b   : > { %v847_v33 = vpack.c.bf16 %v843_v30, %v843_v30  ;;  %v1329_v34 = vpop.f32.mrb[11].mxu1 }
 0x32c   : > { %v786_v37 = vpop.f32.mrb[12].mxu0 }
 0x32d   : > { %v844_v38 = vmul.f32 %v1466_v36, %v786_v37  ;;  %v1334_v39 = vpop.f32.mrb[13].mxu0  ;;  %1351 = vmatmul.mubr.msk.bf16.vlgmr.msra.gmra.mrb[16].mxu1 %vm428_vm2, %v847_v33 }
 0x32e   : > { %v789_v40 = vpop.f32.mrb[14].mxu0  ;;  %1361 = vmatpush3.bf16.msra.mxu1 %v996_v35  ;;  %1362 = vmatprep.mubr.msk.bf16.mxu1 %vm1738_vm0, %v1737_v0 }
 0x32f   : > { %v848_v41 = vpack.c.bf16 %v844_v38, %v844_v38  ;;  %v1335_v42 = vpop.f32.mrb[15].mxu0 }
 0x330   : > { %v832_v44 = vpop.f32.mrb[12].mxu1 }
 0x331   : > { %v845_v45 = vmul.f32 %v1468_v43, %v832_v44  ;;  %v1340_v46 = vpop.f32.mrb[13].mxu1  ;;  %1357 = vmatmul.mubr.msk.bf16.vlgmr.msra.gmra.mrb[20].mxu0 %vm428_vm2, %v848_v41 }
 0x332   : > { %v835_v47 = vpop.f32.mrb[14].mxu1 }
 0x333   : > { %v849_v48 = vpack.c.bf16 %v845_v45, %v845_v45  ;;  %v1341_v49 = vpop.f32.mrb[15].mxu1 }
 0x335   : > { %1363 = vmatmul.mubr.msk.bf16.vlgmr.msra.gmra.mrb[20].mxu1 %vm428_vm2, %v849_v48 }
 0x3fc   : > { %v894_v50 = vpop.f32.mrb[16].mxu0 }
 0x3fd   : > { %v1346_v51 = vpop.f32.mrb[17].mxu0  ;;  %v1040_v54 = vsel %vm1039_vm4, %v894_v50, 0.0 }
 0x3fe   : > { %v897_v52 = vpop.f32.mrb[18].mxu0 }
 0x3ff   : > { %v1347_v53 = vpop.f32.mrb[19].mxu0 }
 0x400   : > { %v940_v0 = vpop.f32.mrb[16].mxu1 }
 0x401   : > { %v1041_v55 = vsel %vm1039_vm4, %v940_v0, 0.0  ;;  %v1352_v56 = vpop.f32.mrb[17].mxu1 }
 0x402   : > { %v1042_v57 = vadd.f32 %v1041_v55, %v1040_v54  ;;  %v943_v58 = vpop.f32.mrb[18].mxu1 }
 0x403   : > { %v1353_v59 = vpop.f32.mrb[19].mxu1 }
 0x404   : > { %v986_v60 = vpop.f32.mrb[20].mxu0 }
 0x405   : > { %v1043_v61 = vsel %vm1039_vm4, %v986_v60, 0.0  ;;  %v1358_v62 = vpop.f32.mrb[21].mxu0 }
 0x406   : > { %v1044_v63 = vadd.f32 %v1043_v61, %v1042_v57  ;;  %v989_v1 = vpop.f32.mrb[22].mxu0 }
 0x407   : > { %v1359_v2 = vpop.f32.mrb[23].mxu0 }
 0x408   : > { %v1032_v3 = vpop.f32.mrb[20].mxu1 }
 0x409   : > { %v1045_v5 = vsel %vm1039_vm4, %v1032_v3, 0.0  ;;  %v1364_v6 = vpop.f32.mrb[21].mxu1 }
 0x40a   : > { %v1046_v7 = vadd.f32 %v1045_v5, %v1044_v63  ;;  %v1035_v8 = vpop.f32.mrb[22].mxu1 }
 0x40b   : > { %v1365_v10 = vpop.f32.mrb[23].mxu1 }
 0x40c   : > { %v1047_v11 = vadd.f32 %v1046_v7, %v1038_v4 }
 0x40e   : > { %v1055_v12 = vadd.f32 %v1262_v9, %v1047_v11 }
 0x410   : > { %1056 = vst.msk [vmem:[%s410_s7] sm:$0xff] %vm1039_vm4, %v1055_v12 }
 0x411   : > { %1658 = shalt.err (!%p1655_p0)
}
 0x412   : > { %s1659_s1 = scalar_lea.hbm %s2178_s29, 128  ;;  %s1663_s13 = scalar_lea.hbm %s2286_s12, 256 }
 0x413   : > { %p1660_p12 = scmp.ne.s32.totalorder %s2178_s29, %s1659_s1  ;;  %p1664_p11 = scmp.lt.u32.totalorder %s2178_s29, %s2286_s12 }
 0x414   : > { %p1665_p2 = scmp.lt.u32.totalorder %s1663_s13, %s1659_s1  ;;  %p1667_p9 = scmp.lt.u32.totalorder %s1659_s1, %s2178_s29 }
 0x415   : > { %p1661_p3 = pnand %p1660_p12, %p2287_p1 }
 0x416   : > { %p1666_p8 = por %p1665_p2, %p1664_p11 }
 0x417   : > { %p1662_p10 = pneg %p1661_p3 }
 0x418   : > { %p1668_p6 = por %p1667_p9, %p1666_p8 }
 0x41a   : > { %p1669_p5 = pnand %p1668_p6, %p1662_p10 }
 0x41c   : > { %1672 = shalt.err (!%p1669_p5)
}
 0x41d   : > { %1382 = dma.vmem_to_hbm [thread:$0]  (%p2287_p1), %s2180_s4, 128, %s2178_s29, %s1058_s19  }
 0x41e PF: > { %s2288_s23 = sld [smem:[#allocation20_spill]]  ;;  %s2289_s17 = sld [smem:[#allocation24_spill]] }
 0x41f   : > { %p2291_p13 = scmp.ge.s32.totalorder %s1727_s24, 2 }
 0x424   : > { %s1083_s15 = sand.u32 1, %s2288_s23   ;;  %p2290_p4 = scmp.ne.s32.totalorder %s2289_s17, 0 }
 0x425   : > { %s1084_s27 = scalar_lea.sflag [#allocation4], %s1083_s15 }
 0x426   : > { %p1405_p7 = pnand %p2291_p13, %p2290_p4 }
 0x428   : > { %1710 = dma.done.wait (!%p1405_p7), %s1084_s27, 128  }
 0x429   : > { %1712 = vsyncadd (!%p1405_p7), %s1084_s27, 4294967168  ;;  %s2292_s24 = sld [smem:[#allocation22_spill]]  ;;  %s2293_s6 = sld [smem:[#allocation21_spill]] }
 0x42a   : > { %s2294_s23 = sld [smem:[#allocation23_spill]]  ;;  %s2295_s21 = smov %s1719_s22 }
 0x42f   : > { %p26_p0 = scmp.ge.s32.totalorder %s2292_s24, 4   ;;  %s2296_s22 = smov %s2293_s6 }
 0x431   :  { %28 = sbr.rel (!%p26_p0) target bundleno = 14 (0xe), region = 134 }
 0x438   :  { %1089 = vsyncpa [#allocation3], 1 }
 0x439   :  { %1091 = vsyncpa [#allocation3 + $0x1], 1 }
 0x43a   :  { %1092 = vsyncpa [#allocation6], 1 }
 0x43b   :  { %1094 = vsyncpa [#allocation6 + $0x1], 1 }
 0x43c   :  { %1095 = vsyncpa [#allocation9], 1 }
 0x43d   :  { %1097 = vsyncpa [#allocation9 + $0x1], 1 }
 0x43e   :  { %1098 = vsyncpa [#allocation12], 1 }
 0x43f   :  { %1099 = vsyncpa [#allocation4], 1 }
 0x440   :  { %1101 = vsyncpa [#allocation4 + $0x1], 1 }

// kernel: vit_encoder_forward.13
= control target key start
LH: loop header
LB: loop body
LE: loop exit
PB: predicated region body
PF: predicated region fallthrough
CT: control target
= control target key end

     0   :  { %14 = vsyncpa [#allocation4], 0  ;;  %s968_s0 = inlined_call_operand.hbm [shape: f32[16,32], index: 0, kind: input, shape index: {}, may-alias: {0,9}]   ;;  %s969_s1 = inlined_call_operand.hbm [shape: f32[1,32], index: 1, kind: input, shape index: {}]   ;;  %s970_s2 = inlined_call_operand.hbm [shape: f32[1,32], index: 2, kind: input, shape index: {}]   ;;  %s971_s3 = inlined_call_operand.hbm [shape: bf16[32,64], index: 3, kind: input, shape index: {}]   ;;  %s972_s4 = inlined_call_operand.hbm [shape: f32[1,64], index: 4, kind: input, shape index: {}]   ;;  %s973_s5 = inlined_call_operand.hbm [shape: bf16[64,32], index: 5, kind: input, shape index: {}]   ;;  %s974_s6 = inlined_call_operand.hbm [shape: f32[1,32], index: 6, kind: input, shape index: {}]   ;;  %s975_s7 = inlined_call_operand.hbm [shape: f32[1,32], index: 7, kind: input, shape index: {}]   ;;  %s976_s8 = inlined_call_operand.hbm [shape: f32[1,32], index: 8, kind: input, shape index: {}]   ;;  %s977_s9 = inlined_call_operand.hbm [shape: f32[16,32], index: 9, kind: output, shape index: {}, may-alias: {0,9}]  }
   0x1   :  { %15 = vsyncpa [#allocation7], 0 }
   0x2   :  { %16 = vsyncpa [#allocation10], 0 }
   0x3   :  { %17 = vsyncpa [#allocation13], 0 }
   0x4   :  { %18 = vsyncpa [#allocation16], 0 }
   0x5   :  { %19 = vsyncpa [#allocation5], 0  ;;  %s753_s30 = smov [#allocation6]   ;;  %s754_s11 = smov [#allocation9]  }
   0x6   :  { %s38_s10 = sshll.u32 %s753_s30, 4  ;;  %s57_s12 = sshll.u32 %s754_s11, 4  ;;  %s39_s10 = int_to_ptr.vmem [resolvable:$true] %s38_s10  ;;  %s819_s12 = int_to_ptr.vmem [resolvable:$true] %s57_s12 }
   0x7   :  { %s521_s15 = scalar_lea.hbm %s969_s1, 16 }
   0x8   :  { %p522_p0 = scmp.ne.s32.totalorder %s969_s1, %s521_s15  ;;  %p525_p1 = scmp.lt.u32.totalorder %s521_s15, %s969_s1 }
   0xa   :  { %p527_p2 = pnand %p525_p1, %p522_p0 }
   0xc   :  { %530 = shalt.err (!%p527_p2)
}
   0xd   :  { %s531_s20 = scalar_lea.vmem %s39_s10, 16  ;;  %s535_s21 = scalar_lea.vmem %s39_s10, 32 }
   0xe   :  { %p532_p3 = scmp.ne.s32.totalorder %s39_s10, %s531_s20  ;;  %p536_p4 = scmp.lt.s32.totalorder %s39_s10, %s39_s10 }
   0xf   :  { %p537_p5 = scmp.lt.s32.totalorder %s535_s21, %s531_s20 }
  0x11   :  { %p538_p6 = por %p537_p5, %p536_p4 }
  0x13   :  { %p539_p7 = pnand %p538_p6, %p532_p3 }
  0x15   :  { %542 = shalt.err (!%p539_p7)
}
  0x16   :  { %41 = dma.hbm_to_vmem [thread:$0]  %s969_s1, 16, %s39_s10, [#allocation7]  }
  0x17   :  { %s543_s26 = scalar_lea.hbm %s971_s3, 256 }
  0x18   :  { %p544_p8 = scmp.ne.s32.totalorder %s971_s3, %s543_s26  ;;  %p547_p9 = scmp.lt.u32.totalorder %s543_s26, %s971_s3 }
  0x1a   :  { %p549_p10 = pnand %p547_p9, %p544_p8 }
  0x1c   :  { %552 = shalt.err (!%p549_p10)
}
  0x1d   :  { %s553_s11 = scalar_lea.vmem %s819_s12, 256  ;;  %p558_p12 = scmp.lt.s32.totalorder %s819_s12, %s819_s12 }
  0x1e   :  { %p554_p11 = scmp.ne.s32.totalorder %s819_s12, %s553_s11  ;;  %p559_p13 = scmp.lt.s32.totalorder %s553_s11, %s553_s11 }
  0x20   :  { %p560_p0 = por %p559_p13, %p558_p12 }
  0x22   :  { %p561_p1 = pnand %p560_p0, %p554_p11 }
  0x24   :  { %564 = shalt.err (!%p561_p1)
}
  0x25   :  { %s755_s1 = smov 64   ;;  %s756_s10 = smov 4  }
  0x26   :  { %63 = dma.hbm_to_vmem [thread:$0]  %s971_s3, 256, %s819_s12, [#allocation10], %s755_s1, %s755_s1, %s756_s10  }
  0x27   :  { %s757_s15 = smov [#allocation12]   ;;  %s758_s17 = smov [#allocation15]  }
  0x28   :  { %s79_s16 = sshll.u32 %s757_s15, 4  ;;  %s102_s18 = sshll.u32 %s758_s17, 4  ;;  %s80_s16 = int_to_ptr.vmem [resolvable:$true] %s79_s16  ;;  %s103_s18 = int_to_ptr.vmem [resolvable:$true] %s102_s18 }
  0x29   :  { %s565_s21 = scalar_lea.hbm %s973_s5, 512 }
  0x2a   :  { %p566_p2 = scmp.ne.s32.totalorder %s973_s5, %s565_s21  ;;  %p569_p3 = scmp.lt.u32.totalorder %s565_s21, %s973_s5 }
  0x2c   :  { %p571_p4 = pnand %p569_p3, %p566_p2 }
  0x2e   :  { %574 = shalt.err (!%p571_p4)
}
  0x2f   :  { %s575_s3 = scalar_lea.vmem %s80_s16, 512  ;;  %p580_p6 = scmp.lt.s32.totalorder %s80_s16, %s80_s16 }
  0x30   :  { %p576_p5 = scmp.ne.s32.totalorder %s80_s16, %s575_s3  ;;  %p581_p7 = scmp.lt.s32.totalorder %s575_s3, %s575_s3 }
  0x32   :  { %p582_p8 = por %p581_p7, %p580_p6 }
  0x34   :  { %p583_p9 = pnand %p582_p8, %p576_p5 }
  0x36   :  { %586 = shalt.err (!%p583_p9)
}
  0x37   :  { %85 = dma.hbm_to_vmem [thread:$0]  %s973_s5, 512, %s80_s16, [#allocation13], %s755_s1, %s755_s1, %s756_s10  }
  0x38   :  { %s587_s29 = scalar_lea.hbm %s975_s7, 16 }
  0x39   :  { %p588_p10 = scmp.ne.s32.totalorder %s975_s7, %s587_s29  ;;  %p591_p11 = scmp.lt.u32.totalorder %s587_s29, %s975_s7 }
  0x3b   :  { %p593_p12 = pnand %p591_p11, %p588_p10 }
  0x3d   :  { %596 = shalt.err (!%p593_p12)
}
  0x3e   :  { %s597_s15 = scalar_lea.vmem %s103_s18, 16  ;;  %s601_s17 = scalar_lea.vmem %s103_s18, 32 }
  0x3f   :  { %p598_p13 = scmp.ne.s32.totalorder %s103_s18, %s597_s15  ;;  %p602_p0 = scmp.lt.s32.totalorder %s103_s18, %s103_s18 }
  0x40   :  { %p603_p1 = scmp.lt.s32.totalorder %s601_s17, %s597_s15 }
  0x42   :  { %p604_p2 = por %p603_p1, %p602_p0 }
  0x44   :  { %p605_p3 = pnand %p604_p2, %p598_p13 }
  0x46   :  { %608 = shalt.err (!%p605_p3)
}
  0x47   :  { %105 = dma.hbm_to_vmem [thread:$0]  %s975_s7, 16, %s103_s18, [#allocation16]  }
  0x48   :  { %s759_s10 = smov [#allocation3]   ;;  %s609_s21 = scalar_lea.hbm %s968_s0, 256 }
  0x49   :  { %s25_s16 = sshll.u32 %s759_s10, 4  ;;  %p610_p4 = scmp.ne.s32.totalorder %s968_s0, %s609_s21  ;;  %s26_s16 = int_to_ptr.vmem [resolvable:$true] %s25_s16 }
  0x4a   :  { %p613_p5 = scmp.lt.u32.totalorder %s609_s21, %s968_s0 }
  0x4c   :  { %p615_p6 = pnand %p613_p5, %p610_p4 }
  0x4e   :  { %618 = shalt.err (!%p615_p6)
}
  0x4f   :  { %s619_s3 = scalar_lea.vmem %s26_s16, 256  ;;  %p624_p8 = scmp.lt.s32.totalorder %s26_s16, %s26_s16 }
  0x50   :  { %p620_p7 = scmp.ne.s32.totalorder %s26_s16, %s619_s3  ;;  %p625_p9 = scmp.lt.s32.totalorder %s619_s3, %s619_s3 }
  0x52   :  { %p626_p10 = por %p625_p9, %p624_p8 }
  0x54   :  { %p627_p11 = pnand %p626_p10, %p620_p7 }
  0x56   :  { %630 = shalt.err (!%p627_p11)
}
  0x57   :  { %s760_s7 = smov 128   ;;  %s761_s18 = smov 8  }
  0x58   :  { %31 = dma.hbm_to_vmem [thread:$0]  %s968_s0, 256, %s26_s16, [#allocation4], %s760_s7, %s760_s7, %s761_s18  }
  0x59   :  { %s762_s27 = smov [#allocation8]   ;;  %s763_s29 = smov [#allocation11]  }
  0x5a   :  { %s48_s28 = sshll.u32 %s762_s27, 4  ;;  %s70_s30 = sshll.u32 %s763_s29, 4  ;;  %s49_s28 = int_to_ptr.vmem [resolvable:$true] %s48_s28  ;;  %s71_s30 = int_to_ptr.vmem [resolvable:$true] %s70_s30 }
  0x5b   :  { %s631_s14 = scalar_lea.hbm %s970_s2, 16 }
  0x5c   :  { %p632_p12 = scmp.ne.s32.totalorder %s970_s2, %s631_s14  ;;  %p635_p13 = scmp.lt.u32.totalorder %s631_s14, %s970_s2 }
  0x5e   :  { %p637_p0 = pnand %p635_p13, %p632_p12 }
  0x60   :  { %640 = shalt.err (!%p637_p0)
}
  0x61   :  { %s641_s0 = scalar_lea.vmem %s49_s28, 16  ;;  %s645_s10 = scalar_lea.vmem %s49_s28, 32 }
  0x62   :  { %p642_p1 = scmp.ne.s32.totalorder %s49_s28, %s641_s0  ;;  %p646_p2 = scmp.lt.s32.totalorder %s49_s28, %s49_s28 }
  0x63   :  { %p647_p3 = scmp.lt.s32.totalorder %s645_s10, %s641_s0 }
  0x65   :  { %p648_p4 = por %p647_p3, %p646_p2 }
  0x67   :  { %p649_p5 = pnand %p648_p4, %p642_p1 }
  0x69   :  { %652 = shalt.err (!%p649_p5)
}
  0x6a   :  { %51 = dma.hbm_to_vmem [thread:$0]  %s970_s2, 16, %s49_s28, [#allocation7]  }
  0x6b   :  { %s653_s22 = scalar_lea.hbm %s972_s4, 16 }
  0x6c   :  { %p654_p6 = scmp.ne.s32.totalorder %s972_s4, %s653_s22  ;;  %p657_p7 = scmp.lt.u32.totalorder %s653_s22, %s972_s4 }
  0x6e   :  { %p659_p8 = pnand %p657_p7, %p654_p6 }
  0x70   :  { %662 = shalt.err (!%p659_p8)
}
  0x71   :  { %s663_s12 = scalar_lea.vmem %s71_s30, 16  ;;  %s667_s26 = scalar_lea.vmem %s71_s30, 32 }
  0x72   :  { %p664_p9 = scmp.ne.s32.totalorder %s71_s30, %s663_s12  ;;  %p668_p10 = scmp.lt.s32.totalorder %s71_s30, %s71_s30 }
  0x73   :  { %p669_p11 = scmp.lt.s32.totalorder %s667_s26, %s663_s12 }
  0x75   :  { %p670_p12 = por %p669_p11, %p668_p10 }
  0x77   :  { %p671_p13 = pnand %p670_p12, %p664_p9 }
  0x79   :  { %674 = shalt.err (!%p671_p13)
}
  0x7a   :  { %73 = dma.hbm_to_vmem [thread:$0]  %s972_s4, 16, %s71_s30, [#allocation10]  }
  0x7b   :  { %s764_s28 = smov [#allocation14]   ;;  %s765_s11 = smov [#allocation17]  }
  0x7c   :  { %s92_s29 = sshll.u32 %s764_s28, 4  ;;  %s112_s13 = sshll.u32 %s765_s11, 4  ;;  %s93_s29 = int_to_ptr.vmem [resolvable:$true] %s92_s29  ;;  %s113_s13 = int_to_ptr.vmem [resolvable:$true] %s112_s13 }
  0x7d   :  { %s675_s17 = scalar_lea.hbm %s974_s6, 16 }
  0x7e   :  { %p676_p0 = scmp.ne.s32.totalorder %s974_s6, %s675_s17  ;;  %p679_p1 = scmp.lt.u32.totalorder %s675_s17, %s974_s6 }
  0x80   :  { %p681_p2 = pnand %p679_p1, %p676_p0 }
  0x82   :  { %684 = shalt.err (!%p681_p2)
}
  0x83   :  { %s685_s4 = scalar_lea.vmem %s93_s29, 16  ;;  %s689_s30 = scalar_lea.vmem %s93_s29, 32 }
  0x84   :  { %p686_p3 = scmp.ne.s32.totalorder %s93_s29, %s685_s4  ;;  %p690_p4 = scmp.lt.s32.totalorder %s93_s29, %s93_s29 }
  0x85   :  { %p691_p5 = scmp.lt.s32.totalorder %s689_s30, %s685_s4 }
  0x87   :  { %p692_p6 = por %p691_p5, %p690_p4 }
  0x89   :  { %p693_p7 = pnand %p692_p6, %p686_p3 }
  0x8b   :  { %696 = shalt.err (!%p693_p7)
}
  0x8c   :  { %95 = dma.hbm_to_vmem [thread:$0]  %s974_s6, 16, %s93_s29, [#allocation13]  }
  0x8d   :  { %s697_s22 = scalar_lea.hbm %s976_s8, 16 }
  0x8e   :  { %p698_p8 = scmp.ne.s32.totalorder %s976_s8, %s697_s22  ;;  %p701_p9 = scmp.lt.u32.totalorder %s697_s22, %s976_s8 }
  0x90   :  { %p703_p10 = pnand %p701_p9, %p698_p8 }
  0x92   :  { %706 = shalt.err (!%p703_p10)
}
  0x93   :  { %s707_s12 = scalar_lea.vmem %s113_s13, 16  ;;  %s711_s26 = scalar_lea.vmem %s113_s13, 32 }
  0x94   :  { %p708_p11 = scmp.ne.s32.totalorder %s113_s13, %s707_s12  ;;  %p712_p12 = scmp.lt.s32.totalorder %s113_s13, %s113_s13 }
  0x95   :  { %p713_p13 = scmp.lt.s32.totalorder %s711_s26, %s707_s12 }
  0x97   :  { %p714_p0 = por %p713_p13, %p712_p12 }
  0x99   :  { %p715_p1 = pnand %p714_p0, %p708_p11 }
  0x9b   :  { %718 = shalt.err (!%p715_p1)
}
  0x9c   :  { %115 = dma.hbm_to_vmem [thread:$0]  %s976_s8, 16, %s113_s13, [#allocation16]  }
  0x9d   :  { %741 = dma.done.wait [#allocation4], 256  }
  0x9e   :  { %742 = vsyncadd [#allocation4], 4294967040 }
  0x9f   :  { %743 = dma.done.wait [#allocation7], 32  }
  0xa0   :  { %744 = vsyncadd [#allocation7], 4294967264 }
  0xa1   :  { %745 = dma.done.wait [#allocation10], 272  }
  0xa2   :  { %746 = vsyncadd [#allocation10], 4294967024 }
  0xa3   :  { %747 = dma.done.wait [#allocation13], 528  }
  0xa4   :  { %748 = vsyncadd [#allocation13], 4294966768 }
  0xa5   :  { %749 = dma.done.wait [#allocation16], 32  }
  0xa6   :  { %750 = vsyncadd [#allocation16], 4294967264  ;;  %vm152_vm0 = vcmask 261120   ;;  %v148_v0 = vld [vmem:[#allocation3] sm:$0xff]  ;;  %v149_v2 = vld [vmem:[#allocation3 + $0x8] sm:$0xff]  ;;  %v766_v18 = vmov 0.0  }
  0xa7   :  { %v447_v1 = vld [vmem:[#allocation14] ss:$0 sm:$0xff]  ;;  %v153_v3 = vsel %vm152_vm0, %v148_v0, 0.0  ;;  %v156_v5 = vsel %vm152_vm0, %v149_v2, 0.0  ;;  %v503_v17 = vld [vmem:[#allocation9] sm:$0xff]   ;;  %467 = vmatprep.subr.bf16.mxu0 %v766_v18  ;;  %475 = vmatprep.subr.bf16.mxu1 %v766_v18  ;;  %v504_v19 = vld [vmem:[#allocation9 + $0x8] sm:$0xff]  }
  0xa8   :  { %v205_v4 = vadd.f32 %v447_v1, %v148_v0  ;;  %v206_v6 = vadd.f32 %v447_v1, %v149_v2  ;;  %154 = vadd.xlane.f32.xlu0 %v153_v3  ;;  %468 = vmatpush3.bf16.msra.mxu0 %v503_v17  ;;  %vm767_vm1 = vmmov 0   ;;  %v445_v28 = vld [vmem:[#allocation6] ss:$0 sm:$0xff]  ;;  %v446_v32 = vld [vmem:[#allocation8] ss:$0 sm:$0xff]  ;;  %v505_v38 = vld [vmem:[#allocation12] sm:$0xff]  }
  0xa9   :  { %471 = vmatprep.mubr.msk.bf16.mxu0 %vm767_vm1, %v766_v18  ;;  %469 = vmatprep.subr.bf16.mxu0 %v766_v18  ;;  %v506_v39 = vld [vmem:[#allocation12 + $0x8] sm:$0xff]   ;;  %v507_v40 = vld [vmem:[#allocation12 + $0x10] sm:$0xff]   ;;  %v508_v41 = vld [vmem:[#allocation12 + $0x18] sm:$0xff]   ;;  %vm323_vm2 = vcmask 523264   ;;  %s768_s8 = smov [#allocation18]  }
  0xaa   :  { %207 = vst.msk [vmem:[#allocation18] sm:$0xff] %vm152_vm0, %v205_v4  ;;  %208 = vst.msk [vmem:[#allocation18 + $0x8] sm:$0xff] %vm152_vm0, %v206_v6  ;;  %483 = vmatprep.mubr.msk.bf16.mxu1 %vm767_vm1, %v766_v18  ;;  %476 = vmatpush3.bf16.msra.mxu1 %v505_v38  ;;  %v448_v42 = vld [vmem:[#allocation11] ss:$0 sm:$0xff]  ;;  %s429_s27 = sshll.u32 %s768_s8, 4  ;;  %s430_s27 = int_to_ptr.vmem [resolvable:$true] %s429_s27 }
  0xab   :  { %477 = vmatprep.subr.bf16.mxu1 %v766_v18  ;;  %s719_s28 = scalar_lea.vmem %s430_s27, 256  ;;  %p724_p3 = scmp.lt.s32.totalorder %s430_s27, %s430_s27 }
  0xac   :  { %157 = vadd.xlane.f32.xlu0 %v156_v5  ;;  %470 = vmatpush3.bf16.msra.mxu0 %v504_v19  ;;  %p720_p2 = scmp.ne.s32.totalorder %s430_s27, %s719_s28  ;;  %p725_p4 = scmp.lt.s32.totalorder %s719_s28, %s719_s28 }
  0xae   :  { %478 = vmatpush3.bf16.msra.mxu1 %v506_v39  ;;  %p726_p5 = por %p725_p4, %p724_p3 }
  0xaf   :  { %479 = vmatprep.subr.bf16.mxu1 %v766_v18 }
  0xb0   :  { %p727_p6 = pnand %p726_p5, %p720_p2 }
  0xb1   :  { %v289_v60 = vld [vmem:[#allocation18] sm:$0xff]  ;;  %v290_v62 = vld [vmem:[#allocation18 + $0x8] sm:$0xff] }
  0xb2   :  { %480 = vmatpush3.bf16.msra.mxu1 %v507_v40 }
  0xb3   :  { %481 = vmatprep.subr.bf16.mxu1 %v766_v18 }
  0xb6   :  { %482 = vmatpush3.bf16.msra.mxu1 %v508_v41 }
 0x135   :  { %v155_v7 = vpop.xlane.xlu0 %154 }
 0x136   :  { %v160_v8 = vmul.f32 0.03125, %v155_v7 }
 0x138   :  { %v162_v9 = vsub.f32 %v148_v0, %v160_v8 }
 0x139   :  { %v158_v10 = vpop.xlane.xlu0 %157 }
 0x13a   :  { %v161_v11 = vmul.f32 0.03125, %v158_v10  ;;  %v164_v12 = vmul.f32 %v162_v9, %v162_v9 }
 0x13c   :  { %v163_v13 = vsub.f32 %v149_v2, %v161_v11  ;;  %v166_v14 = vsel %vm152_vm0, %v164_v12, 0.0 }
 0x13d   :  { %167 = vadd.xlane.f32.xlu1 %v166_v14 }
 0x13e   :  { %v165_v15 = vmul.f32 %v163_v13, %v163_v13 }
 0x140   :  { %v169_v16 = vsel %vm152_vm0, %v165_v15, 0.0 }
 0x141   :  { %170 = vadd.xlane.f32.xlu1 %v169_v16 }
 0x1ca   :  { %v168_v20 = vpop.xlane.xlu1 %167 }
 0x1cb   :  { %v172_v21 = vmul.f32 0.03125, %v168_v20 }
 0x1cd   :  { %v174_v22 = vadd.f32 1e-12, %v172_v21 }
 0x1ce   :  { %v171_v23 = vpop.xlane.xlu1 %170 }
 0x1cf   :  { %509 = vrsqrt.f32 %v174_v22  ;;  %v173_v24 = vmul.f32 0.03125, %v171_v23 }
 0x1d1   :  { %v175_v25 = vadd.f32 1e-12, %v173_v24 }
 0x1d3   :  { %511 = vrsqrt.f32 %v175_v25  ;;  %v457_v25 = vld [vmem:[#allocation15] ss:$0 sm:$0xff] }
 0x1d9   :  { %v510_v26 = vpop.eup %509 }
 0x1da   :  { %v178_v27 = vmul.f32 %v510_v26, %v162_v9 }
 0x1dc   :  { %v186_v30 = vmul.f32 %v445_v28, %v178_v27 }
 0x1dd   :  { %v512_v29 = vpop.eup %511 }
 0x1de   :  { %v179_v31 = vmul.f32 %v512_v29, %v163_v13  ;;  %v194_v34 = vadd.f32 %v446_v32, %v186_v30 }
 0x1e0   :  { %v187_v33 = vmul.f32 %v445_v28, %v179_v31  ;;  %v458_v28 = vld [vmem:[#allocation17] ss:$0 sm:$0xff] }
 0x1e2   :  { %v195_v35 = vadd.f32 %v446_v32, %v187_v33 }
 0x1e4   :  { %v196_v36 = vpack.c.bf16 %v195_v35, %v194_v34 }
 0x1e6   :  { %197 = vst.msk [vmem:[#allocation2] sm:$0xff] %vm152_vm0, %v196_v36 }
 0x1ed   :  { %v209_v37 = vld [vmem:[#allocation2] sm:$0xff] }
 0x1ee   :  { %472 = vmatmul.mubr.msk.bf16.vlgmr.msra.gmra.mrb[0].mxu0 %vm152_vm0, %v209_v37 }
 0x2c1   :  { %v271_v43 = vpop.f32.mrb[0].mxu0 }
 0x2c2   :  { %v272_v44 = vadd.f32 %v448_v42, %v271_v43  ;;  %v473_v45 = vpop.f32.mrb[1].mxu0 }
 0x2c3   :  { %v274_v46 = vpop.f32.mrb[2].mxu0 }
 0x2c4   :  { %v280_v47 = vmul.f32 0.70710677, %v272_v44  ;;  %v275_v48 = vadd.f32 %v448_v42, %v274_v46  ;;  %v474_v49 = vpop.f32.mrb[3].mxu0  ;;  %v278_v54 = vmul.f32 0.5, %v272_v44 }
 0x2c6   :  { %513 = verf.f32 %v280_v47  ;;  %v281_v50 = vmul.f32 0.70710677, %v275_v48  ;;  %v279_v55 = vmul.f32 0.5, %v275_v48 }
 0x2c8   :  { %515 = verf.f32 %v281_v50 }
 0x2d0   :  { %v514_v51 = vpop.eup %513 }
 0x2d1   :  { %v284_v52 = vadd.f32 1.0, %v514_v51 }
 0x2d2   :  { %v516_v53 = vpop.eup %515 }
 0x2d3   :  { %v285_v56 = vadd.f32 1.0, %v516_v53  ;;  %v286_v57 = vmul.f32 %v284_v52, %v278_v54 }
 0x2d5   :  { %v287_v58 = vmul.f32 %v285_v56, %v279_v55 }
 0x2d7   :  { %v288_v59 = vpack.c.bf16 %v287_v58, %v286_v57 }
 0x2d9   :  { %484 = vmatmul.mubr.msk.bf16.vlgmr.msra.gmra.mrb[0].mxu1 %vm323_vm2, %v288_v59 }
 0x3ac   :  { %v361_v61 = vpop.f32.mrb[0].mxu1 }
 0x3ad   :  { %v368_v63 = vadd.f32 %v361_v61, %v289_v60  ;;  %v485_v0 = vpop.f32.mrb[1].mxu1 }
 0x3ae   :  { %v364_v1 = vpop.f32.mrb[2].mxu1 }
 0x3af   :  { %370 = vst.msk [vmem:[#allocation18] sm:$0xff] %vm152_vm0, %v368_v63  ;;  %v369_v2 = vadd.f32 %v364_v1, %v290_v62  ;;  %v486_v3 = vpop.f32.mrb[3].mxu1 }
 0x3b1   :  { %371 = vst.msk [vmem:[#allocation18 + $0x8] sm:$0xff] %vm152_vm0, %v369_v2 }
 0x3b6   :  { %v375_v4 = vld [vmem:[#allocation18] sm:$0xff] }
 0x3b7   :  { %v379_v5 = vsel %vm152_vm0, %v375_v4, 0.0 }
 0x3b8   :  { %380 = vadd.xlane.f32.xlu0 %v379_v5  ;;  %v376_v6 = vld [vmem:[#allocation18 + $0x8] sm:$0xff] }
 0x3b9   :  { %v382_v7 = vsel %vm152_vm0, %v376_v6, 0.0 }
 0x3ba   :  { %383 = vadd.xlane.f32.xlu1 %v382_v7 }
 0x445   :  { %v381_v8 = vpop.xlane.xlu0 %380 }
 0x446   :  { %v386_v9 = vmul.f32 0.03125, %v381_v8 }
 0x447   :  { %v384_v10 = vpop.xlane.xlu1 %383 }
 0x448   :  { %v388_v11 = vsub.f32 %v375_v4, %v386_v9  ;;  %v387_v12 = vmul.f32 0.03125, %v384_v10 }
 0x44a   :  { %v389_v13 = vsub.f32 %v376_v6, %v387_v12  ;;  %v390_v14 = vmul.f32 %v388_v11, %v388_v11 }
 0x44c   :  { %v392_v15 = vsel %vm152_vm0, %v390_v14, 0.0  ;;  %v391_v16 = vmul.f32 %v389_v13, %v389_v13 }
 0x44d   :  { %393 = vadd.xlane.f32.xlu0 %v392_v15 }
 0x44e   :  { %v395_v17 = vsel %vm152_vm0, %v391_v16, 0.0 }
 0x44f   :  { %396 = vadd.xlane.f32.xlu1 %v395_v17 }
 0x4da   :  { %v394_v18 = vpop.xlane.xlu0 %393 }
 0x4db   :  { %v398_v19 = vmul.f32 0.03125, %v394_v18 }
 0x4dc   :  { %v397_v20 = vpop.xlane.xlu1 %396 }
 0x4dd   :  { %v400_v21 = vadd.f32 1e-12, %v398_v19  ;;  %v399_v22 = vmul.f32 0.03125, %v397_v20 }
 0x4df   :  { %517 = vrsqrt.f32 %v400_v21  ;;  %v401_v23 = vadd.f32 1e-12, %v399_v22 }
 0x4e1   :  { %519 = vrsqrt.f32 %v401_v23 }
 0x4e9   :  { %v518_v24 = vpop.eup %517 }
 0x4ea   :  { %v404_v26 = vmul.f32 %v518_v24, %v388_v11 }
 0x4eb   :  { %v520_v27 = vpop.eup %519 }
 0x4ec   :  { %v412_v29 = vmul.f32 %v457_v25, %v404_v26  ;;  %v405_v30 = vmul.f32 %v520_v27, %v389_v13 }
 0x4ee   :  { %v420_v31 = vadd.f32 %v458_v28, %v412_v29  ;;  %v413_v32 = vmul.f32 %v457_v25, %v405_v30 }
 0x4f0   :  { %422 = vst.msk [vmem:[#allocation18] sm:$0xff] %vm152_vm0, %v420_v31  ;;  %v421_v33 = vadd.f32 %v458_v28, %v413_v32 }
 0x4f2   :  { %423 = vst.msk [vmem:[#allocation18 + $0x8] sm:$0xff] %vm152_vm0, %v421_v33 }
 0x4f3   :  { %730 = shalt.err (!%p727_p6)
}
 0x4f4   :  { %s731_s13 = scalar_lea.hbm %s977_s9, 256 }
 0x4f5   :  { %p732_p7 = scmp.ne.s32.totalorder %s977_s9, %s731_s13  ;;  %p735_p8 = scmp.lt.u32.totalorder %s731_s13, %s977_s9 }
 0x4f7   :  { %p737_p9 = pnand %p735_p8, %p732_p7 }
 0x4f9   :  { %740 = shalt.err (!%p737_p9)
}
 0x4fa   :  { %435 = dma.vmem_to_hbm [thread:$0]  %s430_s27, 256, %s977_s9, [#allocation5], %s760_s7, %s760_s7, %s761_s18  }
 0x4fb   :  { %751 = dma.done.wait [#allocation5], 256  }
 0x4fc   :  { %752 = vsyncadd [#allocation5], 4294967040 }
 0x4fd   :  { %439 = vsyncpa [#allocation4], 1 }
 0x4fe   :  { %440 = vsyncpa [#allocation7], 1 }
 0x4ff   :  { %441 = vsyncpa [#allocation10], 1 }
 0x500   :  { %442 = vsyncpa [#allocation13], 1 }
 0x501   :  { %443 = vsyncpa [#allocation16], 1 }
 0x502   :  { %444 = vsyncpa [#allocation5], 1 }

</bundles_post_ra>
